<compile_context>
chip_gen: v7x
topology: tpu7x:2x2x1
jax: 0.10.0
libtpu: 0.0.40
codegen_flags: <defaults>
</compile_context>

<pallas_src>
import functools

import jax
import jax.numpy as jnp
from jax import lax
from jax.experimental import pallas as pl
from jax.experimental.pallas import tpu as pltpu


def _round_up(x, m):
    return (x + m - 1) // m * m


def _pick_row_tile(n, h_out, w_out, max_tile_rows):
    """Pick the output-row tile TH.

    Constraints:
      * TH divides H_out,
      * TH*W_out <= max_tile_rows (bounds the output/accumulator footprint),
      * TH*W_out % 8 == 0 whenever the row axis is split (sublane rule),
      * if batch == 1, prefer >= 2 row tiles so both v7x TensorCores get work.
    """
    divisors = [d for d in range(1, h_out + 1) if h_out % d == 0]

    def legal(d):
        return d == h_out or (d * w_out) % 8 == 0

    budget = max(max_tile_rows, w_out)
    fitting = [d for d in divisors if legal(d) and d * w_out <= budget]
    if not fitting:
        fitting = [d for d in divisors if legal(d)] or [h_out]
    if n == 1:
        split = [d for d in fitting if d < h_out]
        if split:
            return max(split)
    return max(fitting)


def _conv_kernel(x_ref, w_ref, b_ref, o_ref, *,
                 stride, dilation, th, w_out, kh_sz, kw_sz):
    """One grid step == (batch element b, output-row tile t).

    x_ref : (1, Hp, Wp, Cp)       padded NHWC input (bf16); whole image,
                                  resident across the row-tile axis.
    w_ref : (KH*KW*Cp, O_pad)     fused-K weight matrix (bf16), resident.
    b_ref : (1, O_pad)            bias (f32).
    o_ref : (1, TH*W_out, O_pad)  lane-dense output slab.
    """
    t = pl.program_id(1)
    cp = x_ref.shape[-1]
    m = th * w_out

    row_step = th * stride
    row0 = t * row_step
    if row_step % 8 == 0:
        row0 = pl.multiple_of(row0, 8)

    # Build the im2col slab (M, KH*KW*Cp): one small load per tap, fused along
    # the lane axis.  Zero-padded channels contribute exactly zero.
    taps = []
    if stride == 1:
        for kh in range(kh_sz):
            for kw in range(kw_sz):
                p = x_ref[0,
                          pl.ds(row0 + kh * dilation, th),
                          pl.ds(kw * dilation, w_out),
                          :]                               # (TH, W_out, Cp)
                taps.append(p.reshape(m, cp))
    else:
        # Strided fallback: load the halo window once and slice per tap.
        th_in = (th - 1) * stride + (kh_sz - 1) * dilation + 1
        xwin = x_ref[0, pl.ds(row0, th_in)]                # (TH_in, Wp, Cp)
        for kh in range(kh_sz):
            for kw in range(kw_sz):
                h0 = kh * dilation
                w0 = kw * dilation
                p = lax.slice(
                    xwin,
                    (h0, w0, 0),
                    (h0 + (th - 1) * stride + 1,
                     w0 + (w_out - 1) * stride + 1,
                     cp),
                    (stride, stride, 1))                   # (TH, W_out, Cp)
                taps.append(p.reshape(m, cp))

    patch = jnp.concatenate(taps, axis=-1)                 # (M, KH*KW*Cp) bf16

    # Single fused MXU contraction with f32 accumulation; one store.
    acc = jnp.dot(patch, w_ref[...], preferred_element_type=jnp.float32)
    o_ref[0] = (acc + b_ref[...]).astype(o_ref.dtype)


def conv2d_pallas_nhwc(x_nhwc, weight_oihw, bias, *, stride=1, padding=0,
                       dilation=1, max_tile_rows=512, out_dtype=jnp.float32):
    """NHWC-native conv; returns (N, H_out, W_out, O) in `out_dtype`."""
    n, h, w, c = x_nhwc.shape
    o, ci, kh, kw = weight_oihw.shape
    assert ci == c, (ci, c)

    h_out = (h + 2 * padding - dilation * (kh - 1) - 1) // stride + 1
    w_out = (w + 2 * padding - dilation * (kw - 1) - 1) // stride + 1
    hp, wp = h + 2 * padding, w + 2 * padding

    # bf16-friendly channel padding (16 packs per sublane group) and a
    # full-lane-tile out-channel pad (256-multiple for wide O on v6e/v7x MXUs).
    cp = max(16, _round_up(c, 16))
    o_pad = _round_up(o, 256) if o > 128 else 128
    k_fused = kh * kw * cp

    # Input: pad spatial + channels, cast to bf16 (f32 MXU accumulation later).
    x = jnp.pad(x_nhwc, ((0, 0), (padding, padding), (padding, padding),
                         (0, cp - c))).astype(jnp.bfloat16)

    # Weights: OIHW -> (KH, KW, Cp, O_pad) -> (KH*KW*Cp, O_pad).  Row order
    # (kh, kw, c) matches the in-kernel tap concat order; padded rows/cols
    # contribute exactly zero.
    w_t = jnp.transpose(weight_oihw, (2, 3, 1, 0))         # (KH, KW, C, O)
    w_t = jnp.pad(w_t, ((0, 0), (0, 0), (0, cp - c), (0, o_pad - o)))
    w_t = w_t.reshape(k_fused, o_pad).astype(jnp.bfloat16)

    if bias is None:
        b2 = jnp.zeros((1, o_pad), jnp.float32)
    else:
        b2 = jnp.pad(bias.astype(jnp.float32), (0, o_pad - o)).reshape(1, o_pad)

    th = _pick_row_tile(n, h_out, w_out, max_tile_rows)
    num_t = h_out // th
    m_tile = th * w_out

    # VMEM budget from the real block sizes (double-buffered inputs/outputs)
    # plus the in-kernel im2col slab / f32 accumulator, with headroom.
    out_bytes = jnp.dtype(out_dtype).itemsize
    vmem_needed = (
        2 * hp * wp * cp * 2                # image block x 2 buffers (bf16)
        + 2 * k_fused * o_pad * 2           # weights x 2 buffers (bf16)
        + 2 * o_pad * 4                     # bias x 2
        + 2 * m_tile * o_pad * out_bytes    # output block x 2 buffers
        + m_tile * k_fused * 2              # im2col slab
        + m_tile * o_pad * 4)               # f32 accumulator value
    vmem_limit = int(min(max(vmem_needed * 5 // 4 + (4 << 20), 32 << 20),
                         100 << 20))

    kernel = functools.partial(
        _conv_kernel, stride=stride, dilation=dilation, th=th, w_out=w_out,
        kh_sz=kh, kw_sz=kw)

    cost = pl.CostEstimate(
        flops=2 * n * h_out * w_out * kh * kw * c * o,
        transcendentals=0,
        bytes_accessed=(n * hp * wp * cp * 2 + k_fused * o_pad * 2
                        + o_pad * 4 + n * h_out * w_out * o_pad * out_bytes))

    out_flat = pl.pallas_call(
        kernel,
        out_shape=jax.ShapeDtypeStruct((n, h_out * w_out, o_pad), out_dtype),
        grid=(n, num_t),
        in_specs=[
            pl.BlockSpec((1, hp, wp, cp), lambda b, t: (b, 0, 0, 0)),
            pl.BlockSpec((k_fused, o_pad), lambda b, t: (0, 0)),
            pl.BlockSpec((1, o_pad), lambda b, t: (0, 0)),
        ],
        out_specs=pl.BlockSpec((1, m_tile, o_pad), lambda b, t: (b, t, 0)),
        compiler_params=pltpu.CompilerParams(
            dimension_semantics=("parallel", "parallel"),
            vmem_limit_bytes=vmem_limit),
        cost_estimate=cost,
    )(x, w_t, b2)

    out = out_flat.reshape(n, h_out, w_out, o_pad)[..., :o]
    return out


def conv2d_pallas(x_nchw, weight, bias, *, stride=1, padding=0, dilation=1):
    """Matches torch.nn.Conv2d(...)(x): NCHW input, OIHW weight, NCHW output."""
    # NOTE: NHWC-native callers should use conv2d_pallas_nhwc directly and skip
    # these two full-tensor transposes (HBM-bandwidth glue only).
    x = jnp.transpose(x_nchw, (0, 2, 3, 1))
    out_nhwc = conv2d_pallas_nhwc(x, weight, bias, stride=stride,
                                  padding=padding, dilation=dilation)
    return jnp.transpose(out_nhwc, (0, 3, 1, 2)).astype(x_nchw.dtype)


def make_conv_params(key, in_channels, out_channels, kernel_size, bias=True):
    """Deterministic MSRA (kaiming_normal_, fan_in, gain=sqrt(2)) init."""
    fan_in = in_channels * kernel_size * kernel_size
    std = jnp.sqrt(2.0 / fan_in)
    w = std * jax.random.normal(
        key, (out_channels, in_channels, kernel_size, kernel_size), jnp.float32)
    b = jnp.zeros((out_channels,), jnp.float32) if bias else None
    return w, b


if __name__ == "__main__":
    key = jax.random.PRNGKey(0)
    kx, kw_key = jax.random.split(key)

    N, C_IN, H, W = 2, 4, 16, 16
    C_OUT, K = 8, 3
    STRIDE, PAD, DIL = 1, 1, 1

    x = jax.random.normal(kx, (N, C_IN, H, W), jnp.float32)
    weight, bias = make_conv_params(kw_key, C_IN, C_OUT, K, bias=True)

    out = conv2d_pallas(x, weight, bias, stride=STRIDE, padding=PAD, dilation=DIL)
    out = jax.block_until_ready(out)

    # Reference with the same bf16 input/weight quantization + f32 accumulation.
    x_q = x.astype(jnp.bfloat16).astype(jnp.float32)
    w_q = weight.astype(jnp.bfloat16).astype(jnp.float32)
    ref = lax.conv_general_dilated(
        x_q, w_q,
        window_strides=(STRIDE, STRIDE),
        padding=((PAD, PAD), (PAD, PAD)),
        rhs_dilation=(DIL, DIL),
        dimension_numbers=("NCHW", "OIHW", "NCHW"),
        precision=lax.Precision.HIGHEST,
    ) + bias[None, :, None, None]

    assert out.shape == ref.shape, (out.shape, ref.shape)
    err = float(jnp.max(jnp.abs(out - ref)))
    assert err < 2e-2, err
    print("KERNEL_OK")
</pallas_src>

<mosaic_0001>
module attributes {stable_mosaic.version = 11 : i64} {
  func.func @_conv_kernel(%arg0: i32, %arg1: i32, %arg2: memref<1x18x18x16xbf16, #tpu.memory_space<vmem>>, %arg3: memref<144x128xbf16, #tpu.memory_space<vmem>>, %arg4: memref<1x128xf32, #tpu.memory_space<vmem>>, %arg5: memref<1x256x128xf32, #tpu.memory_space<vmem>>) attributes {dimension_semantics = [#tpu.dimension_semantics<parallel>, #tpu.dimension_semantics<parallel>], iteration_bounds = array<i64: 2, 1>, scalar_prefetch = 0 : i64, scratch_operands = 0 : i64, tpu.core_type = #tpu.core_type<tc>, window_params = [{transform_indices = @transform_0, window_bounds = array<i64: 1, 18, 18, 16>}, {pipeline_mode = #tpu.pipeline_mode<synchronous>, transform_indices = @transform_1, window_bounds = array<i64: 144, 128>}, {pipeline_mode = #tpu.pipeline_mode<synchronous>, transform_indices = @transform_2, window_bounds = array<i64: 1, 128>}, {transform_indices = @transform_3, window_bounds = array<i64: 1, 256, 128>}]} {
    %c16_i32 = arith.constant 16 : i32
    %0 = arith.muli %arg1, %c16_i32 : i32
    %1 = tpu.assume_multiple %0, 8 : i32
    %c0_i32 = arith.constant 0 : i32
    %2 = arith.addi %1, %c0_i32 : i32
    %c0 = arith.constant 0 : index
    %3 = arith.index_cast %2 : i32 to index
    %c0_0 = arith.constant 0 : index
    %c0_1 = arith.constant 0 : index
    %4 = vector.load %arg2[%c0, %3, %c0_0, %c0_1] : memref<1x18x18x16xbf16, #tpu.memory_space<vmem>>, vector<1x16x16x16xbf16>
    %5 = vector.shape_cast %4 : vector<1x16x16x16xbf16> to vector<16x16x16xbf16>
    %6 = vector.shape_cast %5 : vector<16x16x16xbf16> to vector<256x16xbf16>
    %c0_i32_2 = arith.constant 0 : i32
    %7 = arith.addi %1, %c0_i32_2 : i32
    %c0_3 = arith.constant 0 : index
    %8 = arith.index_cast %7 : i32 to index
    %c1 = arith.constant 1 : index
    %c0_4 = arith.constant 0 : index
    %9 = vector.load %arg2[%c0_3, %8, %c1, %c0_4] : memref<1x18x18x16xbf16, #tpu.memory_space<vmem>>, vector<1x16x16x16xbf16>
    %10 = vector.shape_cast %9 : vector<1x16x16x16xbf16> to vector<16x16x16xbf16>
    %11 = vector.shape_cast %10 : vector<16x16x16xbf16> to vector<256x16xbf16>
    %c0_i32_5 = arith.constant 0 : i32
    %12 = arith.addi %1, %c0_i32_5 : i32
    %c0_6 = arith.constant 0 : index
    %13 = arith.index_cast %12 : i32 to index
    %c2 = arith.constant 2 : index
    %c0_7 = arith.constant 0 : index
    %14 = vector.load %arg2[%c0_6, %13, %c2, %c0_7] : memref<1x18x18x16xbf16, #tpu.memory_space<vmem>>, vector<1x16x16x16xbf16>
    %15 = vector.shape_cast %14 : vector<1x16x16x16xbf16> to vector<16x16x16xbf16>
    %16 = vector.shape_cast %15 : vector<16x16x16xbf16> to vector<256x16xbf16>
    %c1_i32 = arith.constant 1 : i32
    %17 = arith.addi %1, %c1_i32 : i32
    %c0_8 = arith.constant 0 : index
    %18 = arith.index_cast %17 : i32 to index
    %c0_9 = arith.constant 0 : index
    %c0_10 = arith.constant 0 : index
    %19 = vector.load %arg2[%c0_8, %18, %c0_9, %c0_10] : memref<1x18x18x16xbf16, #tpu.memory_space<vmem>>, vector<1x16x16x16xbf16>
    %20 = vector.shape_cast %19 : vector<1x16x16x16xbf16> to vector<16x16x16xbf16>
    %21 = vector.shape_cast %20 : vector<16x16x16xbf16> to vector<256x16xbf16>
    %c1_i32_11 = arith.constant 1 : i32
    %22 = arith.addi %1, %c1_i32_11 : i32
    %c0_12 = arith.constant 0 : index
    %23 = arith.index_cast %22 : i32 to index
    %c1_13 = arith.constant 1 : index
    %c0_14 = arith.constant 0 : index
    %24 = vector.load %arg2[%c0_12, %23, %c1_13, %c0_14] : memref<1x18x18x16xbf16, #tpu.memory_space<vmem>>, vector<1x16x16x16xbf16>
    %25 = vector.shape_cast %24 : vector<1x16x16x16xbf16> to vector<16x16x16xbf16>
    %26 = vector.shape_cast %25 : vector<16x16x16xbf16> to vector<256x16xbf16>
    %c1_i32_15 = arith.constant 1 : i32
    %27 = arith.addi %1, %c1_i32_15 : i32
    %c0_16 = arith.constant 0 : index
    %28 = arith.index_cast %27 : i32 to index
    %c2_17 = arith.constant 2 : index
    %c0_18 = arith.constant 0 : index
    %29 = vector.load %arg2[%c0_16, %28, %c2_17, %c0_18] : memref<1x18x18x16xbf16, #tpu.memory_space<vmem>>, vector<1x16x16x16xbf16>
    %30 = vector.shape_cast %29 : vector<1x16x16x16xbf16> to vector<16x16x16xbf16>
    %31 = vector.shape_cast %30 : vector<16x16x16xbf16> to vector<256x16xbf16>
    %c2_i32 = arith.constant 2 : i32
    %32 = arith.addi %1, %c2_i32 : i32
    %c0_19 = arith.constant 0 : index
    %33 = arith.index_cast %32 : i32 to index
    %c0_20 = arith.constant 0 : index
    %c0_21 = arith.constant 0 : index
    %34 = vector.load %arg2[%c0_19, %33, %c0_20, %c0_21] : memref<1x18x18x16xbf16, #tpu.memory_space<vmem>>, vector<1x16x16x16xbf16>
    %35 = vector.shape_cast %34 : vector<1x16x16x16xbf16> to vector<16x16x16xbf16>
    %36 = vector.shape_cast %35 : vector<16x16x16xbf16> to vector<256x16xbf16>
    %c2_i32_22 = arith.constant 2 : i32
    %37 = arith.addi %1, %c2_i32_22 : i32
    %c0_23 = arith.constant 0 : index
    %38 = arith.index_cast %37 : i32 to index
    %c1_24 = arith.constant 1 : index
    %c0_25 = arith.constant 0 : index
    %39 = vector.load %arg2[%c0_23, %38, %c1_24, %c0_25] : memref<1x18x18x16xbf16, #tpu.memory_space<vmem>>, vector<1x16x16x16xbf16>
    %40 = vector.shape_cast %39 : vector<1x16x16x16xbf16> to vector<16x16x16xbf16>
    %41 = vector.shape_cast %40 : vector<16x16x16xbf16> to vector<256x16xbf16>
    %c2_i32_26 = arith.constant 2 : i32
    %42 = arith.addi %1, %c2_i32_26 : i32
    %c0_27 = arith.constant 0 : index
    %43 = arith.index_cast %42 : i32 to index
    %c2_28 = arith.constant 2 : index
    %c0_29 = arith.constant 0 : index
    %44 = vector.load %arg2[%c0_27, %43, %c2_28, %c0_29] : memref<1x18x18x16xbf16, #tpu.memory_space<vmem>>, vector<1x16x16x16xbf16>
    %45 = vector.shape_cast %44 : vector<1x16x16x16xbf16> to vector<16x16x16xbf16>
    %46 = vector.shape_cast %45 : vector<16x16x16xbf16> to vector<256x16xbf16>
    %47 = tpu.concatenate %6, %11, %16, %21, %26, %31, %36, %41, %46 in 1 : vector<256x16xbf16>, vector<256x16xbf16>, vector<256x16xbf16>, vector<256x16xbf16>, vector<256x16xbf16>, vector<256x16xbf16>, vector<256x16xbf16>, vector<256x16xbf16>, vector<256x16xbf16> -> vector<256x144xbf16>
    %c0_30 = arith.constant 0 : index
    %c0_31 = arith.constant 0 : index
    %48 = vector.load %arg3[%c0_30, %c0_31] : memref<144x128xbf16, #tpu.memory_space<vmem>>, vector<144x128xbf16>
    %cst = arith.constant dense<0.000000e+00> : vector<256x128xf32>
    %49 = tpu.matmul %47, %48, %cst {dimension_numbers = #tpu.dot_dimension_numbers<[1], [0], [0], [1], [0, 0, 1, 1], [], []>} : vector<256x144xbf16>, vector<144x128xbf16>, vector<256x128xf32> -> vector<256x128xf32>
    %c0_32 = arith.constant 0 : index
    %c0_33 = arith.constant 0 : index
    %50 = vector.load %arg4[%c0_32, %c0_33] : memref<1x128xf32, #tpu.memory_space<vmem>>, vector<1x128xf32>
    %51 = vector.broadcast %50 : vector<1x128xf32> to vector<256x128xf32>
    %52 = arith.addf %49, %51 : vector<256x128xf32>
    %c0_34 = arith.constant 0 : index
    %c0_35 = arith.constant 0 : index
    %c0_36 = arith.constant 0 : index
    %53 = vector.load %arg5[%c0_34, %c0_35, %c0_36] : memref<1x256x128xf32, #tpu.memory_space<vmem>>, vector<1x256x128xf32>
    %54 = vector.shape_cast %53 : vector<1x256x128xf32> to vector<256x128xf32>
    %55 = vector.shape_cast %52 : vector<256x128xf32> to vector<1x256x128xf32>
    tpu.vector_store %arg5[%c0_34, %c0_35, %c0_36], %55 {strides = array<i32>} : memref<1x256x128xf32, #tpu.memory_space<vmem>>, vector<1x256x128xf32>,
    return
  }
  func.func @transform_0(%arg0: i32, %arg1: i32) -> (i32, i32, i32, i32) {
    %c0_i32 = arith.constant 0 : i32
    %c0_i32_0 = arith.constant 0 : i32
    %c0_i32_1 = arith.constant 0 : i32
    %c0_i32_2 = arith.constant 0 : i32
    return %arg0, %c0_i32, %c0_i32_0, %c0_i32_1 : i32, i32, i32, i32
  }
  func.func @transform_1(%arg0: i32, %arg1: i32) -> (i32, i32) {
    %c0_i32 = arith.constant 0 : i32
    %c0_i32_0 = arith.constant 0 : i32
    %c0_i32_1 = arith.constant 0 : i32
    return %c0_i32, %c0_i32_0 : i32, i32
  }
  func.func @transform_2(%arg0: i32, %arg1: i32) -> (i32, i32) {
    %c0_i32 = arith.constant 0 : i32
    %c0_i32_0 = arith.constant 0 : i32
    %c0_i32_1 = arith.constant 0 : i32
    return %c0_i32, %c0_i32_0 : i32, i32
  }
  func.func @transform_3(%arg0: i32, %arg1: i32) -> (i32, i32, i32) {
    %c0_i32 = arith.constant 0 : i32
    %c0_i32_0 = arith.constant 0 : i32
    return %arg0, %arg1, %c0_i32 : i32, i32, i32
  }
}

</mosaic_0001>

<bundles_post_ra>
// kernel: tpu_custom_call.1
= control target key start
LH: loop header
LB: loop body
LE: loop exit
PB: predicated region body
PF: predicated region fallthrough
CT: control target
= control target key end

     0   :  { %8 = vsyncpa [#allocation3], 0  ;;  %s5890_s0 = inlined_call_operand.vmem [shape: bf16[2,18,18,16], index: 0, kind: input, shape index: {}]   ;;  %s5891_s1 = inlined_call_operand.vmem [shape: bf16[144,128], index: 1, kind: input, shape index: {}]   ;;  %s5892_s2 = inlined_call_operand.vmem [shape: f32[1,128], index: 2, kind: input, shape index: {}]   ;;  %s5893_s3 = inlined_call_operand.hbm [shape: f32[2,256,128], index: 3, kind: output, shape index: {}]  }
   0x1   :  { %10 = vsyncpa [#allocation3 + $0x1], 0  ;;  %s4056_s12 = smov 0   ;;  %s4058_s13 = smov 0  }
   0x2   :  { %s4060_s14 = smov 0   ;;  %s4062_s15 = smov 0  }
   0x3   :  { %s4064_s16 = smov 0   ;;  %s4066_s17 = smov 0  }
   0x4 LB: > { %s3413_s18 = sadd.s32 4294967295, %s4023_s17   ;;  %s3414_s19 = sadd.s32 4294967294, %s4023_s17   ;;  %s4023_s17 = sphi %s4066_s17, %s16_s17   ;;  %s4019_s16 = sphi %s4064_s16, %s5938_s16   ;;  %s4015_s15 = sphi %s4062_s15, %s5937_s15   ;;  %s4011_s14 = sphi %s4060_s14, %s5936_s14   ;;  %s4007_s13 = sphi %s4058_s13, %s5935_s13   ;;  %s4003_s12 = sphi %s4056_s12, %s5934_s12  }
   0x5   : > { %s28_s20 = sadd.s32 1, %s4019_s16  ;;  %s105_s21 = sadd.s32 1, %s4011_s14 }
   0x6   : > { %p30_p0 = scmp.ge.s32.totalorder %s28_s20, 2  ;;  %p115_p1 = scmp.ne.s32.totalorder %s4011_s14, %s4007_s13 }
   0x7   : > { %p116_p2 = scmp.eq.s32.totalorder %s3413_s18, 1  ;;  %p121_p3 = scmp.ne.s32.totalorder %s4007_s13, %s4003_s12 }
   0x8   : > { %s5940_s20 = smov (%p30_p0, %s28_s20), 0  ;;  %p122_p5 = scmp.eq.s32.totalorder %s3414_s19, 1 }
   0x9   : > { %p4096_p4 = por %p116_p2, %p115_p1  ;;  %s100_s23 = ssub.s32 %s4019_s16, %s5940_s20 }
   0xa   : > { %p3417_p6 = scmp.ge.s32.totalorder %s4023_s17, 1  ;;  %p103_p7 = scmp.eq.s32.totalorder %s100_s23, 0 }
   0xb   : > { %p4103_p8 = por %p122_p5, %p121_p3  ;;  %p154_p9 = scmp.lt.s32.totalorder %s4023_s17, 3 }
   0xc   : > { %s4109_s25 = scalar_select %p103_p7, %s4011_s14, %s105_s21  }
   0xd   : > { %p155_p10 = pnand %p3417_p6, %p154_p9 }
   0xf   : > { %158 = sbr.rel (%p155_p10) target bundleno = 679 (0x2a7), region = 32 }
  0x16   : > { %p178_p11 = scmp.lt.s32.totalorder %s4015_s15, 1  ;;  %vm688_vm0 = vcmask 1042432   ;;  %vm689_vm1 = vcmask 1046532   ;;  %s4025_s4 = smov 48   ;;  %vm237_vm3 = vsmask.f32 3328 }
  0x17   : > { %vm4140_vm2 = vmor %vm688_vm0, %vm689_vm1  ;;  %vm238_vm4 = vsmask.f32 7440  ;;  %s4026_s5 = smov 80   ;;  %s4027_s6 = smov 32   ;;  %vm2731_vm6 = vcmask 130048   ;;  %vm2780_vm7 = vcmask 261120  }
  0x18   : > { %s179_s26 = scalar_select %p178_p11, %s4015_s15, 1  ;;  %vm4184_vm5 = vmor %vm237_vm3, %vm238_vm4  ;;  %vm2813_vm8 = vcmask 392192   ;;  %vm2846_vm9 = vcmask 523264   ;;  %vm2879_vm10 = vcmask 654336   ;;  %vm2912_vm11 = vcmask 785408  }
  0x19   : > { %s4028_s7 = smov 16   ;;  %s4029_s8 = smov 64   ;;  %vm2945_vm12 = vcmask 916480  }
  0x1a   : > { %s3790_s27 = smul.u32 216, %s179_s26  ;;  %s4030_s9 = smov 96  }
  0x1b   : > { %s4031_s10 = smov 112   ;;  %s4033_s21 = smov [#allocation2]  }
  0x1c   : > { %s4116_s30 = scalar_lea.vmem %s5890_s0, %s3790_s27  ;;  %s3949_s23 = sshll.u32 %s4033_s21, 4  ;;  %s3950_s23 = int_to_ptr.vmem [resolvable:$false] %s3949_s23 }
  0x1d   : > { %v3452_v0 = vld [vmem:[%s4116_s30 + $0x6c] sm:$0xf]  ;;  %v4120_v1 = vld [vmem:[%s4116_s30 + $0x70] sm:$0xf]  ;;  %v4133_v12 = vld [vmem:[%s4116_s30 + $0x14] sm:$0x1] }
  0x1e   : > { %v3436_v2 = vld [vmem:[%s4116_s30 + $0xc] sm:$0xf]  ;;  %v1057_v3 = vshll.u32 %v4120_v1, 16  ;;  %v1061_v4 = vshrl.u32 %v4120_v1, 16  ;;  %v3652_v5 = vcombine.low %v3452_v0, %v4120_v1  ;;  %v1048_v6 = vshrl.u32 %v3452_v0, 16  ;;  %s3951_s26 = scalar_lea.vmem %s3950_s23, 8192 }
  0x1f   : > { %v4127_v7 = vld [vmem:[%s4116_s30 + $0x10] sm:$0xf]  ;;  %v1051_v8 = vshll.u32 %v3452_v0, 16  ;;  %v856_v15 = vshrl.u32 %v3436_v2, 16  ;;  %v859_v16 = vshll.u32 %v3436_v2, 16  ;;  %v1308_v26 = vrot.slane %v4133_v12, 5 }
  0x20   : > { %v865_v9 = vshll.u32 %v4127_v7, 16  ;;  %v869_v10 = vshrl.u32 %v4127_v7, 16  ;;  %v3644_v11 = vcombine.low %v3436_v2, %v4127_v7  ;;  %v4135_v13 = vrot.slane %v1061_v4, 4  ;;  %2331 = vrot.lane.b32.xlu1 %v3652_v5, %s4025_s4  ;;  %v3484_v18 = vld [vmem:[%s4116_s30 + $0xc] sm:$0xe] }
  0x21   : > { %v1050_v14 = vrot.slane %v1048_v6, 4  ;;  %v1053_v19 = vrot.slane %v1051_v8, 5  ;;  %v3500_v21 = vrot.slane %v3484_v18, 9  ;;  %v1305_v22 = vrot.slane %v4127_v7, 5  ;;  %v190_v23 = vld [vmem:[%s4116_s30 + $0x4] sm:$0xf] }
  0x22   : > { %v4145_v20 = vrot.slane %v869_v10, 4  ;;  %2315 = vrot.lane.b32.xlu0 %v3644_v11, %s4025_s4  ;;  %v858_v24 = vrot.slane %v856_v15, 4  ;;  %v861_v25 = vrot.slane %v859_v16, 5  ;;  %v221_v27 = vld [vmem:[%s4116_s30 + $0x8] sm:$0x1]  ;;  %v693_v28 = vrot.slane %v190_v23, 5 }
  0x23   : > { %v1054_v29 = vor.u32 %v1053_v19, %v1050_v14  ;;  %v1306_v30 = vsel %vm4140_vm2, %v3500_v21, %v1305_v22  ;;  %v1307_v31 = vrot.slane %v1305_v22, 4  ;;  %v624_v32 = vld [vmem:[%s4116_s30] sm:$0xe]  ;;  %v696_v33 = vrot.slane %v221_v27, 5  ;;  %v206_v34 = vld [vmem:[%s4116_s30 + $0x64] sm:$0xf] }
  0x24   : > { %v862_v35 = vor.u32 %v861_v25, %v858_v24  ;;  %v3420_v36 = vrot.slane %v624_v32, 9  ;;  %v695_v37 = vrot.slane %v693_v28, 4  ;;  %v229_v38 = vld [vmem:[%s4116_s30 + $0x68] sm:$0x1]  ;;  %v632_v39 = vld [vmem:[%s4116_s30 + $0x60] sm:$0xe] }
  0x25   : > { %v4158_v40 = vrot.slane %v1054_v29, 4  ;;  %v1309_v41 = vsel %vm4140_vm2, %v1307_v31, %v1308_v26  ;;  %v3428_v42 = vrot.slane %v632_v39, 9  ;;  %v749_v43 = vrot.slane %v206_v34, 5  ;;  %v189_v44 = vld [vmem:[%s4116_s30] sm:$0xf] }
  0x26   : > { %v4163_v45 = vrot.slane %v862_v35, 4  ;;  %v3676_v46 = vcombine.low %v1306_v30, %v1309_v41  ;;  %v694_v47 = vsel %vm4140_vm2, %v3420_v36, %v693_v28  ;;  %v697_v48 = vsel %vm4140_vm2, %v695_v37, %v696_v33  ;;  %v3492_v49 = vld [vmem:[%s4116_s30 + $0x6c] sm:$0xe]  ;;  %v3476_v58 = vld [vmem:[%s4116_s30 + $0x74] sm:$0x1] }
  0x27   : > { %v3628_v50 = vcombine.low %v694_v47, %v697_v48  ;;  %v750_v51 = vsel %vm4140_vm2, %v3428_v42, %v749_v43  ;;  %v751_v52 = vrot.slane %v749_v43, 4  ;;  %v752_v53 = vrot.slane %v229_v38, 5  ;;  %v205_v63 = vld [vmem:[%s4116_s30 + $0x60] sm:$0xf]  ;;  %v3532_v42 = vld [vmem:[%s4116_s30 + $0x78] sm:$0xf] }
  0x28   : > { %2475 = vrot.lane.b32.xlu0 %v3676_v46, %s4026_s5  ;;  %v241_v54 = vshrl.u32 %v189_v44, 16  ;;  %v244_v55 = vshll.u32 %v189_v44, 16  ;;  %v250_v56 = vshll.u32 %v190_v23, 16  ;;  %v254_v57 = vshrl.u32 %v190_v23, 16 }
  0x29   : > { %2219 = vrot.lane.b32.xlu1 %v3628_v50, %s4027_s6  ;;  %v753_v59 = vsel %vm4140_vm2, %v751_v52, %v752_v53  ;;  %v260_v60 = vshll.u32 %v221_v27, 16  ;;  %v3508_v61 = vrot.slane %v3492_v49, 9  ;;  %v1361_v62 = vrot.slane %v4120_v1, 5 }
  0x2a   : > { %v3636_v0 = vcombine.low %v750_v51, %v753_v59  ;;  %v243_v2 = vrot.slane %v241_v54, 4  ;;  %v246_v4 = vrot.slane %v244_v55, 5  ;;  %v252_v5 = vrot.slane %v250_v56, 5  ;;  %v3516_v51 = vld [vmem:[%s4116_s30 + $0x18] sm:$0xf] }
  0x2b   : > { %v256_v6 = vrot.slane %v254_v57, 4  ;;  %v262_v8 = vrot.slane %v260_v60, 5  ;;  %v1362_v10 = vsel %vm4140_vm2, %v3508_v61, %v1361_v62  ;;  %v1363_v11 = vrot.slane %v1361_v62, 4  ;;  %v3556_v62 = vld [vmem:[%s4116_s30 + $0x80] sm:$0x1] }
  0x2c   : > { %v247_v14 = vor.u32 %v246_v4, %v243_v2  ;;  %v1364_v15 = vrot.slane %v3476_v58, 5  ;;  %v433_v16 = vshrl.u32 %v205_v63, 16  ;;  %v436_v18 = vshll.u32 %v205_v63, 16 }
  0x2d   : > { %2235 = vrot.lane.b32.xlu1 %v3636_v0, %s4027_s6  ;;  %v257_v21 = vor.u32 %v256_v6, %v252_v5  ;;  %v442_v22 = vshll.u32 %v206_v34, 16  ;;  %v446_v23 = vshrl.u32 %v206_v34, 16  ;;  %v452_v24 = vshll.u32 %v229_v38, 16 }
  0x2e   : > { %v248_v25 = vrot.slane %v247_v14, 4  ;;  %v1365_v26 = vsel %vm4140_vm2, %v1363_v11, %v1364_v15  ;;  %v435_v27 = vrot.slane %v433_v16, 4  ;;  %v438_v28 = vrot.slane %v436_v18, 5  ;;  %v207_v14 = vld [vmem:[%s4116_s30 + $0x6c] sm:$0xf] }
  0x2f   : > { %v258_v29 = vrot.slane %v257_v21, 4  ;;  %v3684_v30 = vcombine.low %v1362_v10, %v1365_v26  ;;  %v444_v31 = vrot.slane %v442_v22, 5  ;;  %v448_v32 = vrot.slane %v446_v23, 4  ;;  %v208_v26 = vld [vmem:[%s4116_s30 + $0x70] sm:$0xf] }
  0x30   : > { %v253_v33 = vsel %vm4184_vm5, %v248_v25, %v252_v5  ;;  %v439_v35 = vor.u32 %v438_v28, %v435_v27  ;;  %v454_v36 = vrot.slane %v452_v24, 5  ;;  %v1059_v34 = vrot.slane %v1057_v3, 5  ;;  %v3533_v3 = vld [vmem:[%s4116_s30 + $0x7c] sm:$0xf]  ;;  %v3548_v5 = vld [vmem:[%s4116_s30 + $0x20] sm:$0x1] }
  0x31   : > { %v263_v37 = vsel %vm4184_vm5, %v258_v29, %v262_v8  ;;  %2491 = vrot.lane.b32.xlu1 %v3684_v30, %s4026_s5  ;;  %v449_v38 = vor.u32 %v448_v32, %v444_v31  ;;  %v1067_v39 = vshll.u32 %v3476_v58, 16  ;;  %v867_v41 = vrot.slane %v865_v9, 5  ;;  %v4229_v30 = vld [vmem:[%s4116_s30 + $0x74] sm:$0x1] }
  0x32   : > { %v3612_v43 = vcombine.low %v253_v33, %v263_v37  ;;  %v440_v44 = vrot.slane %v439_v35, 4  ;;  %v1060_v46 = vsel %vm4184_vm5, %v4158_v40, %v1059_v34  ;;  %v1064_v1 = vor.u32 %v4135_v13, %v1059_v34  ;;  %v191_v34 = vld [vmem:[%s4116_s30 + $0xc] sm:$0xf] }
  0x33   : > { %v450_v47 = vrot.slane %v449_v38, 4  ;;  %v1069_v48 = vrot.slane %v1067_v39, 5  ;;  %v868_v49 = vsel %vm4184_vm5, %v4163_v45, %v867_v41  ;;  %v872_v7 = vor.u32 %v4145_v20, %v867_v41  ;;  %v3517_v20 = vld [vmem:[%s4116_s30 + $0x1c] sm:$0xf] }
  0x34   : > { %2139 = vrot.lane.b32.xlu0 %v3612_v43, %s4028_s7  ;;  %v445_v9 = vsel %vm4184_vm5, %v440_v44, %v444_v31  ;;  %v1065_v50 = vrot.slane %v1064_v1, 4  ;;  %v875_v40 = vshll.u32 %v4133_v12, 16  ;;  %v1660_v13 = vshrl.u32 %v3532_v42, 16 }
  0x35   : > { %v455_v52 = vsel %vm4184_vm5, %v450_v47, %v454_v36  ;;  %v873_v53 = vrot.slane %v872_v7, 4  ;;  %v1663_v54 = vshll.u32 %v3532_v42, 16  ;;  %v1673_v45 = vshrl.u32 %v3533_v3, 16 }
  0x36   : > { %v3620_v55 = vcombine.low %v445_v9, %v455_v52  ;;  %v1070_v56 = vsel %vm4184_vm5, %v1065_v50, %v1069_v48  ;;  %v877_v57 = vrot.slane %v875_v40, 5  ;;  %v1662_v58 = vrot.slane %v1660_v13, 4  ;;  %v192_v48 = vld [vmem:[%s4116_s30 + $0x10] sm:$0xf]  ;;  %v222_v13 = vld [vmem:[%s4116_s30 + $0x14] sm:$0x1] }
  0x37   : > { %v3668_v59 = vcombine.low %v1060_v46, %v1070_v56  ;;  %v1665_v60 = vrot.slane %v1663_v54, 5  ;;  %v3700_v12 = vcombine.low %v3532_v42, %v3533_v3  ;;  %v1468_v61 = vshrl.u32 %v3516_v51, 16 }
  0x38   : > { %2155 = vrot.lane.b32.xlu0 %v3620_v55, %s4028_s7  ;;  %v878_v63 = vsel %vm4184_vm5, %v873_v53, %v877_v57  ;;  %v1471_v0 = vshll.u32 %v3516_v51, 16  ;;  %v1481_v2 = vshrl.u32 %v3517_v20, 16  ;;  %v3692_v4 = vcombine.low %v3516_v51, %v3517_v20  ;;  %v633_v51 = vld [vmem:[%s4116_s30 + $0x6c] sm:$0xe] }
  0x39   : > { %2411 = vrot.lane.b32.xlu1 %v3668_v59, %s4029_s8  ;;  %v3660_v6 = vcombine.low %v868_v49, %v878_v63  ;;  %v1470_v8 = vrot.slane %v1468_v61, 4  ;;  %v1666_v10 = vor.u32 %v1665_v60, %v1662_v58  ;;  %v1669_v11 = vshll.u32 %v3533_v3, 16  ;;  %v625_v61 = vld [vmem:[%s4116_s30 + $0xc] sm:$0xe] }
  0x3a   : > { %v1473_v15 = vrot.slane %v1471_v0, 5  ;;  %v1675_v16 = vrot.slane %v1673_v45, 4  ;;  %v1679_v18 = vshll.u32 %v3556_v62, 16  ;;  %v1477_v21 = vshll.u32 %v3517_v20, 16 }
  0x3b   : > { %v1667_v22 = vrot.slane %v1666_v10, 4  ;;  %v1671_v23 = vrot.slane %v1669_v11, 5  ;;  %v1483_v24 = vrot.slane %v1481_v2, 4  ;;  %v1487_v25 = vshll.u32 %v3548_v5, 16  ;;  %v3454_v10 = vld [vmem:[%s4116_s30 + $0x78] sm:$0xf] }
  0x3c   : > { %2395 = vrot.lane.b32.xlu0 %v3660_v6, %s4029_s8  ;;  %v1681_v27 = vrot.slane %v1679_v18, 5  ;;  %v1474_v28 = vor.u32 %v1473_v15, %v1470_v8  ;;  %v1479_v29 = vrot.slane %v1477_v21, 5  ;;  %v457_v31 = vshrl.u32 %v207_v14, 16 }
  0x3d   : > { %2587 = vrot.lane.b32.xlu1 %v3700_v12, %s4030_s9  ;;  %v1672_v32 = vsel %vm4184_vm5, %v1667_v22, %v1671_v23  ;;  %v1676_v33 = vor.u32 %v1675_v16, %v1671_v23  ;;  %v1489_v35 = vrot.slane %v1487_v25, 5  ;;  %v460_v36 = vshll.u32 %v207_v14, 16 }
  0x3e   : > { %v1475_v37 = vrot.slane %v1474_v28, 4  ;;  %v1484_v38 = vor.u32 %v1483_v24, %v1479_v29  ;;  %v459_v39 = vrot.slane %v457_v31, 4  ;;  %v466_v41 = vshll.u32 %v208_v26, 16  ;;  %v4258_v24 = vld [vmem:[%s4116_s30 + $0x7c] sm:$0xf] }
  0x3f   : > { %v1677_v42 = vrot.slane %v1676_v33, 4  ;;  %v462_v43 = vrot.slane %v460_v36, 5  ;;  %v470_v44 = vshrl.u32 %v208_v26, 16  ;;  %v476_v46 = vshll.u32 %v4229_v30, 16 }
  0x40   : > { %2571 = vrot.lane.b32.xlu0 %v3692_v4, %s4030_s9  ;;  %v1480_v1 = vsel %vm4184_vm5, %v1475_v37, %v1479_v29  ;;  %v1485_v3 = vrot.slane %v1484_v38, 4  ;;  %v468_v47 = vrot.slane %v466_v41, 5  ;;  %v265_v49 = vshrl.u32 %v191_v34, 16  ;;  %v4263_v29 = vld [vmem:[%s4116_s30 + $0x18] sm:$0xf] }
  0x41   : > { %v1682_v7 = vsel %vm4184_vm5, %v1677_v42, %v1681_v27  ;;  %v463_v9 = vor.u32 %v462_v43, %v459_v39  ;;  %v472_v50 = vrot.slane %v470_v44, 4  ;;  %v478_v40 = vrot.slane %v476_v46, 5  ;;  %v3477_v43 = vld [vmem:[%s4116_s30 + $0x80] sm:$0x1] }
  0x42   : > { %v3716_v52 = vcombine.low %v1672_v32, %v1682_v7  ;;  %v1490_v53 = vsel %vm4184_vm5, %v1485_v3, %v1489_v35  ;;  %v267_v54 = vrot.slane %v265_v49, 4  ;;  %v268_v45 = vshll.u32 %v191_v34, 16  ;;  %v4271_v35 = vld [vmem:[%s4116_s30 + $0x1c] sm:$0xf] }
  0x43   : > { %v3708_v20 = vcombine.low %v1480_v1, %v1490_v53  ;;  %v464_v55 = vrot.slane %v463_v9, 4  ;;  %v473_v56 = vor.u32 %v472_v50, %v468_v47  ;;  %v274_v57 = vshll.u32 %v192_v48, 16 }
  0x44   : > { %2667 = vrot.lane.b32.xlu1 %v3716_v52, %s4031_s10  ;;  %v270_v58 = vrot.slane %v268_v45, 5  ;;  %v278_v59 = vshrl.u32 %v192_v48, 16  ;;  %v284_v60 = vshll.u32 %v222_v13, 16  ;;  %v3429_v12 = vrot.slane %v633_v51, 9  ;;  %v3493_v52 = vld [vmem:[%s4116_s30 + $0x78] sm:$0xe] }
  0x45   : > { %2651 = vrot.lane.b32.xlu0 %v3708_v20, %s4031_s10  ;;  %v469_v62 = vsel %vm4184_vm5, %v464_v55, %v468_v47  ;;  %v474_v63 = vrot.slane %v473_v56, 4  ;;  %v276_v0 = vrot.slane %v274_v57, 5  ;;  %v756_v2 = vrot.slane %v208_v26, 5  ;;  %v3469_v47 = vld [vmem:[%s4116_s30 + $0x20] sm:$0x1] }
  0x46   : > { %v271_v4 = vor.u32 %v270_v58, %v267_v54  ;;  %v280_v5 = vrot.slane %v278_v59, 4  ;;  %v286_v6 = vrot.slane %v284_v60, 5  ;;  %v759_v8 = vrot.slane %v4229_v30, 5  ;;  %v3485_v55 = vld [vmem:[%s4116_s30 + $0x18] sm:$0xe] }
  0x47   : > { %v479_v11 = vsel %vm4184_vm5, %v474_v63, %v478_v40  ;;  %v757_v14 = vsel %vm4140_vm2, %v3429_v12, %v756_v2  ;;  %v758_v15 = vrot.slane %v756_v2, 4  ;;  %v3421_v16 = vrot.slane %v625_v61, 9  ;;  %v4295_v63 = vld [vmem:[%s4116_s30 + $0x84] sm:$0xf] }
  0x48   : > { %v3621_v18 = vcombine.low %v469_v62, %v479_v11  ;;  %v272_v21 = vrot.slane %v271_v4, 4  ;;  %v281_v22 = vor.u32 %v280_v5, %v276_v0  ;;  %v700_v23 = vrot.slane %v192_v48, 5 }
  0x49   : > { %v760_v25 = vsel %vm4140_vm2, %v758_v15, %v759_v8  ;;  %v703_v26 = vrot.slane %v222_v13, 5  ;;  %v1072_v27 = vshrl.u32 %v3454_v10, 16  ;;  %v1075_v28 = vshll.u32 %v3454_v10, 16 }
  0x4a   : > { %2157 = vrot.lane.b32.xlu1 %v3621_v18, %s4028_s7  ;;  %v277_v30 = vsel %vm4184_vm5, %v272_v21, %v276_v0  ;;  %v282_v31 = vrot.slane %v281_v22, 4  ;;  %v3637_v32 = vcombine.low %v757_v14, %v760_v25  ;;  %v701_v33 = vsel %vm4140_vm2, %v3421_v16, %v700_v23 }
  0x4b   : > { %v702_v36 = vrot.slane %v700_v23, 4  ;;  %v1074_v34 = vrot.slane %v1072_v27, 4  ;;  %v1077_v37 = vrot.slane %v1075_v28, 5  ;;  %v1085_v38 = vshrl.u32 %v4258_v24, 16 }
  0x4c   : > { %v287_v39 = vsel %vm4184_vm5, %v282_v31, %v286_v6  ;;  %v880_v41 = vshrl.u32 %v4263_v29, 16  ;;  %v883_v42 = vshll.u32 %v4263_v29, 16  ;;  %v3653_v1 = vcombine.low %v3454_v10, %v4258_v24  ;;  %v4321_v31 = vld [vmem:[%s4116_s30 + $0x28] sm:$0xf] }
  0x4d   : > { %v3613_v44 = vcombine.low %v277_v30, %v287_v39  ;;  %v704_v46 = vsel %vm4140_vm2, %v702_v36, %v703_v26  ;;  %v893_v3 = vshrl.u32 %v4271_v35, 16  ;;  %v1078_v9 = vor.u32 %v1077_v37, %v1074_v34  ;;  %v3518_v30 = vld [vmem:[%s4116_s30 + $0x24] sm:$0xf]  ;;  %v4327_v37 = vld [vmem:[%s4116_s30 + $0x8c] sm:$0x1] }
  0x4e   : > { %2237 = vrot.lane.b32.xlu1 %v3637_v32, %s4027_s6  ;;  %v3629_v48 = vcombine.low %v701_v33, %v704_v46  ;;  %v882_v49 = vrot.slane %v880_v41, 4  ;;  %v885_v7 = vrot.slane %v883_v42, 5  ;;  %v1081_v50 = vshll.u32 %v4258_v24, 16 }
  0x4f   : > { %2141 = vrot.lane.b32.xlu0 %v3613_v44, %s4028_s7  ;;  %v1087_v40 = vrot.slane %v1085_v38, 4  ;;  %v1091_v13 = vshll.u32 %v3477_v43, 16  ;;  %v889_v51 = vshll.u32 %v4271_v35, 16  ;;  %v1079_v53 = vrot.slane %v1078_v9, 4  ;;  %v209_v9 = vld [vmem:[%s4116_s30 + $0x78] sm:$0xf] }
  0x50   : > { %v886_v54 = vor.u32 %v885_v7, %v882_v49  ;;  %v895_v45 = vrot.slane %v893_v3, 4  ;;  %v899_v20 = vshll.u32 %v3469_v47, 16  ;;  %v3645_v56 = vcombine.low %v4263_v29, %v4271_v35  ;;  %v4334_v3 = vld [vmem:[%s4116_s30 + $0x2c] sm:$0x1] }
  0x51   : > { %v1083_v57 = vrot.slane %v1081_v50, 5  ;;  %v1093_v58 = vrot.slane %v1091_v13, 5  ;;  %v891_v59 = vrot.slane %v889_v51, 5  ;;  %v3509_v12 = vrot.slane %v3493_v52, 9  ;;  %v4342_v52 = vld [vmem:[%s4116_s30 + $0x7c] sm:$0xf] }
  0x52   : > { %2333 = vrot.lane.b32.xlu1 %v3653_v1, %s4025_s4  ;;  %v887_v60 = vrot.slane %v886_v54, 4  ;;  %v1368_v61 = vrot.slane %v4258_v24, 5  ;;  %v1371_v62 = vrot.slane %v3477_v43, 5  ;;  %v901_v4 = vrot.slane %v899_v20, 5  ;;  %v4309_v24 = vld [vmem:[%s4116_s30 + $0x88] sm:$0xf] }
  0x53   : > { %2221 = vrot.lane.b32.xlu0 %v3629_v48, %s4027_s6  ;;  %v1088_v0 = vor.u32 %v1087_v40, %v1083_v57  ;;  %v896_v2 = vor.u32 %v895_v45, %v891_v59  ;;  %v3501_v5 = vrot.slane %v3485_v55, 9  ;;  %v1084_v6 = vsel %vm4184_vm5, %v1079_v53, %v1083_v57 }
  0x54   : > { %v892_v8 = vsel %vm4184_vm5, %v887_v60, %v891_v59  ;;  %v1370_v10 = vrot.slane %v1368_v61, 4  ;;  %v1312_v11 = vrot.slane %v4271_v35, 5  ;;  %v1315_v16 = vrot.slane %v3469_v47, 5 }
  0x55   : > { %v1089_v14 = vrot.slane %v1088_v0, 4  ;;  %v897_v15 = vrot.slane %v896_v2, 4  ;;  %v1684_v18 = vshrl.u32 %v4295_v63, 16  ;;  %v1369_v21 = vsel %vm4140_vm2, %v3509_v12, %v1368_v61 }
  0x56   : > { %v1372_v22 = vsel %vm4140_vm2, %v1370_v10, %v1371_v62  ;;  %v1314_v23 = vrot.slane %v1312_v11, 4  ;;  %v1687_v25 = vshll.u32 %v4295_v63, 16  ;;  %v1313_v28 = vsel %vm4140_vm2, %v3501_v5, %v1312_v11 }
  0x57   : > { %2317 = vrot.lane.b32.xlu0 %v3645_v56, %s4025_s4  ;;  %v1094_v26 = vsel %vm4184_vm5, %v1089_v14, %v1093_v58  ;;  %v902_v27 = vsel %vm4184_vm5, %v897_v15, %v901_v4  ;;  %v1686_v29 = vrot.slane %v1684_v18, 4  ;;  %v1697_v34 = vshrl.u32 %v4309_v24, 16  ;;  %v4351_v58 = vld [vmem:[%s4116_s30 + $0x80] sm:$0x1]  ;;  %v194_v14 = vld [vmem:[%s4116_s30 + $0x1c] sm:$0xf] }
  0x58   : > { %v3669_v32 = vcombine.low %v1084_v6, %v1094_v26  ;;  %v3661_v33 = vcombine.low %v892_v8, %v902_v27  ;;  %v1316_v35 = vsel %vm4140_vm2, %v1314_v23, %v1315_v16  ;;  %v1689_v36 = vrot.slane %v1687_v25, 5 }
  0x59   : > { %v3685_v38 = vcombine.low %v1369_v21, %v1372_v22  ;;  %v1492_v39 = vshrl.u32 %v3518_v30, 16  ;;  %v1495_v41 = vshll.u32 %v3518_v30, 16  ;;  %v1505_v42 = vshrl.u32 %v4321_v31, 16  ;;  %v223_v21 = vld [vmem:[%s4116_s30 + $0x20] sm:$0x1] }
  0x5a   : > { %2413 = vrot.lane.b32.xlu1 %v3669_v32, %s4029_s8  ;;  %v3677_v43 = vcombine.low %v1313_v28, %v1316_v35  ;;  %v1690_v44 = vor.u32 %v1689_v36, %v1686_v29  ;;  %v1693_v46 = vshll.u32 %v4309_v24, 16  ;;  %v1699_v1 = vrot.slane %v1697_v34, 4  ;;  %v634_v28 = vld [vmem:[%s4116_s30 + $0x78] sm:$0xe] }
  0x5b   : > { %2397 = vrot.lane.b32.xlu0 %v3661_v33, %s4029_s8  ;;  %v3701_v47 = vcombine.low %v4295_v63, %v4309_v24  ;;  %v1494_v48 = vrot.slane %v1492_v39, 4  ;;  %v1497_v49 = vrot.slane %v1495_v41, 5  ;;  %v1703_v7 = vshll.u32 %v4327_v37, 16  ;;  %v193_v63 = vld [vmem:[%s4116_s30 + $0x18] sm:$0xf] }
  0x5c   : > { %v1691_v50 = vrot.slane %v1690_v44, 4  ;;  %v1695_v40 = vrot.slane %v1693_v46, 5  ;;  %v1501_v13 = vshll.u32 %v4321_v31, 16  ;;  %v1507_v51 = vrot.slane %v1505_v42, 4  ;;  %v626_v39 = vld [vmem:[%s4116_s30 + $0x18] sm:$0xe] }
  0x5d   : > { %v3693_v53 = vcombine.low %v3518_v30, %v4321_v31  ;;  %v1705_v54 = vrot.slane %v1703_v7, 5  ;;  %v1498_v45 = vor.u32 %v1497_v49, %v1494_v48  ;;  %v1511_v20 = vshll.u32 %v4334_v3, 16  ;;  %v3456_v46 = vld [vmem:[%s4116_s30 + $0x84] sm:$0xf]  ;;  %v4376_v7 = vld [vmem:[%s4116_s30 + $0x88] sm:$0xf] }
  0x5e   : > { %2493 = vrot.lane.b32.xlu1 %v3685_v38, %s4026_s5  ;;  %v1696_v55 = vsel %vm4184_vm5, %v1691_v50, %v1695_v40  ;;  %v1700_v56 = vor.u32 %v1699_v1, %v1695_v40  ;;  %v1503_v57 = vrot.slane %v1501_v13, 5  ;;  %v481_v59 = vshrl.u32 %v209_v9, 16 }
  0x5f   : > { %2477 = vrot.lane.b32.xlu0 %v3677_v43, %s4026_s5  ;;  %v1499_v60 = vrot.slane %v1498_v45, 4  ;;  %v1513_v12 = vrot.slane %v1511_v20, 5  ;;  %v484_v61 = vshll.u32 %v209_v9, 16  ;;  %v490_v62 = vshll.u32 %v4342_v52, 16  ;;  %v4384_v20 = vld [vmem:[%s4116_s30 + $0x24] sm:$0xf] }
  0x60   : > { %v1701_v0 = vrot.slane %v1700_v56, 4  ;;  %v1508_v2 = vor.u32 %v1507_v51, %v1503_v57  ;;  %v483_v4 = vrot.slane %v481_v59, 4  ;;  %v494_v5 = vshrl.u32 %v4342_v52, 16 }
  0x61   : > { %v1504_v6 = vsel %vm4184_vm5, %v1499_v60, %v1503_v57  ;;  %v486_v8 = vrot.slane %v484_v61, 5  ;;  %v492_v10 = vrot.slane %v490_v62, 5  ;;  %v500_v11 = vshll.u32 %v4351_v58, 16 }
  0x62   : > { %2589 = vrot.lane.b32.xlu1 %v3701_v47, %s4030_s9  ;;  %v1706_v15 = vsel %vm4184_vm5, %v1701_v0, %v1705_v54  ;;  %v1509_v16 = vrot.slane %v1508_v2, 4  ;;  %v496_v18 = vrot.slane %v494_v5, 4  ;;  %v289_v22 = vshrl.u32 %v193_v63, 16  ;;  %v3441_v2 = vld [vmem:[%s4116_s30 + $0x28] sm:$0xf] }
  0x63   : > { %2573 = vrot.lane.b32.xlu0 %v3693_v53, %s4030_s9  ;;  %v3717_v23 = vcombine.low %v1696_v55, %v1706_v15  ;;  %v487_v25 = vor.u32 %v486_v8, %v483_v4  ;;  %v502_v26 = vrot.slane %v500_v11, 5  ;;  %v292_v27 = vshll.u32 %v193_v63, 16  ;;  %v3478_v15 = vld [vmem:[%s4116_s30 + $0x8c] sm:$0x1] }
  0x64   : > { %v1514_v29 = vsel %vm4184_vm5, %v1509_v16, %v1513_v12  ;;  %v497_v30 = vor.u32 %v496_v18, %v492_v10  ;;  %v291_v32 = vrot.slane %v289_v22, 4  ;;  %v298_v33 = vshll.u32 %v194_v14, 16 }
  0x65   : > { %v3709_v35 = vcombine.low %v1504_v6, %v1514_v29  ;;  %v488_v36 = vrot.slane %v487_v25, 4  ;;  %v294_v34 = vrot.slane %v292_v27, 5  ;;  %v302_v38 = vshrl.u32 %v194_v14, 16  ;;  %v3494_v25 = vld [vmem:[%s4116_s30 + $0x84] sm:$0xe] }
  0x66   : > { %2669 = vrot.lane.b32.xlu1 %v3717_v23, %s4031_s10  ;;  %v498_v41 = vrot.slane %v497_v30, 4  ;;  %v300_v42 = vrot.slane %v298_v33, 5  ;;  %v308_v43 = vshll.u32 %v223_v21, 16  ;;  %v3430_v44 = vrot.slane %v634_v28, 9  ;;  %v3470_v23 = vld [vmem:[%s4116_s30 + $0x2c] sm:$0x1] }
  0x67   : > { %2653 = vrot.lane.b32.xlu0 %v3709_v35, %s4031_s10  ;;  %v493_v1 = vsel %vm4184_vm5, %v488_v36, %v492_v10  ;;  %v295_v47 = vor.u32 %v294_v34, %v291_v32  ;;  %v304_v48 = vrot.slane %v302_v38, 4  ;;  %v763_v49 = vrot.slane %v4342_v52, 5 }
  0x68   : > { %v503_v9 = vsel %vm4184_vm5, %v498_v41, %v502_v26  ;;  %v310_v50 = vrot.slane %v308_v43, 5  ;;  %v766_v40 = vrot.slane %v4351_v58, 5  ;;  %v3422_v13 = vrot.slane %v626_v39, 9  ;;  %v3486_v41 = vld [vmem:[%s4116_s30 + $0x24] sm:$0xe] }
  0x69   : > { %v3622_v51 = vcombine.low %v493_v1, %v503_v9  ;;  %v296_v53 = vrot.slane %v295_v47, 4  ;;  %v305_v54 = vor.u32 %v304_v48, %v300_v42  ;;  %v764_v45 = vsel %vm4140_vm2, %v3430_v44, %v763_v49  ;;  %v4416_v9 = vld [vmem:[%s4116_s30 + $0x90] sm:$0xf] }
  0x6a   : > { %v765_v55 = vrot.slane %v763_v49, 4  ;;  %v707_v52 = vrot.slane %v194_v14, 5  ;;  %v710_v56 = vrot.slane %v223_v21, 5  ;;  %v1096_v57 = vshrl.u32 %v3456_v46, 16 }
  0x6b   : > { %2159 = vrot.lane.b32.xlu1 %v3622_v51, %s4028_s7  ;;  %v301_v59 = vsel %vm4184_vm5, %v296_v53, %v300_v42  ;;  %v306_v58 = vrot.slane %v305_v54, 4  ;;  %v1099_v60 = vshll.u32 %v3456_v46, 16  ;;  %v1109_v12 = vshrl.u32 %v4376_v7, 16 }
  0x6c   : > { %v767_v61 = vsel %vm4140_vm2, %v765_v55, %v766_v40  ;;  %v708_v62 = vsel %vm4140_vm2, %v3422_v13, %v707_v52  ;;  %v709_v63 = vrot.slane %v707_v52, 4  ;;  %v1098_v0 = vrot.slane %v1096_v57, 4  ;;  %v4423_v52 = vld [vmem:[%s4116_s30 + $0x94] sm:$0xf] }
  0x6d   : > { %v311_v4 = vsel %vm4184_vm5, %v306_v58, %v310_v50  ;;  %v3638_v5 = vcombine.low %v764_v45, %v767_v61  ;;  %v1101_v6 = vrot.slane %v1099_v60, 5  ;;  %v904_v11 = vshrl.u32 %v4384_v20, 16  ;;  %v3520_v61 = vld [vmem:[%s4116_s30 + $0x30] sm:$0xf] }
  0x6e   : > { %v3614_v8 = vcombine.low %v301_v59, %v311_v4  ;;  %v711_v10 = vsel %vm4140_vm2, %v709_v63, %v710_v56  ;;  %v907_v14 = vshll.u32 %v4384_v20, 16  ;;  %v3654_v18 = vcombine.low %v3456_v46, %v4376_v7  ;;  %v4438_v4 = vld [vmem:[%s4116_s30 + $0x34] sm:$0xf] }
  0x6f   : > { %2239 = vrot.lane.b32.xlu1 %v3638_v5, %s4027_s6  ;;  %v3630_v16 = vcombine.low %v708_v62, %v711_v10  ;;  %v917_v21 = vshrl.u32 %v3441_v2, 16  ;;  %v1102_v22 = vor.u32 %v1101_v6, %v1098_v0  ;;  %v906_v26 = vrot.slane %v904_v11, 4 }
  0x70   : > { %2143 = vrot.lane.b32.xlu0 %v3614_v8, %s4028_s7  ;;  %v909_v27 = vrot.slane %v907_v14, 5  ;;  %v1105_v28 = vshll.u32 %v4376_v7, 16  ;;  %v1111_v29 = vrot.slane %v1109_v12, 4  ;;  %v1115_v32 = vshll.u32 %v3478_v15, 16 }
  0x71   : > { %v1103_v30 = vrot.slane %v1102_v22, 4  ;;  %v913_v33 = vshll.u32 %v3441_v2, 16  ;;  %v919_v35 = vrot.slane %v917_v21, 4  ;;  %v923_v38 = vshll.u32 %v3470_v23, 16 }
  0x72   : > { %v1107_v36 = vrot.slane %v1105_v28, 5  ;;  %v910_v34 = vor.u32 %v909_v27, %v906_v26  ;;  %v3510_v39 = vrot.slane %v3494_v25, 9  ;;  %v3646_v42 = vcombine.low %v4384_v20, %v3441_v2  ;;  %v4452_v25 = vld [vmem:[%s4116_s30 + $0x38] sm:$0x1] }
  0x73   : > { %2335 = vrot.lane.b32.xlu1 %v3654_v18, %s4025_s4  ;;  %v1117_v43 = vrot.slane %v1115_v32, 5  ;;  %v915_v44 = vrot.slane %v913_v33, 5  ;;  %v1375_v46 = vrot.slane %v4376_v7, 5  ;;  %v1378_v49 = vrot.slane %v3478_v15, 5 }
  0x74   : > { %2223 = vrot.lane.b32.xlu0 %v3630_v16, %s4027_s6  ;;  %v1108_v1 = vsel %vm4184_vm5, %v1103_v30, %v1107_v36  ;;  %v1112_v47 = vor.u32 %v1111_v29, %v1107_v36  ;;  %v911_v48 = vrot.slane %v910_v34, 4  ;;  %v925_v40 = vrot.slane %v923_v38, 5  ;;  %v4446_v16 = vld [vmem:[%s4116_s30 + $0x98] sm:$0x1]  ;;  %v211_v30 = vld [vmem:[%s4116_s30 + $0x84] sm:$0xf] }
  0x75   : > { %v920_v50 = vor.u32 %v919_v35, %v915_v44  ;;  %v1377_v13 = vrot.slane %v1375_v46, 4  ;;  %v3502_v51 = vrot.slane %v3486_v41, 9  ;;  %v1376_v7 = vsel %vm4140_vm2, %v3510_v39, %v1375_v46 }
  0x76   : > { %v1113_v53 = vrot.slane %v1112_v47, 4  ;;  %v1319_v54 = vrot.slane %v3441_v2, 5  ;;  %v1322_v45 = vrot.slane %v3470_v23, 5  ;;  %v916_v20 = vsel %vm4184_vm5, %v911_v48, %v915_v44 }
  0x77   : > { %v921_v55 = vrot.slane %v920_v50, 4  ;;  %v1708_v56 = vshrl.u32 %v4416_v9, 16  ;;  %v1711_v57 = vshll.u32 %v4416_v9, 16  ;;  %v1379_v58 = vsel %vm4140_vm2, %v1377_v13, %v1378_v49 }
  0x78   : > { %2319 = vrot.lane.b32.xlu0 %v3646_v42, %s4025_s4  ;;  %v1118_v59 = vsel %vm4184_vm5, %v1113_v53, %v1117_v43  ;;  %v1320_v60 = vsel %vm4140_vm2, %v3502_v51, %v1319_v54  ;;  %v1321_v12 = vrot.slane %v1319_v54, 4  ;;  %v1721_v8 = vshrl.u32 %v4423_v52, 16  ;;  %v212_v42 = vld [vmem:[%s4116_s30 + $0x88] sm:$0xf] }
  0x79   : > { %v3670_v62 = vcombine.low %v1108_v1, %v1118_v59  ;;  %v926_v63 = vsel %vm4184_vm5, %v921_v55, %v925_v40  ;;  %v1710_v0 = vrot.slane %v1708_v56, 4  ;;  %v1713_v2 = vrot.slane %v1711_v57, 5  ;;  %v4466_v1 = vld [vmem:[%s4116_s30 + $0x8c] sm:$0x1]  ;;  %v195_v40 = vld [vmem:[%s4116_s30 + $0x24] sm:$0xf] }
  0x7a   : > { %v3662_v5 = vcombine.low %v916_v20, %v926_v63  ;;  %v1323_v6 = vsel %vm4140_vm2, %v1321_v12, %v1322_v45  ;;  %v3686_v11 = vcombine.low %v1376_v7, %v1379_v58  ;;  %v1516_v14 = vshrl.u32 %v3520_v61, 16  ;;  %v196_v56 = vld [vmem:[%s4116_s30 + $0x28] sm:$0xf] }
  0x7b   : > { %2415 = vrot.lane.b32.xlu1 %v3670_v62, %s4029_s8  ;;  %v1519_v15 = vshll.u32 %v3520_v61, 16  ;;  %v1924_v18 = vrot.slane %v4321_v31, 5  ;;  %v3678_v21 = vcombine.low %v1320_v60, %v1323_v6  ;;  %v1529_v22 = vshrl.u32 %v4438_v4, 16  ;;  %v224_v60 = vld [vmem:[%s4116_s30 + $0x2c] sm:$0x1] }
  0x7c   : > { %2399 = vrot.lane.b32.xlu0 %v3662_v5, %s4029_s8  ;;  %v1714_v23 = vor.u32 %v1713_v2, %v1710_v0  ;;  %v1518_v26 = vrot.slane %v1516_v14, 4  ;;  %v1717_v28 = vshll.u32 %v4423_v52, 16  ;;  %v1723_v29 = vrot.slane %v1721_v8, 4  ;;  %v635_v2 = vld [vmem:[%s4116_s30 + $0x84] sm:$0xe] }
  0x7d   : > { %v1521_v27 = vrot.slane %v1519_v15, 5  ;;  %v3702_v32 = vcombine.low %v4416_v9, %v4423_v52  ;;  %v1727_v35 = vshll.u32 %v4446_v16, 16  ;;  %v1525_v36 = vshll.u32 %v4438_v4, 16 }
  0x7e   : > { %v1715_v33 = vrot.slane %v1714_v23, 4  ;;  %v1719_v34 = vrot.slane %v1717_v28, 5  ;;  %v1531_v39 = vrot.slane %v1529_v22, 4  ;;  %v1535_v41 = vshll.u32 %v4452_v25, 16 }
  0x7f   : > { %2495 = vrot.lane.b32.xlu1 %v3686_v11, %s4026_s5  ;;  %v1522_v38 = vor.u32 %v1521_v27, %v1518_v26  ;;  %v3694_v43 = vcombine.low %v3520_v61, %v4438_v4  ;;  %v1729_v44 = vrot.slane %v1727_v35, 5  ;;  %v1527_v46 = vrot.slane %v1525_v36, 5  ;;  %v627_v35 = vld [vmem:[%s4116_s30 + $0x24] sm:$0xe] }
  0x80   : > { %2479 = vrot.lane.b32.xlu0 %v3678_v21, %s4026_s5  ;;  %v505_v47 = vshrl.u32 %v211_v30, 16  ;;  %v1720_v48 = vsel %vm4184_vm5, %v1715_v33, %v1719_v34  ;;  %v1724_v49 = vor.u32 %v1723_v29, %v1719_v34  ;;  %v1537_v50 = vrot.slane %v1535_v41, 5  ;;  %v3458_v41 = vld [vmem:[%s4116_s30 + $0x90] sm:$0xf] }
  0x81   : > { %v1523_v9 = vrot.slane %v1522_v38, 4  ;;  %v1532_v13 = vor.u32 %v1531_v39, %v1527_v46  ;;  %v508_v53 = vshll.u32 %v211_v30, 16  ;;  %v514_v7 = vshll.u32 %v212_v42, 16 }
  0x82   : > { %v507_v51 = vrot.slane %v505_v47, 4  ;;  %v1725_v54 = vrot.slane %v1724_v49, 4  ;;  %v518_v20 = vshrl.u32 %v212_v42, 16  ;;  %v524_v55 = vshll.u32 %v4466_v1, 16 }
  0x83   : > { %2591 = vrot.lane.b32.xlu1 %v3702_v32, %s4030_s9  ;;  %v1528_v45 = vsel %vm4184_vm5, %v1523_v9, %v1527_v46  ;;  %v1533_v57 = vrot.slane %v1532_v13, 4  ;;  %v510_v59 = vrot.slane %v508_v53, 5  ;;  %v516_v58 = vrot.slane %v514_v7, 5  ;;  %v4500_v53 = vld [vmem:[%s4116_s30 + $0x30] sm:$0xf] }
  0x84   : > { %2575 = vrot.lane.b32.xlu0 %v3694_v43, %s4030_s9  ;;  %v313_v12 = vshrl.u32 %v195_v40, 16  ;;  %v1730_v61 = vsel %vm4184_vm5, %v1725_v54, %v1729_v44  ;;  %v520_v62 = vrot.slane %v518_v20, 4  ;;  %v526_v63 = vrot.slane %v524_v55, 5  ;;  %v4506_v55 = vld [vmem:[%s4116_s30 + $0x34] sm:$0xf] }
  0x85   : > { %v316_v0 = vshll.u32 %v195_v40, 16  ;;  %v3718_v5 = vcombine.low %v1720_v48, %v1730_v61  ;;  %v1538_v6 = vsel %vm4184_vm5, %v1533_v57, %v1537_v50  ;;  %v511_v8 = vor.u32 %v510_v59, %v507_v51  ;;  %v3459_v50 = vld [vmem:[%s4116_s30 + $0x94] sm:$0xf] }
  0x86   : > { %v315_v11 = vrot.slane %v313_v12, 4  ;;  %v3710_v14 = vcombine.low %v1528_v45, %v1538_v6  ;;  %v521_v15 = vor.u32 %v520_v62, %v516_v58  ;;  %v322_v22 = vshll.u32 %v196_v56, 16 }
  0x87   : > { %v318_v21 = vrot.slane %v316_v0, 5  ;;  %2671 = vrot.lane.b32.xlu1 %v3718_v5, %s4031_s10  ;;  %v512_v23 = vrot.slane %v511_v8, 4  ;;  %v326_v26 = vshrl.u32 %v196_v56, 16  ;;  %v332_v27 = vshll.u32 %v224_v60, 16  ;;  %v4517_v8 = vld [vmem:[%s4116_s30 + $0x38] sm:$0x1] }
  0x88   : > { %v3431_v28 = vrot.slane %v635_v2, 9  ;;  %2655 = vrot.lane.b32.xlu0 %v3710_v14, %s4031_s10  ;;  %v522_v29 = vrot.slane %v521_v15, 4  ;;  %v324_v32 = vrot.slane %v322_v22, 5  ;;  %v770_v33 = vrot.slane %v212_v42, 5  ;;  %v3495_v22 = vld [vmem:[%s4116_s30 + $0x90] sm:$0xe] }
  0x89   : > { %v319_v30 = vor.u32 %v318_v21, %v315_v11  ;;  %v517_v36 = vsel %vm4184_vm5, %v512_v23, %v516_v58  ;;  %v328_v34 = vrot.slane %v326_v26, 4  ;;  %v334_v38 = vrot.slane %v332_v27, 5 }
  0x8a   : > { %v773_v39 = vrot.slane %v4466_v1, 5  ;;  %v527_v43 = vsel %vm4184_vm5, %v522_v29, %v526_v63  ;;  %v771_v46 = vsel %vm4140_vm2, %v3431_v28, %v770_v33  ;;  %v772_v47 = vrot.slane %v770_v33, 4  ;;  %v3479_v63 = vld [vmem:[%s4116_s30 + $0x98] sm:$0x1] }
  0x8b   : > { %v320_v44 = vrot.slane %v319_v30, 4  ;;  %v3623_v42 = vcombine.low %v517_v36, %v527_v43  ;;  %v329_v48 = vor.u32 %v328_v34, %v324_v32  ;;  %v3423_v49 = vrot.slane %v627_v35, 9  ;;  %v3487_v35 = vld [vmem:[%s4116_s30 + $0x30] sm:$0xe] }
  0x8c   : > { %v714_v9 = vrot.slane %v196_v56, 5  ;;  %v774_v1 = vsel %vm4140_vm2, %v772_v47, %v773_v39  ;;  %v717_v13 = vrot.slane %v224_v60, 5  ;;  %v1120_v51 = vshrl.u32 %v3458_v41, 16 }
  0x8d   : > { %v325_v40 = vsel %vm4184_vm5, %v320_v44, %v324_v32  ;;  %2161 = vrot.lane.b32.xlu1 %v3623_v42, %s4028_s7  ;;  %v330_v7 = vrot.slane %v329_v48, 4  ;;  %v3639_v54 = vcombine.low %v771_v46, %v774_v1  ;;  %v1123_v57 = vshll.u32 %v3458_v41, 16 }
  0x8e   : > { %v715_v45 = vsel %vm4140_vm2, %v3423_v49, %v714_v9  ;;  %v716_v20 = vrot.slane %v714_v9, 4  ;;  %v1122_v56 = vrot.slane %v1120_v51, 4  ;;  %v1133_v59 = vshrl.u32 %v3459_v50, 16 }
  0x8f   : > { %v3655_v58 = vcombine.low %v3458_v41, %v3459_v50  ;;  %v335_v60 = vsel %vm4184_vm5, %v330_v7, %v334_v38  ;;  %v928_v61 = vshrl.u32 %v4500_v53, 16  ;;  %v931_v62 = vshll.u32 %v4500_v53, 16 }
  0x90   : > { %v718_v12 = vsel %vm4140_vm2, %v716_v20, %v717_v13  ;;  %v3615_v0 = vcombine.low %v325_v40, %v335_v60  ;;  %v1125_v5 = vrot.slane %v1123_v57, 5  ;;  %v941_v6 = vshrl.u32 %v4506_v55, 16  ;;  %v4534_v40 = vld [vmem:[%s4116_s30 + $0x9c] sm:$0xf] }
  0x91   : > { %v3631_v2 = vcombine.low %v715_v45, %v718_v12  ;;  %2241 = vrot.lane.b32.xlu1 %v3639_v54, %s4027_s6  ;;  %v930_v11 = vrot.slane %v928_v61, 4  ;;  %v933_v14 = vrot.slane %v931_v62, 5  ;;  %v3647_v15 = vcombine.low %v4500_v53, %v4506_v55  ;;  %v3872_v53 = vld [vmem:[%s5891_s1] sm:$0xff]   ;;  %v4559_v12 = vld [vmem:[%s4116_s30 + $0x3c] sm:$0xf] }
  0x92   : > { %v1129_v21 = vshll.u32 %v3459_v50, 16  ;;  %2145 = vrot.lane.b32.xlu0 %v3615_v0, %s4028_s7  ;;  %v1126_v23 = vor.u32 %v1125_v5, %v1122_v56  ;;  %v1135_v26 = vrot.slane %v1133_v59, 4  ;;  %v1139_v27 = vshll.u32 %v3479_v63, 16  ;;  %v4527_v36 = vpop.permute.xlu1 %2331  ;;  %v4570_v5 = vld [vmem:[%s4116_s30 + $0x40] sm:$0xf] }
  0x93   : > { %v937_v28 = vshll.u32 %v4506_v55, 16  ;;  %v934_v30 = vor.u32 %v933_v14, %v930_v11  ;;  %v943_v32 = vrot.slane %v941_v6, 4  ;;  %v947_v33 = vshll.u32 %v4517_v8, 16 }
  0x94   : > { %v1131_v29 = vrot.slane %v1129_v21, 5  ;;  %v1127_v34 = vrot.slane %v1126_v23, 4  ;;  %v1141_v38 = vrot.slane %v1139_v27, 5  ;;  %v3511_v41 = vrot.slane %v3495_v22, 9  ;;  %v4545_v20 = vpop.permute.xlu0 %2315  ;;  %v4581_v27 = vld [vmem:[%s4116_s30 + $0xa4] sm:$0x1] }
  0x95   : > { %v939_v39 = vrot.slane %v937_v28, 5  ;;  %2337 = vrot.lane.b32.xlu1 %v3655_v58, %s4025_s4  ;;  %v935_v44 = vrot.slane %v934_v30, 4  ;;  %v949_v46 = vrot.slane %v947_v33, 5  ;;  %v1382_v47 = vrot.slane %v3459_v50, 5  ;;  %v4554_v58 = vld [vmem:[%s4116_s30 + $0xa0] sm:$0xf] }
  0x96   : > { %v1136_v43 = vor.u32 %v1135_v26, %v1131_v29  ;;  %2225 = vrot.lane.b32.xlu0 %v3631_v2, %s4027_s6  ;;  %v1132_v42 = vsel %vm4184_vm5, %v1127_v34, %v1131_v29  ;;  %v1385_v49 = vrot.slane %v3479_v63, 5  ;;  %v3503_v9 = vrot.slane %v3487_v35, 9 }
  0x97   : > { %v944_v48 = vor.u32 %v943_v32, %v939_v39  ;;  %v940_v13 = vsel %vm4184_vm5, %v935_v44, %v939_v39  ;;  %v1383_v51 = vsel %vm4140_vm2, %v3511_v41, %v1382_v47  ;;  %v1384_v50 = vrot.slane %v1382_v47, 4  ;;  %v4594_v41 = vld [vmem:[%s4116_s30 + $0x44] sm:$0x1] }
  0x98   : > { %v1137_v1 = vrot.slane %v1136_v43, 4  ;;  %v1326_v54 = vrot.slane %v4506_v55, 5  ;;  %v1329_v45 = vrot.slane %v4517_v8, 5  ;;  %v4032_v59 = vmov 0   ;;  %v3874_v43 = vld [vmem:[%s5891_s1 + $0x10] sm:$0xff]  }
  0x99   : > { %v945_v7 = vrot.slane %v944_v48, 4  ;;  %v1386_v57 = vsel %vm4140_vm2, %v1384_v50, %v1385_v49  ;;  %3121 = vmatprep.subr.bf16.mxu0 %v4032_v59  ;;  %3772 = vmatprep.subr.bf16.mxu1 %v4032_v59  ;;  %v1732_v55 = vshrl.u32 %v4534_v40, 16  ;;  %v1735_v60 = vshll.u32 %v4534_v40, 16  ;;  %v213_v49 = vld [vmem:[%s4116_s30 + $0x90] sm:$0xf] }
  0x9a   : > { %v1142_v56 = vsel %vm4184_vm5, %v1137_v1, %v1141_v38  ;;  %2321 = vrot.lane.b32.xlu0 %v3647_v15, %s4025_s4  ;;  %v1327_v2 = vsel %vm4140_vm2, %v3503_v9, %v1326_v54  ;;  %v1328_v8 = vrot.slane %v1326_v54, 4  ;;  %3122 = vmatpush1.bf16.msra.mxu0 %v3872_v53  ;;  %v3873_v15 = vld [vmem:[%s5891_s1 + $0x8] sm:$0xff]   ;;  %v3687_v22 = vcombine.low %v1383_v51, %v1386_v57  ;;  %v4599_v44 = vpop.permute.xlu0 %2475  ;;  %v4618_v57 = vld [vmem:[%s4116_s30 + $0x98] sm:$0x1] }
  0x9b   : > { %v4561_v61 = vpop.permute.xlu1 %2219  ;;  %v3671_v63 = vcombine.low %v1132_v42, %v1142_v56  ;;  %v950_v0 = vsel %vm4184_vm5, %v945_v7, %v949_v46  ;;  %v1734_v11 = vrot.slane %v1732_v55, 4  ;;  %v1737_v14 = vrot.slane %v1735_v60, 5  ;;  %3781 = vmatpush1.bf16.msra.mxu1 %v3872_v53  ;;  %3123 = vmatprep.subr.bf16.mxu0 %v4032_v59 }
  0x9c   : > { %v3663_v6 = vcombine.low %v940_v13, %v950_v0  ;;  %v1745_v23 = vshrl.u32 %v4554_v58, 16  ;;  %v1540_v26 = vshrl.u32 %v4559_v12, 16  ;;  %v1330_v29 = vsel %vm4140_vm2, %v1328_v8, %v1329_v45  ;;  %3773 = vmatprep.subr.bf16.mxu1 %v4032_v59  ;;  %v4614_v45 = vld [vmem:[%s4116_s30 + $0x94] sm:$0xf]  ;;  %v3875_v8 = vld [vmem:[%s5891_s1 + $0x18] sm:$0xff]  }
  0x9d   : > { %2417 = vrot.lane.b32.xlu1 %v3671_v63, %s4029_s8  ;;  %v1543_v30 = vshll.u32 %v4559_v12, 16  ;;  %v1553_v32 = vshrl.u32 %v4570_v5, 16  ;;  %v3679_v34 = vcombine.low %v1327_v2, %v1330_v29  ;;  %v1738_v39 = vor.u32 %v1737_v14, %v1734_v11 }
  0x9e   : > { %2401 = vrot.lane.b32.xlu0 %v3663_v6, %s4029_s8  ;;  %v1542_v38 = vrot.slane %v1540_v26, 4  ;;  %v1741_v47 = vshll.u32 %v4554_v58, 16  ;;  %v1747_v42 = vrot.slane %v1745_v23, 4  ;;  %v1751_v48 = vshll.u32 %v4581_v27, 16  ;;  %3124 = vmatpush1.bf16.msra.mxu0 %v3873_v15  ;;  %v197_v6 = vld [vmem:[%s4116_s30 + $0x30] sm:$0xf] }
  0x9f   : > { %v4589_v33 = vpop.permute.xlu1 %2235  ;;  %v1545_v46 = vrot.slane %v1543_v30, 5  ;;  %3782 = vmatpush1.bf16.msra.mxu1 %v3873_v15  ;;  %v3703_v9 = vcombine.low %v4534_v40, %v4554_v58  ;;  %v1739_v1 = vrot.slane %v1738_v39, 4  ;;  %v1549_v13 = vshll.u32 %v4570_v5, 16  ;;  %3125 = vmatprep.subr.bf16.mxu0 %v4032_v59 }
  0xa0   : > { %v1555_v51 = vrot.slane %v1553_v32, 4  ;;  %v3695_v50 = vcombine.low %v4559_v12, %v4570_v5  ;;  %v1743_v53 = vrot.slane %v1741_v47, 5  ;;  %v1559_v54 = vshll.u32 %v4594_v41, 16  ;;  %3774 = vmatprep.subr.bf16.mxu1 %v4032_v59  ;;  %v4643_v47 = vld [vmem:[%s4116_s30 + $0x38] sm:$0x1] }
  0xa1   : > { %2497 = vrot.lane.b32.xlu1 %v3687_v22, %s4026_s5  ;;  %v1546_v7 = vor.u32 %v1545_v46, %v1542_v38  ;;  %v1753_v40 = vrot.slane %v1751_v48, 5  ;;  %v1551_v56 = vrot.slane %v1549_v13, 5  ;;  %v529_v55 = vshrl.u32 %v213_v49, 16  ;;  %v4638_v38 = vld [vmem:[%s4116_s30 + $0x34] sm:$0xf] }
  0xa2   : > { %2481 = vrot.lane.b32.xlu0 %v3679_v34, %s4026_s5  ;;  %v532_v60 = vshll.u32 %v213_v49, 16  ;;  %v1744_v12 = vsel %vm4184_vm5, %v1739_v1, %v1743_v53  ;;  %v1748_v63 = vor.u32 %v1747_v42, %v1743_v53  ;;  %v1561_v2 = vrot.slane %v1559_v54, 5  ;;  %3126 = vmatpush1.bf16.msra.mxu0 %v3874_v43  ;;  %v636_v13 = vld [vmem:[%s4116_s30 + $0x90] sm:$0xe] }
  0xa3   : > { %v1547_v0 = vrot.slane %v1546_v7, 4  ;;  %3783 = vmatpush1.bf16.msra.mxu1 %v3874_v43  ;;  %v4626_v11 = vpop.permute.xlu1 %2491  ;;  %v1556_v14 = vor.u32 %v1555_v51, %v1551_v56  ;;  %v531_v15 = vrot.slane %v529_v55, 4  ;;  %v538_v23 = vshll.u32 %v4614_v45, 16  ;;  %3127 = vmatprep.subr.bf16.mxu0 %v4032_v59  ;;  %v3878_v51 = vld [vmem:[%s5891_s1 + $0x20] sm:$0xff]  }
  0xa4   : > { %v534_v22 = vrot.slane %v532_v60, 5  ;;  %v1749_v29 = vrot.slane %v1748_v63, 4  ;;  %v542_v32 = vshrl.u32 %v4614_v45, 16  ;;  %v548_v34 = vshll.u32 %v4618_v57, 16  ;;  %3775 = vmatprep.subr.bf16.mxu1 %v4032_v59 }
  0xa5   : > { %2593 = vrot.lane.b32.xlu1 %v3703_v9, %s4030_s9  ;;  %v1552_v30 = vsel %vm4184_vm5, %v1547_v0, %v1551_v56  ;;  %v1557_v39 = vrot.slane %v1556_v14, 4  ;;  %v540_v46 = vrot.slane %v538_v23, 5  ;;  %v337_v42 = vshrl.u32 %v197_v6, 16  ;;  %v628_v0 = vld [vmem:[%s4116_s30 + $0x30] sm:$0xe] }
  0xa6   : > { %v4631_v26 = vpop.permute.xlu0 %2139  ;;  %2577 = vrot.lane.b32.xlu0 %v3695_v50, %s4030_s9  ;;  %v535_v43 = vor.u32 %v534_v22, %v531_v15  ;;  %v1754_v48 = vsel %vm4184_vm5, %v1749_v29, %v1753_v40  ;;  %v544_v49 = vrot.slane %v542_v32, 4  ;;  %v550_v9 = vrot.slane %v548_v34, 5  ;;  %3128 = vmatpush1.bf16.msra.mxu0 %v3875_v8 }
  0xa7   : > { %v340_v1 = vshll.u32 %v197_v6, 16  ;;  %3784 = vmatpush1.bf16.msra.mxu1 %v3875_v8  ;;  %v3719_v50 = vcombine.low %v1744_v12, %v1754_v48  ;;  %v1562_v53 = vsel %vm4184_vm5, %v1557_v39, %v1561_v2  ;;  %v339_v54 = vrot.slane %v337_v42, 4  ;;  %3129 = vmatprep.subr.bf16.mxu0 %v4032_v59 }
  0xa8   : > { %v536_v7 = vrot.slane %v535_v43, 4  ;;  %3776 = vmatprep.subr.bf16.mxu1 %v4032_v59  ;;  %v3711_v56 = vcombine.low %v1552_v30, %v1562_v53  ;;  %v545_v55 = vor.u32 %v544_v49, %v540_v46  ;;  %v346_v63 = vshll.u32 %v4638_v38, 16  ;;  %v3880_v30 = vld [vmem:[%s5891_s1 + $0x28] sm:$0xff]   ;;  %v4686_v53 = vld [vmem:[%s4116_s30 + $0xa0] sm:$0xf] }
  0xa9   : > { %v342_v60 = vrot.slane %v340_v1, 5  ;;  %2673 = vrot.lane.b32.xlu1 %v3719_v50, %s4031_s10  ;;  %v350_v2 = vshrl.u32 %v4638_v38, 16  ;;  %v356_v8 = vshll.u32 %v4643_v47, 16  ;;  %v3432_v14 = vrot.slane %v636_v13, 9 }
  0xaa   : > { %v4655_v40 = vpop.permute.xlu0 %2155  ;;  %v541_v12 = vsel %vm4184_vm5, %v536_v7, %v540_v46  ;;  %2657 = vrot.lane.b32.xlu0 %v3711_v56, %s4031_s10  ;;  %v546_v15 = vrot.slane %v545_v55, 4  ;;  %v348_v23 = vrot.slane %v346_v63, 5  ;;  %v777_v29 = vrot.slane %v4614_v45, 5  ;;  %3130 = vmatpush1.bf16.msra.mxu0 %v3878_v51  ;;  %v4673_v46 = vld [vmem:[%s4116_s30 + $0x9c] sm:$0xf] }
  0xab   : > { %v4659_v6 = vpop.permute.xlu1 %2411  ;;  %v343_v22 = vor.u32 %v342_v60, %v339_v54  ;;  %v352_v32 = vrot.slane %v350_v2, 4  ;;  %v358_v34 = vrot.slane %v356_v8, 5  ;;  %v780_v39 = vrot.slane %v4618_v57, 5  ;;  %3785 = vmatpush1.bf16.msra.mxu1 %v3878_v51  ;;  %3131 = vmatprep.subr.bf16.mxu0 %v4032_v59  ;;  %v4697_v60 = vld [vmem:[%s4116_s30 + $0x3c] sm:$0xf] }
  0xac   : > { %v3424_v43 = vrot.slane %v628_v0, 9  ;;  %v551_v42 = vsel %vm4184_vm5, %v546_v15, %v550_v9  ;;  %v778_v48 = vsel %vm4140_vm2, %v3432_v14, %v777_v29  ;;  %v779_v49 = vrot.slane %v777_v29, 4  ;;  %3777 = vmatprep.subr.bf16.mxu1 %v4032_v59  ;;  %v4706_v2 = vld [vmem:[%s4116_s30 + $0x40] sm:$0xf]  ;;  %v199_v8 = vld [vmem:[%s4116_s30 + $0x3c] sm:$0xf] }
  0xad   : > { %v344_v45 = vrot.slane %v343_v22, 4  ;;  %v3624_v57 = vcombine.low %v541_v12, %v551_v42  ;;  %v353_v13 = vor.u32 %v352_v32, %v348_v23  ;;  %v721_v50 = vrot.slane %v4638_v38, 5  ;;  %v3882_v38 = vld [vmem:[%s5891_s1 + $0x30] sm:$0xff]  }
  0xae   : > { %v4681_v1 = vpop.permute.xlu0 %2395  ;;  %v724_v51 = vrot.slane %v4643_v47, 5  ;;  %v781_v54 = vsel %vm4140_vm2, %v779_v49, %v780_v39  ;;  %v1144_v56 = vshrl.u32 %v4673_v46, 16  ;;  %v1147_v55 = vshll.u32 %v4673_v46, 16  ;;  %3132 = vmatpush1.bf16.msra.mxu0 %v3880_v30 }
  0xaf   : > { %v4688_v9 = vpop.permute.xlu1 %2587  ;;  %v349_v7 = vsel %vm4184_vm5, %v344_v45, %v348_v23  ;;  %2163 = vrot.lane.b32.xlu1 %v3624_v57, %s4028_s7  ;;  %v354_v47 = vrot.slane %v353_v13, 4  ;;  %v3640_v63 = vcombine.low %v778_v48, %v781_v54  ;;  %v722_v0 = vsel %vm4140_vm2, %v3424_v43, %v721_v50  ;;  %3786 = vmatpush1.bf16.msra.mxu1 %v3880_v30  ;;  %v4722_v48 = vld [vmem:[%s4116_s30 + $0xa4] sm:$0x1] }
  0xb0   : > { %v723_v12 = vrot.slane %v721_v50, 4  ;;  %v1146_v14 = vrot.slane %v1144_v56, 4  ;;  %v1149_v15 = vrot.slane %v1147_v55, 5  ;;  %v1157_v22 = vshrl.u32 %v4686_v53, 16  ;;  %3133 = vmatprep.subr.bf16.mxu0 %v4032_v59  ;;  %3778 = vmatprep.subr.bf16.mxu1 %v4032_v59  ;;  %v3913_v50 = vld [vmem:[%s4116_s30 + $0x4] sm:$0xf] }
  0xb1   : > { %v359_v23 = vsel %vm4184_vm5, %v354_v47, %v358_v34  ;;  %v952_v30 = vshrl.u32 %v4697_v60, 16  ;;  %v955_v32 = vshll.u32 %v4697_v60, 16  ;;  %v3656_v42 = vcombine.low %v4673_v46, %v4686_v53  ;;  %v3885_v34 = vld [vmem:[%s5891_s1 + $0x38] sm:$0xff]   ;;  %v4737_v47 = vld [vmem:[%s4116_s30 + $0x44] sm:$0x1] }
  0xb2   : > { %v725_v29 = vsel %vm4140_vm2, %v723_v12, %v724_v51  ;;  %v3616_v39 = vcombine.low %v349_v7, %v359_v23  ;;  %v965_v45 = vshrl.u32 %v4706_v2, 16  ;;  %3134 = vmatpush1.bf16.msra.mxu0 %v3882_v38  ;;  %v4727_v49 = vpop.permute.xlu0 %2571  ;;  %v3914_v51 = vld [vmem:[%s4116_s30] sm:$0xf]  ;;  %v1150_v54 = vor.u32 %v1149_v15, %v1146_v14  ;;  %v3496_v23 = vld [vmem:[%s4116_s30 + $0x9c] sm:$0xe] }
  0xb3   : > { %v3632_v43 = vcombine.low %v722_v0, %v725_v29  ;;  %2243 = vrot.lane.b32.xlu1 %v3640_v63, %s4027_s6  ;;  %v954_v57 = vrot.slane %v952_v30, 4  ;;  %v957_v13 = vrot.slane %v955_v32, 5  ;;  %v3596_v46 = vcombine.low %v3914_v51, %v3913_v50  ;;  %3787 = vmatpush1.bf16.msra.mxu1 %v3882_v38  ;;  %v3915_v50 = vld [vmem:[%s4116_s30 + $0x64] sm:$0xf]  ;;  %v3916_v51 = vld [vmem:[%s4116_s30 + $0x60] sm:$0xf] }
  0xb4   : > { %2147 = vrot.lane.b32.xlu0 %v3616_v39, %s4028_s7  ;;  %v1153_v56 = vshll.u32 %v4686_v53, 16  ;;  %v1159_v55 = vrot.slane %v1157_v22, 4  ;;  %3135 = vmatprep.subr.bf16.mxu0 %v4032_v59  ;;  %v1163_v0 = vshll.u32 %v4722_v48, 16  ;;  %v961_v12 = vshll.u32 %v4706_v2, 16 }
  0xb5   : > { %v2734_v63 = vsel %vm2731_vm6, %v3596_v46, %v4631_v26  ;;  %v958_v38 = vor.u32 %v957_v13, %v954_v57  ;;  %3779 = vmatprep.subr.bf16.mxu1 %v4032_v59  ;;  %v3648_v14 = vcombine.low %v4697_v60, %v4706_v2  ;;  %v1151_v15 = vrot.slane %v1150_v54, 4  ;;  %v3886_v26 = vld [vmem:[%s5891_s1 + $0x40] sm:$0xff]   ;;  %v3488_v60 = vld [vmem:[%s4116_s30 + $0x3c] sm:$0xe] }
  0xb6   : > { %v4732_v7 = vpop.permute.xlu1 %2667  ;;  %v1155_v22 = vrot.slane %v1153_v56, 5  ;;  %v967_v29 = vrot.slane %v965_v45, 4  ;;  %3136 = vmatpush1.bf16.msra.mxu0 %v3885_v34  ;;  %v2782_v30 = vsel %vm2780_vm7, %v2734_v63, %v4561_v61  ;;  %v963_v39 = vrot.slane %v961_v12, 5 }
  0xb7   : > { %2339 = vrot.lane.b32.xlu1 %v3656_v42, %s4025_s4  ;;  %v959_v32 = vrot.slane %v958_v38, 4  ;;  %v971_v57 = vshll.u32 %v4737_v47, 16  ;;  %3788 = vmatpush1.bf16.msra.mxu1 %v3885_v34  ;;  %v1165_v45 = vrot.slane %v1163_v0, 5  ;;  %v3604_v46 = vcombine.low %v3916_v51, %v3915_v50  ;;  %v4760_v42 = vpop.permute.xlu0 %2651  ;;  %v4797_v50 = vld [vmem:[%s4116_s30 + $0xac] sm:$0xf] }
  0xb8   : > { %2227 = vrot.lane.b32.xlu0 %v3632_v43, %s4027_s6  ;;  %v1160_v13 = vor.u32 %v1159_v55, %v1155_v22  ;;  %v3512_v54 = vrot.slane %v3496_v23, 9  ;;  %3137 = vmatprep.subr.bf16.mxu0 %v4032_v59  ;;  %v1156_v61 = vsel %vm4184_vm5, %v1151_v15, %v1155_v22  ;;  %v968_v56 = vor.u32 %v967_v29, %v963_v39 }
  0xb9   : > { %v973_v63 = vrot.slane %v971_v57, 5  ;;  %v1389_v38 = vrot.slane %v4686_v53, 5  ;;  %3780 = vmatprep.subr.bf16.mxu1 %v4032_v59  ;;  %v2758_v55 = vsel %vm2731_vm6, %v3604_v46, %v4655_v40  ;;  %v1392_v0 = vrot.slane %v4722_v48, 5 }
  0xba   : > { %v1161_v34 = vrot.slane %v1160_v13, 4  ;;  %v3504_v12 = vrot.slane %v3488_v60, 9  ;;  %3138 = vmatpush1.bf16.msra.mxu0 %v3886_v26  ;;  %v964_v23 = vsel %vm4184_vm5, %v959_v32, %v963_v39  ;;  %v969_v15 = vrot.slane %v968_v56, 4  ;;  %v3540_v32 = vld [vmem:[%s4116_s30 + $0xa8] sm:$0xf] }
  0xbb   : > { %v2798_v53 = vsel %vm2780_vm7, %v2758_v55, %v4589_v33  ;;  %v1391_v22 = vrot.slane %v1389_v38, 4  ;;  %3789 = vmatpush1.bf16.msra.mxu1 %v3886_v26  ;;  %v1390_v40 = vsel %vm4140_vm2, %v3512_v54, %v1389_v38  ;;  %v1333_v48 = vrot.slane %v4706_v2, 5  ;;  %v3524_v54 = vld [vmem:[%s4116_s30 + $0x48] sm:$0xf]  ;;  %v4868_v56 = vld [vmem:[%s4116_s30 + $0xa0] sm:$0xf] }
  0xbc   : > { %v4766_v43 = vpop.permute.xlu1 %2157  ;;  %2323 = vrot.lane.b32.xlu0 %v3648_v14, %s4025_s4  ;;  %v1166_v59 = vsel %vm4184_vm5, %v1161_v34, %v1165_v45  ;;  %v1336_v29 = vrot.slane %v4737_v47, 5  ;;  %v974_v33 = vsel %vm4184_vm5, %v969_v15, %v973_v63  ;;  %v2831_v45 = vsel %vm2813_vm8, %v2798_v53, %v4527_v36  ;;  %v4807_v34 = vld [vmem:[%s4116_s30 + $0x4c] sm:$0xf] }
  0xbd   : > { %v3672_v39 = vcombine.low %v1156_v61, %v1166_v59  ;;  %v1393_v14 = vsel %vm4140_vm2, %v1391_v22, %v1392_v0  ;;  %v3664_v57 = vcombine.low %v964_v23, %v974_v33  ;;  %v1334_v60 = vsel %vm4140_vm2, %v3504_v12, %v1333_v48 }
  0xbe   : > { %v1335_v2 = vrot.slane %v1333_v48, 4  ;;  %v3688_v13 = vcombine.low %v1390_v40, %v1393_v14  ;;  %v1756_v51 = vshrl.u32 %v3540_v32, 16  ;;  %v1759_v46 = vshll.u32 %v3540_v32, 16 }
  0xbf   : > { %2419 = vrot.lane.b32.xlu1 %v3672_v39, %s4029_s8  ;;  %v2815_v55 = vsel %vm2813_vm8, %v2782_v30, %v4545_v20  ;;  %v2864_v23 = vsel %vm2846_vm9, %v2831_v45, %v4659_v6  ;;  %v1769_v15 = vshrl.u32 %v4797_v50, 16  ;;  %v1564_v53 = vshrl.u32 %v3524_v54, 16  ;;  %v4822_v30 = vld [vmem:[%s4116_s30 + $0xb0] sm:$0x1] }
  0xc0   : > { %v4787_v26 = vpop.permute.xlu1 %2237  ;;  %2403 = vrot.lane.b32.xlu0 %v3664_v57, %s4029_s8  ;;  %v1337_v38 = vsel %vm4140_vm2, %v1335_v2, %v1336_v29  ;;  %v1758_v0 = vrot.slane %v1756_v51, 4  ;;  %v1761_v12 = vrot.slane %v1759_v46, 5  ;;  %v1567_v22 = vshll.u32 %v3524_v54, 16  ;;  %v3564_v46 = vld [vmem:[%s4116_s30 + $0x18] sm:$0xe] }
  0xc1   : > { %v4791_v47 = vpop.permute.xlu0 %2141  ;;  %v3680_v36 = vcombine.low %v1334_v60, %v1337_v38  ;;  %v2848_v40 = vsel %vm2846_vm9, %v2815_v55, %v4681_v1  ;;  %v3704_v48 = vcombine.low %v3540_v32, %v4797_v50  ;;  %v1577_v20 = vshrl.u32 %v4807_v34, 16  ;;  %v4833_v60 = vld [vmem:[%s4116_s30 + $0x50] sm:$0x1]  ;;  %v3920_v29 = vld [vmem:[%s4116_s30 + $0x80] sm:$0x1] }
  0xc2   : > { %v1566_v39 = vrot.slane %v1564_v53, 4  ;;  %v1569_v33 = vrot.slane %v1567_v22, 5  ;;  %v3696_v14 = vcombine.low %v3524_v54, %v4807_v34  ;;  %v2897_v1 = vsel %vm2879_vm10, %v2864_v23, %v4626_v11 }
  0xc3   : > { %2499 = vrot.lane.b32.xlu1 %v3688_v13, %s4026_s5  ;;  %v1762_v32 = vor.u32 %v1761_v12, %v1758_v0  ;;  %v1765_v57 = vshll.u32 %v4797_v50, 16  ;;  %v4837_v2 = vsel %vm2879_vm10, %v2848_v40, %v4599_v44  ;;  %v1771_v13 = vrot.slane %v1769_v15, 4  ;;  %v3572_v0 = vld [vmem:[%s4116_s30 + $0x78] sm:$0xe] }
  0xc4   : > { %v4824_v6 = vpop.permute.xlu1 %2333  ;;  %2483 = vrot.lane.b32.xlu0 %v3680_v36, %s4026_s5  ;;  %v1775_v45 = vshll.u32 %v4822_v30, 16  ;;  %v1570_v51 = vor.u32 %v1569_v33, %v1566_v39  ;;  %v1573_v36 = vshll.u32 %v4807_v34, 16  ;;  %v1579_v55 = vrot.slane %v1577_v20, 4  ;;  %v215_v20 = vld [vmem:[%s4116_s30 + $0x9c] sm:$0xf] }
  0xc5   : > { %v4814_v59 = vpop.permute.xlu0 %2221  ;;  %v1763_v11 = vrot.slane %v1762_v32, 4  ;;  %v1767_v38 = vrot.slane %v1765_v57, 5  ;;  %v4849_v44 = vsel %vm2912_vm11, %v2897_v1, %v4688_v9  ;;  %v1583_v15 = vshll.u32 %v4833_v60, 16  ;;  %v3918_v1 = vld [vmem:[%s4116_s30 + $0x20] sm:$0x1] }
  0xc6   : > { %v1777_v12 = vrot.slane %v1775_v45, 5  ;;  %v1571_v23 = vrot.slane %v1570_v51, 4  ;;  %v1575_v40 = vrot.slane %v1573_v36, 5  ;;  %v1920_v32 = vrot.slane %v3918_v1, 5 }
  0xc7   : > { %2595 = vrot.lane.b32.xlu1 %v3704_v48, %s4030_s9  ;;  %v1768_v53 = vsel %vm4184_vm5, %v1763_v11, %v1767_v38  ;;  %v1772_v22 = vor.u32 %v1771_v13, %v1767_v38  ;;  %v3580_v48 = vrot.slane %v3564_v46, 9  ;;  %v1585_v33 = vrot.slane %v1583_v15, 5  ;;  %v3919_v46 = vld [vmem:[%s4116_s30 + $0x7c] sm:$0xf] }
  0xc8   : > { %2579 = vrot.lane.b32.xlu0 %v3696_v14, %s4030_s9  ;;  %v3917_v14 = vld [vmem:[%s4116_s30 + $0x1c] sm:$0xf]  ;;  %v3588_v57 = vrot.slane %v3572_v0, 9  ;;  %v1576_v11 = vsel %vm4184_vm5, %v1571_v23, %v1575_v40  ;;  %v1580_v13 = vor.u32 %v1579_v55, %v1575_v40  ;;  %v1973_v38 = vrot.slane %v3919_v46, 5 }
  0xc9   : > { %v4841_v54 = vpop.permute.xlu0 %2317  ;;  %v1917_v9 = vrot.slane %v3917_v14, 5  ;;  %v1773_v51 = vrot.slane %v1772_v22, 4  ;;  %v1976_v14 = vrot.slane %v3920_v29, 5  ;;  %v553_v0 = vshrl.u32 %v215_v20, 16  ;;  %v4879_v29 = vld [vmem:[%s4116_s30 + $0xa4] sm:$0x1] }
  0xca   : > { %v1581_v1 = vrot.slane %v1580_v13, 4  ;;  %v1974_v55 = vsel %vm4140_vm2, %v3588_v57, %v1973_v38  ;;  %v1975_v23 = vrot.slane %v1973_v38, 4  ;;  %v556_v63 = vshll.u32 %v215_v20, 16  ;;  %v4890_v13 = vld [vmem:[%s4116_s30 + $0x40] sm:$0xf] }
  0xcb   : > { %v1918_v36 = vsel %vm4140_vm2, %v3580_v48, %v1917_v9  ;;  %v1919_v15 = vrot.slane %v1917_v9, 4  ;;  %v1778_v22 = vsel %vm4184_vm5, %v1773_v51, %v1777_v12  ;;  %v555_v9 = vrot.slane %v553_v0, 4  ;;  %v4895_v0 = vld [vmem:[%s4116_s30 + $0x44] sm:$0x1] }
  0xcc   : > { %v4855_v39 = vpop.permute.xlu1 %2413  ;;  %v3720_v46 = vcombine.low %v1768_v53, %v1778_v22  ;;  %v1586_v12 = vsel %vm4184_vm5, %v1581_v1, %v1585_v33  ;;  %v1977_v57 = vsel %vm4140_vm2, %v1975_v23, %v1976_v14  ;;  %v562_v53 = vshll.u32 %v4868_v56, 16 }
  0xcd   : > { %v4859_v45 = vpop.permute.xlu0 %2397  ;;  %v1921_v48 = vsel %vm4140_vm2, %v1919_v15, %v1920_v32  ;;  %v3712_v32 = vcombine.low %v1576_v11, %v1586_v12  ;;  %v3732_v38 = vcombine.low %v1974_v55, %v1977_v57  ;;  %v558_v15 = vrot.slane %v556_v63, 5 }
  0xce   : > { %v3724_v51 = vcombine.low %v1918_v36, %v1921_v48  ;;  %2675 = vrot.lane.b32.xlu1 %v3720_v46, %s4031_s10  ;;  %v566_v20 = vshrl.u32 %v4868_v56, 16  ;;  %v564_v33 = vrot.slane %v562_v53, 5  ;;  %v572_v36 = vshll.u32 %v4879_v29, 16 }
  0xcf   : > { %v361_v22 = vshrl.u32 %v199_v8, 16  ;;  %v364_v14 = vshll.u32 %v199_v8, 16  ;;  %2659 = vrot.lane.b32.xlu0 %v3712_v32, %s4031_s10  ;;  %3758 = vmatprep.mubr.msk.bf16.mxu1 %vm2731_vm6, %v3732_v38  ;;  %v559_v11 = vor.u32 %v558_v15, %v555_v9  ;;  %v370_v63 = vshll.u32 %v4890_v13, 16  ;;  %v637_v15 = vld [vmem:[%s4116_s30 + $0x9c] sm:$0xe] }
  0xd0   : > { %v4874_v40 = vpop.permute.xlu1 %2493  ;;  %3750 = vmatprep.mubr.msk.bf16.mxu0 %vm2731_vm6, %v3724_v51  ;;  %v568_v55 = vrot.slane %v566_v20, 4  ;;  %v374_v23 = vshrl.u32 %v4890_v13, 16  ;;  %v574_v46 = vrot.slane %v572_v36, 5  ;;  %v380_v51 = vshll.u32 %v4895_v0, 16 }
  0xd1   : > { %v4882_v28 = vpop.permute.xlu0 %2477  ;;  %v363_v48 = vrot.slane %v361_v22, 4  ;;  %v366_v12 = vrot.slane %v364_v14, 5  ;;  %v560_v57 = vrot.slane %v559_v11, 4  ;;  %v372_v53 = vrot.slane %v370_v63, 5 }
  0xd2   : > { %v569_v8 = vor.u32 %v568_v55, %v564_v33  ;;  %v376_v61 = vrot.slane %v374_v23, 4  ;;  %v2914_v9 = vsel %vm2912_vm11, %v4837_v2, %v4727_v49  ;;  %v382_v38 = vrot.slane %v380_v51, 5  ;;  %v629_v23 = vld [vmem:[%s4116_s30 + $0x3c] sm:$0xe] }
  0xd3   : > { %v367_v32 = vor.u32 %v366_v12, %v363_v48  ;;  %v565_v36 = vsel %vm4184_vm5, %v560_v57, %v564_v33  ;;  %v2947_v11 = vsel %vm2945_vm12, %v2914_v9, %v4760_v42  ;;  %v2971_v63 = vsel %vm2945_vm12, %v4849_v44, %v4732_v7  ;;  %v3921_v57 = vld [vmem:[%s4116_s30 + $0x6c] sm:$0xf]  ;;  %v3462_v44 = vld [vmem:[%s4116_s30 + $0xa8] sm:$0xf] }
  0xd4   : > { %v4899_v1 = vpop.permute.xlu1 %2589  ;;  %v570_v22 = vrot.slane %v569_v8, 4  ;;  %v377_v14 = vor.u32 %v376_v61, %v372_v53  ;;  %3154 = vmatmul.mubr.bf16.vlgmr.msra.gmra.mrb[0].mxu0 %v2947_v11  ;;  %3218 = vmatmul.mubr.bf16.vlgmr.msra.gmra.mrb[0].mxu1 %v2971_v63  ;;  %v3433_v48 = vrot.slane %v637_v15, 9  ;;  %v784_v42 = vrot.slane %v4868_v56, 5  ;;  %v3922_v8 = vld [vmem:[%s4116_s30 + $0x70] sm:$0xf] }
  0xd5   : > { %v4906_v35 = vpop.permute.xlu0 %2573  ;;  %v368_v2 = vrot.slane %v367_v32, 4  ;;  %v3605_v9 = vcombine.low %v3921_v57, %v3922_v8  ;;  %v787_v7 = vrot.slane %v4879_v29, 5  ;;  %v3425_v15 = vrot.slane %v629_v23, 9  ;;  %v3923_v63 = vld [vmem:[%s4116_s30 + $0xc] sm:$0xf] }
  0xd6   : > { %v575_v33 = vsel %vm4184_vm5, %v570_v22, %v574_v46  ;;  %v378_v61 = vrot.slane %v377_v14, 4  ;;  %v785_v32 = vsel %vm4140_vm2, %v3433_v48, %v784_v42  ;;  %v786_v56 = vrot.slane %v784_v42, 4  ;;  %v4954_v57 = vld [vmem:[%s4116_s30 + $0x4c] sm:$0xf] }
  0xd7   : > { %v3625_v12 = vcombine.low %v565_v36, %v575_v33  ;;  %v373_v51 = vsel %vm4184_vm5, %v368_v2, %v372_v53  ;;  %v4938_v36 = vld [vmem:[%s4116_s30 + $0xac] sm:$0xf]  ;;  %v728_v14 = vrot.slane %v4890_v13, 5  ;;  %v731_v11 = vrot.slane %v4895_v0, 5  ;;  %v3924_v33 = vld [vmem:[%s4116_s30 + $0x10] sm:$0xf] }
  0xd8   : > { %v4912_v20 = vpop.permute.xlu1 %2669  ;;  %v383_v46 = vsel %vm4184_vm5, %v378_v61, %v382_v38  ;;  %v3446_v38 = vld [vmem:[%s4116_s30 + $0x48] sm:$0xf]  ;;  %v3597_v23 = vcombine.low %v3923_v63, %v3924_v33  ;;  %v788_v61 = vsel %vm4140_vm2, %v786_v56, %v787_v7  ;;  %v1168_v48 = vshrl.u32 %v3462_v44, 16 }
  0xd9   : > { %v4940_v53 = vpop.permute.xlu0 %2653  ;;  %2165 = vrot.lane.b32.xlu1 %v3625_v12, %s4028_s7  ;;  %v3617_v29 = vcombine.low %v373_v51, %v383_v46  ;;  %v1171_v42 = vshll.u32 %v3462_v44, 16  ;;  %v3641_v13 = vcombine.low %v785_v32, %v788_v61  ;;  %v729_v0 = vsel %vm4140_vm2, %v3425_v15, %v728_v14  ;;  %v3481_v15 = vld [vmem:[%s4116_s30 + $0xb0] sm:$0x1] }
  0xda   : > { %v730_v12 = vrot.slane %v728_v14, 4  ;;  %v1181_v51 = vshrl.u32 %v4938_v36, 16  ;;  %v2761_v8 = vsel %vm2731_vm6, %v3605_v9, %v4766_v43  ;;  %v1170_v46 = vrot.slane %v1168_v48, 4  ;;  %v3473_v14 = vld [vmem:[%s4116_s30 + $0x50] sm:$0x1] }
  0xdb   : > { %2149 = vrot.lane.b32.xlu0 %v3617_v29, %s4028_s7  ;;  %v1173_v7 = vrot.slane %v1171_v42, 5  ;;  %v976_v56 = vshrl.u32 %v3446_v38, 16  ;;  %v3657_v29 = vcombine.low %v3462_v44, %v4938_v36  ;;  %v979_v32 = vshll.u32 %v3446_v38, 16 }
  0xdc   : > { %v732_v63 = vsel %vm4140_vm2, %v730_v12, %v731_v11  ;;  %v989_v33 = vshrl.u32 %v4954_v57, 16  ;;  %v2737_v43 = vsel %vm2731_vm6, %v3597_v23, %v4791_v47  ;;  %v3649_v42 = vcombine.low %v3446_v38, %v4954_v57  ;;  %v3497_v47 = vld [vmem:[%s4116_s30 + $0xa8] sm:$0xe] }
  0xdd   : > { %v4947_v2 = vpop.permute.xlu1 %2159  ;;  %2245 = vrot.lane.b32.xlu1 %v3641_v13, %s4027_s6  ;;  %v3633_v9 = vcombine.low %v729_v0, %v732_v63  ;;  %v978_v48 = vrot.slane %v976_v56, 4  ;;  %v981_v11 = vrot.slane %v979_v32, 5  ;;  %v1174_v44 = vor.u32 %v1173_v7, %v1170_v46  ;;  %v3489_v46 = vld [vmem:[%s4116_s30 + $0x48] sm:$0xe] }
  0xde   : > { %v1177_v12 = vshll.u32 %v4938_v36, 16  ;;  %v1183_v49 = vrot.slane %v1181_v51, 4  ;;  %v1187_v22 = vshll.u32 %v3481_v15, 16  ;;  %v985_v55 = vshll.u32 %v4954_v57, 16 }
  0xdf   : > { %2229 = vrot.lane.b32.xlu0 %v3633_v9, %s4027_s6  ;;  %v991_v62 = vrot.slane %v989_v33, 4  ;;  %v995_v10 = vshll.u32 %v3473_v14, 16  ;;  %v2800_v23 = vsel %vm2780_vm7, %v2761_v8, %v4787_v26  ;;  %v1175_v38 = vrot.slane %v1174_v44, 4 }
  0xe0   : > { %v1179_v0 = vrot.slane %v1177_v12, 5  ;;  %v982_v56 = vor.u32 %v981_v11, %v978_v48  ;;  %v2784_v51 = vsel %vm2780_vm7, %v2737_v43, %v4814_v59  ;;  %v2833_v7 = vsel %vm2813_vm8, %v2800_v23, %v4824_v6  ;;  %v5013_v23 = vld [vmem:[%s4116_s30 + $0xb8] sm:$0xf] }
  0xe1   : > { %v4969_v61 = vpop.permute.xlu1 %2239  ;;  %2341 = vrot.lane.b32.xlu1 %v3657_v29, %s4025_s4  ;;  %v1189_v63 = vrot.slane %v1187_v22, 5  ;;  %v987_v32 = vrot.slane %v985_v55, 5  ;;  %v997_v26 = vrot.slane %v995_v10, 5  ;;  %v3513_v8 = vrot.slane %v3497_v47, 9  ;;  %v4998_v10 = vld [vmem:[%s4116_s30 + $0xb4] sm:$0xf] }
  0xe2   : > { %v4974_v13 = vpop.permute.xlu0 %2143  ;;  %v1184_v9 = vor.u32 %v1183_v49, %v1179_v0  ;;  %v983_v21 = vrot.slane %v982_v56, 4  ;;  %v1396_v11 = vrot.slane %v4938_v36, 5  ;;  %v1399_v59 = vrot.slane %v3481_v15, 5  ;;  %5904 = vst [vmem:[#allocation5_spill] sm:$0xff] %v5013_v23  ;;  %v3526_v56 = vld [vmem:[%s4116_s30 + $0x54] sm:$0xf] }
  0xe3   : > { %2325 = vrot.lane.b32.xlu0 %v3649_v42, %s4025_s4  ;;  %v992_v48 = vor.u32 %v991_v62, %v987_v32  ;;  %v3505_v43 = vrot.slane %v3489_v46, 9  ;;  %v1180_v6 = vsel %vm4184_vm5, %v1175_v38, %v1179_v0  ;;  %v1340_v22 = vrot.slane %v4954_v57, 5 }
  0xe4   : > { %v1185_v55 = vrot.slane %v1184_v9, 4  ;;  %v1343_v49 = vrot.slane %v3473_v14, 5  ;;  %v2817_v44 = vsel %vm2813_vm8, %v2784_v51, %v4841_v54  ;;  %v988_v62 = vsel %vm4184_vm5, %v983_v21, %v987_v32  ;;  %v5027_v9 = vld [vmem:[%s4116_s30 + $0x58] sm:$0xf] }
  0xe5   : > { %v4990_v29 = vpop.permute.xlu1 %2335  ;;  %v993_v36 = vrot.slane %v992_v48, 4  ;;  %v1398_v15 = vrot.slane %v1396_v11, 4  ;;  %v1397_v57 = vsel %vm4140_vm2, %v3513_v8, %v1396_v11  ;;  %v1341_v14 = vsel %vm4140_vm2, %v3505_v43, %v1340_v22  ;;  %5905 = vst [vmem:[#allocation6_spill] sm:$0xff] %v5027_v9 }
  0xe6   : > { %v4988_v33 = vpop.permute.xlu0 %2223  ;;  %v1190_v12 = vsel %vm4184_vm5, %v1185_v55, %v1189_v63  ;;  %v1342_v47 = vrot.slane %v1340_v22, 4  ;;  %v1780_v0 = vshrl.u32 %v4998_v10, 16  ;;  %v2866_v51 = vsel %vm2846_vm9, %v2833_v7, %v4855_v39  ;;  %v5039_v22 = vld [vmem:[%s4116_s30 + $0xbc] sm:$0x1] }
  0xe7   : > { %v3673_v54 = vcombine.low %v1180_v6, %v1190_v12  ;;  %v998_v21 = vsel %vm4184_vm5, %v993_v36, %v997_v26  ;;  %v1400_v38 = vsel %vm4140_vm2, %v1398_v15, %v1399_v59  ;;  %v1783_v32 = vshll.u32 %v4998_v10, 16 }
  0xe8   : > { %v3665_v46 = vcombine.low %v988_v62, %v998_v21  ;;  %v1344_v63 = vsel %vm4140_vm2, %v1342_v47, %v1343_v49  ;;  %v2850_v26 = vsel %vm2846_vm9, %v2817_v44, %v4859_v45  ;;  %v3689_v48 = vcombine.low %v1397_v57, %v1400_v38  ;;  %v3565_v38 = vld [vmem:[%s4116_s30 + $0x24] sm:$0xe] }
  0xe9   : > { %2421 = vrot.lane.b32.xlu1 %v3673_v54, %s4029_s8  ;;  %v1782_v11 = vrot.slane %v1780_v0, 4  ;;  %v1793_v59 = vshrl.u32 %v5013_v23, 16  ;;  %v3681_v7 = vcombine.low %v1341_v14, %v1344_v63  ;;  %v1785_v43 = vrot.slane %v1783_v32, 5  ;;  %v5052_v14 = vld [vmem:[%s4116_s30 + $0x5c] sm:$0x1] }
  0xea   : > { %v5004_v42 = vpop.permute.xlu0 %2319  ;;  %2405 = vrot.lane.b32.xlu0 %v3665_v46, %s4029_s8  ;;  %v1588_v6 = vshrl.u32 %v3526_v56, 16  ;;  %v1591_v55 = vshll.u32 %v3526_v56, 16  ;;  %v5044_v45 = vsel %vm2879_vm10, %v2866_v51, %v4874_v40  ;;  %v2883_v44 = vsel %vm2879_vm10, %v2850_v26, %v4882_v28  ;;  %v3573_v63 = vld [vmem:[%s4116_s30 + $0x84] sm:$0xe] }
  0xeb   : > { %v1601_v62 = vshrl.u32 %v5027_v9, 16  ;;  %v3705_v36 = vcombine.low %v4998_v10, %v5013_v23  ;;  %v1786_v57 = vor.u32 %v1785_v43, %v1782_v11  ;;  %v3697_v40 = vcombine.low %v3526_v56, %v5027_v9 }
  0xec   : > { %v1590_v15 = vrot.slane %v1588_v6, 4  ;;  %v1593_v12 = vrot.slane %v1591_v55, 5  ;;  %v1789_v54 = vshll.u32 %v5013_v23, 16  ;;  %v1795_v28 = vrot.slane %v1793_v59, 4 }
  0xed   : > { %v5029_v8 = vpop.permute.xlu1 %2415  ;;  %2501 = vrot.lane.b32.xlu1 %v3689_v48, %s4026_s5  ;;  %v1799_v21 = vshll.u32 %v5039_v22, 16  ;;  %v1787_v10 = vrot.slane %v1786_v57, 4  ;;  %v1597_v46 = vshll.u32 %v5027_v9, 16  ;;  %v1603_v51 = vrot.slane %v1601_v62, 4  ;;  %v5080_v57 = vld [vmem:[%s4116_s30 + $0xac] sm:$0xf] }
  0xee   : > { %v5035_v39 = vpop.permute.xlu0 %2399  ;;  %2485 = vrot.lane.b32.xlu0 %v3681_v7, %s4026_s5  ;;  %v1594_v0 = vor.u32 %v1593_v12, %v1590_v15  ;;  %v5068_v56 = vsel %vm2912_vm11, %v2883_v44, %v4906_v35  ;;  %v1791_v26 = vrot.slane %v1789_v54, 5  ;;  %v1607_v11 = vshll.u32 %v5052_v14, 16  ;;  %v217_v12 = vld [vmem:[%s4116_s30 + $0xa8] sm:$0xf] }
  0xef   : > { %v1801_v48 = vrot.slane %v1799_v21, 5  ;;  %v1599_v7 = vrot.slane %v1597_v46, 5  ;;  %v3581_v43 = vrot.slane %v3565_v38, 9  ;;  %v1926_v6 = vrot.slane %v1924_v18, 4 }
  0xf0   : > { %v1595_v59 = vrot.slane %v1594_v0, 4  ;;  %v1792_v62 = vsel %vm4184_vm5, %v1787_v10, %v1791_v26  ;;  %v1796_v35 = vor.u32 %v1795_v28, %v1791_v26  ;;  %v1609_v44 = vrot.slane %v1607_v11, 5  ;;  %v5094_v10 = vld [vmem:[%s4116_s30 + $0xb0] sm:$0x1] }
  0xf1   : > { %v5054_v47 = vpop.permute.xlu1 %2495  ;;  %2597 = vrot.lane.b32.xlu1 %v3705_v36, %s4030_s9  ;;  %v3589_v15 = vrot.slane %v3573_v63, 9  ;;  %v1604_v21 = vor.u32 %v1603_v51, %v1599_v7  ;;  %v1925_v36 = vsel %vm4140_vm2, %v3581_v43, %v1924_v18  ;;  %v5906_v38 = vrot.slane %v4334_v3, 5 }
  0xf2   : > { %v5064_v32 = vpop.permute.xlu0 %2479  ;;  %2581 = vrot.lane.b32.xlu0 %v3697_v40, %s4030_s9  ;;  %v1600_v54 = vsel %vm4184_vm5, %v1595_v59, %v1599_v7  ;;  %v1797_v0 = vrot.slane %v1796_v35, 4  ;;  %v5907_v46 = vrot.slane %v4309_v24, 5  ;;  %v577_v26 = vshrl.u32 %v217_v12, 16 }
  0xf3   : > { %v1928_v28 = vsel %vm4140_vm2, %v1926_v6, %v5906_v38  ;;  %v1605_v18 = vrot.slane %v1604_v21, 4  ;;  %v580_v3 = vshll.u32 %v217_v12, 16  ;;  %v586_v11 = vshll.u32 %v5080_v57, 16  ;;  %v5116_v12 = vld [vmem:[%s4116_s30 + $0x4c] sm:$0xf] }
  0xf4   : > { %v3725_v40 = vcombine.low %v1925_v36, %v1928_v28  ;;  %v1981_v51 = vsel %vm4140_vm2, %v3589_v15, %v5907_v46  ;;  %v5908_v31 = vmov %v5907_v46  ;;  %v1802_v7 = vsel %vm4184_vm5, %v1797_v0, %v1801_v48  ;;  %v201_v15 = vld [vmem:[%s4116_s30 + $0x48] sm:$0xf]  ;;  %v5123_v0 = vld [vmem:[%s4116_s30 + $0x50] sm:$0x1] }
  0xf5   : > { %v5073_v55 = vpop.permute.xlu1 %2591  ;;  %v1982_v63 = vrot.slane %v5908_v31, 4  ;;  %v5909_v43 = vrot.slane %v4327_v37, 5  ;;  %v590_v24 = vshrl.u32 %v5080_v57, 16  ;;  %v596_v35 = vshll.u32 %v5094_v10, 16 }
  0xf6   : > { %v5103_v59 = vpop.permute.xlu0 %2575  ;;  %3751 = vmatprep.mubr.msk.bf16.mxu0 %vm2731_vm6, %v3725_v40  ;;  %v3721_v36 = vcombine.low %v1792_v62, %v1802_v7  ;;  %v1610_v48 = vsel %vm4184_vm5, %v1605_v18, %v1609_v44  ;;  %v579_v28 = vrot.slane %v577_v26, 4  ;;  %v582_v40 = vrot.slane %v580_v3, 5 }
  0xf7   : > { %v1984_v6 = vsel %vm4140_vm2, %v1982_v63, %v5909_v43  ;;  %v3713_v37 = vcombine.low %v1600_v54, %v1610_v48  ;;  %v588_v46 = vrot.slane %v586_v11, 5  ;;  %v592_v31 = vrot.slane %v590_v24, 4 }
  0xf8   : > { %v3733_v38 = vcombine.low %v1981_v51, %v1984_v6  ;;  %2677 = vrot.lane.b32.xlu1 %v3721_v36, %s4031_s10  ;;  %v598_v63 = vrot.slane %v596_v35, 5  ;;  %v385_v43 = vshrl.u32 %v201_v15, 16  ;;  %v388_v49 = vshll.u32 %v201_v15, 16  ;;  %v638_v6 = vld [vmem:[%s4116_s30 + $0xa8] sm:$0xe] }
  0xf9   : > { %v5118_v21 = vpop.permute.xlu1 %2671  ;;  %v394_v62 = vshll.u32 %v5116_v12, 16  ;;  %2661 = vrot.lane.b32.xlu0 %v3713_v37, %s4031_s10  ;;  %v583_v44 = vor.u32 %v582_v40, %v579_v28  ;;  %v593_v51 = vor.u32 %v592_v31, %v588_v46  ;;  %v398_v18 = vshrl.u32 %v5116_v12, 16 }
  0xfa   : > { %3759 = vmatprep.mubr.msk.bf16.mxu1 %vm2731_vm6, %v3733_v38  ;;  %v404_v54 = vshll.u32 %v5123_v0, 16  ;;  %v387_v26 = vrot.slane %v385_v43, 4  ;;  %v390_v3 = vrot.slane %v388_v49, 5  ;;  %v2950_v7 = vsel %vm2945_vm12, %v5068_v56, %v4940_v53  ;;  %v5135_v24 = vpop.permute.xlu0 %2655  ;;  %v630_v56 = vld [vmem:[%s4116_s30 + $0x48] sm:$0xe] }
  0xfb   : > { %v396_v11 = vrot.slane %v394_v62, 5  ;;  %v2932_v35 = vsel %vm2912_vm11, %v5044_v45, %v4899_v1  ;;  %v584_v15 = vrot.slane %v583_v44, 4  ;;  %v594_v36 = vrot.slane %v593_v51, 4  ;;  %3162 = vmatmul.mubr.bf16.gmra.mrb[4].mxu0 %v2950_v7  ;;  %v3925_v51 = vld [vmem:[%s4116_s30 + $0x78] sm:$0xf] }
  0xfc   : > { %v400_v48 = vrot.slane %v398_v18, 4  ;;  %v391_v28 = vor.u32 %v390_v3, %v387_v26  ;;  %v406_v37 = vrot.slane %v404_v54, 5  ;;  %v2974_v53 = vsel %vm2945_vm12, %v2932_v35, %v4912_v20  ;;  %v3926_v18 = vld [vmem:[%s4116_s30 + $0x7c] sm:$0xf] }
  0xfd   : > { %v589_v1 = vsel %vm4184_vm5, %v584_v15, %v588_v46  ;;  %v599_v45 = vsel %vm4184_vm5, %v594_v36, %v598_v63  ;;  %3226 = vmatmul.mubr.bf16.gmra.mrb[4].mxu1 %v2974_v53  ;;  %v3434_v31 = vrot.slane %v638_v6, 9  ;;  %v3606_v20 = vcombine.low %v3925_v51, %v3926_v18  ;;  %v3464_v63 = vld [vmem:[%s4116_s30 + $0xb4] sm:$0xf]  ;;  %v3928_v53 = vld [vmem:[%s4116_s30 + $0x1c] sm:$0xf] }
  0xfe   : > { %v401_v40 = vor.u32 %v400_v48, %v396_v11  ;;  %v3626_v62 = vcombine.low %v589_v1, %v599_v45  ;;  %v392_v44 = vrot.slane %v391_v28, 4  ;;  %v791_v26 = vrot.slane %v5080_v57, 5  ;;  %v5165_v57 = vld [vmem:[%s4116_s30 + $0xb8] sm:$0xf] }
  0xff   : > { %v5140_v38 = vpop.permute.xlu1 %2161  ;;  %v794_v46 = vrot.slane %v5094_v10, 5  ;;  %v3426_v3 = vrot.slane %v630_v56, 9  ;;  %v735_v15 = vrot.slane %v5116_v12, 5  ;;  %v738_v36 = vrot.slane %v5123_v0, 5  ;;  %v3927_v28 = vld [vmem:[%s4116_s30 + $0x18] sm:$0xf] }
 0x100   : > { %v402_v54 = vrot.slane %v401_v40, 4  ;;  %2167 = vrot.lane.b32.xlu1 %v3626_v62, %s4028_s7  ;;  %v397_v35 = vsel %vm4184_vm5, %v392_v44, %v396_v11  ;;  %v3598_v56 = vcombine.low %v3927_v28, %v3928_v53  ;;  %v792_v1 = vsel %vm4140_vm2, %v3434_v31, %v791_v26  ;;  %v3448_v11 = vld [vmem:[%s4116_s30 + $0x54] sm:$0xf]  ;;  %v5179_v44 = vld [vmem:[%s4116_s30 + $0x58] sm:$0xf] }
 0x101   : > { %v793_v45 = vrot.slane %v791_v26, 4  ;;  %v736_v12 = vsel %vm4140_vm2, %v3426_v3, %v735_v15  ;;  %v737_v0 = vrot.slane %v735_v15, 4  ;;  %v1192_v62 = vshrl.u32 %v3464_v63, 16  ;;  %v5190_v15 = vld [vmem:[%s4116_s30 + $0xbc] sm:$0x1] }
 0x102   : > { %v407_v48 = vsel %vm4184_vm5, %v402_v54, %v406_v37  ;;  %v2764_v37 = vsel %vm2731_vm6, %v3606_v20, %v4947_v2  ;;  %v1195_v18 = vshll.u32 %v3464_v63, 16  ;;  %v1205_v31 = vshrl.u32 %v5165_v57, 16 }
 0x103   : > { %v5156_v7 = vpop.permute.xlu1 %2241  ;;  %v3618_v40 = vcombine.low %v397_v35, %v407_v48  ;;  %v795_v51 = vsel %vm4140_vm2, %v793_v45, %v794_v46  ;;  %v739_v26 = vsel %vm4140_vm2, %v737_v0, %v738_v36  ;;  %v1194_v3 = vrot.slane %v1192_v62, 4  ;;  %v3474_v45 = vld [vmem:[%s4116_s30 + $0x5c] sm:$0x1] }
 0x104   : > { %v5167_v10 = vpop.permute.xlu0 %2145  ;;  %v3642_v54 = vcombine.low %v792_v1, %v795_v51  ;;  %v1000_v35 = vshrl.u32 %v3448_v11, 16  ;;  %v3634_v20 = vcombine.low %v736_v12, %v739_v26  ;;  %v1197_v28 = vrot.slane %v1195_v18, 5 }
 0x105   : > { %2151 = vrot.lane.b32.xlu0 %v3618_v40, %s4028_s7  ;;  %v1003_v46 = vshll.u32 %v3448_v11, 16  ;;  %v1013_v53 = vshrl.u32 %v5179_v44, 16  ;;  %v2740_v1 = vsel %vm2731_vm6, %v3598_v56, %v4974_v13  ;;  %v3658_v36 = vcombine.low %v3464_v63, %v5165_v57 }
 0x106   : > { %2247 = vrot.lane.b32.xlu1 %v3642_v54, %s4027_s6  ;;  %v1002_v40 = vrot.slane %v1000_v35, 4  ;;  %v3650_v0 = vcombine.low %v3448_v11, %v5179_v44  ;;  %v1198_v51 = vor.u32 %v1197_v28, %v1194_v3  ;;  %v1201_v12 = vshll.u32 %v5165_v57, 16  ;;  %v3498_v54 = vld [vmem:[%s4116_s30 + $0xb4] sm:$0xe] }
 0x107   : > { %v5194_v2 = vpop.permute.xlu1 %2337  ;;  %v1005_v62 = vrot.slane %v1003_v46, 5  ;;  %v1207_v18 = vrot.slane %v1205_v31, 4  ;;  %v1211_v26 = vshll.u32 %v5190_v15, 16  ;;  %v1009_v43 = vshll.u32 %v5179_v44, 16  ;;  %v3490_v28 = vld [vmem:[%s4116_s30 + $0x54] sm:$0xe] }
 0x108   : > { %v5192_v48 = vpop.permute.xlu0 %2225  ;;  %v1015_v13 = vrot.slane %v1013_v53, 4  ;;  %v1019_v56 = vshll.u32 %v3474_v45, 16  ;;  %v2802_v63 = vsel %vm2780_vm7, %v2764_v37, %v4969_v61  ;;  %v1199_v11 = vrot.slane %v1198_v51, 4 }
 0x109   : > { %2231 = vrot.lane.b32.xlu0 %v3634_v20, %s4027_s6  ;;  %v1203_v35 = vrot.slane %v1201_v12, 5  ;;  %v1006_v3 = vor.u32 %v1005_v62, %v1002_v40  ;;  %v2786_v31 = vsel %vm2780_vm7, %v2740_v1, %v4988_v33  ;;  %v2835_v20 = vsel %vm2813_vm8, %v2802_v63, %v4990_v29 }
 0x10a   : > { %2343 = vrot.lane.b32.xlu1 %v3658_v36, %s4025_s4  ;;  %v1213_v46 = vrot.slane %v1211_v26, 5  ;;  %v1011_v53 = vrot.slane %v1009_v43, 5  ;;  %v1021_v61 = vrot.slane %v1019_v56, 5  ;;  %v3514_v37 = vrot.slane %v3498_v54, 9  ;;  %v5244_v54 = vld [vmem:[%s4116_s30 + $0xc4] sm:$0xf] }
 0x10b   : > { %v1208_v23 = vor.u32 %v1207_v18, %v1203_v35  ;;  %v1007_v9 = vrot.slane %v1006_v3, 4  ;;  %v1403_v62 = vrot.slane %v5165_v57, 5  ;;  %v1406_v33 = vrot.slane %v5190_v15, 5  ;;  %v5229_v18 = vld [vmem:[%s4116_s30 + $0xc0] sm:$0xf] }
 0x10c   : > { %v5208_v6 = vpop.permute.xlu0 %2321  ;;  %v1016_v40 = vor.u32 %v1015_v13, %v1011_v53  ;;  %v3506_v1 = vrot.slane %v3490_v28, 9  ;;  %v1204_v29 = vsel %vm4184_vm5, %v1199_v11, %v1203_v35  ;;  %v1347_v51 = vrot.slane %v5179_v44, 5  ;;  %v3528_v35 = vld [vmem:[%s4116_s30 + $0x60] sm:$0xf] }
 0x10d   : > { %2327 = vrot.lane.b32.xlu0 %v3650_v0, %s4025_s4  ;;  %v1209_v43 = vrot.slane %v1208_v23, 4  ;;  %v1350_v12 = vrot.slane %v3474_v45, 5  ;;  %v2819_v0 = vsel %vm2813_vm8, %v2786_v31, %v5004_v42  ;;  %v1012_v57 = vsel %vm4184_vm5, %v1007_v9, %v1011_v53  ;;  %v5258_v53 = vld [vmem:[%s4116_s30 + $0x64] sm:$0xf] }
 0x10e   : > { %v1017_v15 = vrot.slane %v1016_v40, 4  ;;  %v1405_v26 = vrot.slane %v1403_v62, 4  ;;  %v1404_v44 = vsel %vm4140_vm2, %v3514_v37, %v1403_v62  ;;  %v1348_v45 = vsel %vm4140_vm2, %v3506_v1, %v1347_v51 }
 0x10f   : > { %v5218_v49 = vpop.permute.xlu1 %2417  ;;  %v1214_v23 = vsel %vm4184_vm5, %v1209_v43, %v1213_v46  ;;  %v1349_v56 = vrot.slane %v1347_v51, 4  ;;  %v1804_v11 = vshrl.u32 %v5229_v18, 16  ;;  %v2868_v28 = vsel %vm2846_vm9, %v2835_v20, %v5029_v8  ;;  %v5268_v43 = vld [vmem:[%s4116_s30 + $0xc8] sm:$0x1] }
 0x110   : > { %v5223_v36 = vpop.permute.xlu0 %2401  ;;  %v3674_v42 = vcombine.low %v1204_v29, %v1214_v23  ;;  %v1022_v9 = vsel %vm4184_vm5, %v1017_v15, %v1021_v61  ;;  %v1407_v63 = vsel %vm4140_vm2, %v1405_v26, %v1406_v33  ;;  %v1807_v46 = vshll.u32 %v5229_v18, 16 }
 0x111   : > { %v3666_v3 = vcombine.low %v1012_v57, %v1022_v9  ;;  %v1351_v31 = vsel %vm4140_vm2, %v1349_v56, %v1350_v12  ;;  %v2852_v61 = vsel %vm2846_vm9, %v2819_v0, %v5035_v39  ;;  %v3690_v40 = vcombine.low %v1404_v44, %v1407_v63 }
 0x112   : > { %2423 = vrot.lane.b32.xlu1 %v3674_v42, %s4029_s8  ;;  %v1806_v62 = vrot.slane %v1804_v11, 4  ;;  %v1817_v33 = vshrl.u32 %v5244_v54, 16  ;;  %v3682_v8 = vcombine.low %v1348_v45, %v1351_v31  ;;  %v1809_v20 = vrot.slane %v1807_v46, 5  ;;  %v5281_v45 = vld [vmem:[%s4116_s30 + $0x68] sm:$0x1] }
 0x113   : > { %v5235_v13 = vpop.permute.xlu1 %2497  ;;  %2407 = vrot.lane.b32.xlu0 %v3666_v3, %s4029_s8  ;;  %v1612_v1 = vshrl.u32 %v3528_v35, 16  ;;  %v1615_v29 = vshll.u32 %v3528_v35, 16  ;;  %v2901_v51 = vsel %vm2879_vm10, %v2868_v28, %v5054_v47  ;;  %v2885_v39 = vsel %vm2879_vm10, %v2852_v61, %v5064_v32  ;;  %v3566_v42 = vld [vmem:[%s4116_s30 + $0x30] sm:$0xe] }
 0x114   : > { %v5260_v37 = vpop.permute.xlu0 %2481  ;;  %v3706_v12 = vcombine.low %v5229_v18, %v5244_v54  ;;  %v1625_v0 = vshrl.u32 %v5258_v53, 16  ;;  %v3698_v23 = vcombine.low %v3528_v35, %v5258_v53  ;;  %v1810_v44 = vor.u32 %v1809_v20, %v1806_v62  ;;  %v3574_v3 = vld [vmem:[%s4116_s30 + $0x90] sm:$0xe] }
 0x115   : > { %v1614_v15 = vrot.slane %v1612_v1, 4  ;;  %v1617_v26 = vrot.slane %v1615_v29, 5  ;;  %v5286_v47 = vsel %vm2912_vm11, %v2901_v51, %v5073_v55  ;;  %v1813_v32 = vshll.u32 %v5244_v54, 16 }
 0x116   : > { %2503 = vrot.lane.b32.xlu1 %v3690_v40, %s4026_s5  ;;  %v1819_v18 = vrot.slane %v1817_v33, 4  ;;  %v1823_v56 = vshll.u32 %v5268_v43, 16  ;;  %v1811_v9 = vrot.slane %v1810_v44, 4  ;;  %v1621_v11 = vshll.u32 %v5258_v53, 16 }
 0x117   : > { %v5277_v57 = vpop.permute.xlu1 %2593  ;;  %2487 = vrot.lane.b32.xlu0 %v3682_v8, %s4026_s5  ;;  %v1618_v63 = vor.u32 %v1617_v26, %v1614_v15  ;;  %v1627_v35 = vrot.slane %v1625_v0, 4  ;;  %v5298_v55 = vsel %vm2912_vm11, %v2885_v39, %v5103_v59  ;;  %v1815_v31 = vrot.slane %v1813_v32, 5  ;;  %v5307_v39 = vld [vmem:[%s4116_s30 + $0xb4] sm:$0xf]  ;;  %v5310_v0 = vld [vmem:[%s4116_s30 + $0xb8] sm:$0xf] }
 0x118   : > { %v5294_v28 = vpop.permute.xlu0 %2577  ;;  %v1825_v46 = vrot.slane %v1823_v56, 5  ;;  %v1631_v61 = vshll.u32 %v5281_v45, 16  ;;  %v1623_v62 = vrot.slane %v1621_v11, 5  ;;  %v3582_v33 = vrot.slane %v3566_v42, 9  ;;  %v5326_v42 = vld [vmem:[%s4116_s30 + $0xbc] sm:$0x1] }
 0x119   : > { %v1619_v40 = vrot.slane %v1618_v63, 4  ;;  %v5910_v8 = vrot.slane %v4438_v4, 5  ;;  %v1816_v1 = vsel %vm4184_vm5, %v1811_v9, %v1815_v31  ;;  %v1820_v29 = vor.u32 %v1819_v18, %v1815_v31 }
 0x11a   : > { %2599 = vrot.lane.b32.xlu1 %v3706_v12, %s4030_s9  ;;  %v1633_v51 = vrot.slane %v1631_v61, 5  ;;  %v3590_v59 = vrot.slane %v3574_v3, 9  ;;  %v1628_v44 = vor.u32 %v1627_v35, %v1623_v62  ;;  %v5912_v18 = vrot.slane %v4452_v25, 5 }
 0x11b   : > { %v1933_v20 = vrot.slane %v5910_v8, 4  ;;  %v5312_v15 = vpop.permute.xlu1 %2673  ;;  %2583 = vrot.lane.b32.xlu0 %v3698_v23, %s4030_s9  ;;  %v1624_v26 = vsel %vm4184_vm5, %v1619_v40, %v1623_v62  ;;  %v5911_v12 = vmov %v5910_v8  ;;  %v1821_v9 = vrot.slane %v1820_v29, 4  ;;  %v5349_v29 = vld [vmem:[%s4116_s30 + $0x54] sm:$0xf] }
 0x11c   : > { %v1932_v32 = vsel %vm4140_vm2, %v3582_v33, %v5911_v12  ;;  %v5913_v63 = vrot.slane %v4423_v52, 5  ;;  %v1629_v3 = vrot.slane %v1628_v44, 4  ;;  %v601_v25 = vshrl.u32 %v5307_v39, 16  ;;  %v5337_v40 = vpop.permute.xlu0 %2657 }
 0x11d   : > { %v1935_v56 = vsel %vm4140_vm2, %v1933_v20, %v5912_v18  ;;  %v604_v31 = vshll.u32 %v5307_v39, 16  ;;  %v610_v61 = vshll.u32 %v5310_v0, 16  ;;  %v1826_v62 = vsel %vm4184_vm5, %v1821_v9, %v1825_v46  ;;  %v5357_v18 = vld [vmem:[%s4116_s30 + $0x5c] sm:$0x1] }
 0x11e   : > { %v3726_v23 = vcombine.low %v1932_v32, %v1935_v56  ;;  %v1988_v11 = vsel %vm4140_vm2, %v3590_v59, %v5913_v63  ;;  %v5914_v4 = vmov %v5913_v63  ;;  %v5915_v33 = vrot.slane %v4446_v16, 5  ;;  %v5352_v59 = vld [vmem:[%s4116_s30 + $0x58] sm:$0xf] }
 0x11f   : > { %v1989_v35 = vrot.slane %v5914_v4, 4  ;;  %v614_v8 = vshrl.u32 %v5310_v0, 16  ;;  %v620_v20 = vshll.u32 %v5326_v42, 16  ;;  %v3722_v44 = vcombine.low %v1816_v1, %v1826_v62 }
 0x120   : > { %3752 = vmatprep.mubr.msk.bf16.mxu0 %vm2731_vm6, %v3726_v23  ;;  %v1634_v12 = vsel %vm4184_vm5, %v1629_v3, %v1633_v51  ;;  %v603_v32 = vrot.slane %v601_v25, 4  ;;  %v606_v56 = vrot.slane %v604_v31, 5  ;;  %v612_v9 = vrot.slane %v610_v61, 5 }
 0x121   : > { %v1991_v52 = vsel %vm4140_vm2, %v1989_v35, %v5915_v33  ;;  %v3714_v16 = vcombine.low %v1624_v26, %v1634_v12  ;;  %v616_v23 = vrot.slane %v614_v8, 4  ;;  %v5359_v63 = vpop.permute.xlu1 %2163  ;;  %2679 = vrot.lane.b32.xlu1 %v3722_v44, %s4031_s10  ;;  %v622_v4 = vrot.slane %v620_v20, 5 }
 0x122   : > { %v3734_v46 = vcombine.low %v1988_v11, %v1991_v52  ;;  %v409_v1 = vshrl.u32 %v5349_v29, 16  ;;  %v412_v51 = vshll.u32 %v5349_v29, 16  ;;  %v418_v11 = vshll.u32 %v5352_v59, 16  ;;  %v639_v52 = vld [vmem:[%s4116_s30 + $0xb4] sm:$0xe] }
 0x123   : > { %2663 = vrot.lane.b32.xlu0 %v3714_v16, %s4031_s10  ;;  %v607_v26 = vor.u32 %v606_v56, %v603_v32  ;;  %v617_v35 = vor.u32 %v616_v23, %v612_v9  ;;  %v422_v3 = vshrl.u32 %v5352_v59, 16  ;;  %v428_v25 = vshll.u32 %v5357_v18, 16  ;;  %v3929_v56 = vld [vmem:[%s4116_s30 + $0x84] sm:$0xf]  ;;  %v3930_v23 = vld [vmem:[%s4116_s30 + $0x88] sm:$0xf] }
 0x124   : > { %3760 = vmatprep.mubr.msk.bf16.mxu1 %vm2731_vm6, %v3734_v46  ;;  %v411_v31 = vrot.slane %v409_v1, 4  ;;  %v414_v61 = vrot.slane %v412_v51, 5  ;;  %v420_v62 = vrot.slane %v418_v11, 5  ;;  %v2953_v33 = vsel %vm2945_vm12, %v5298_v55, %v5135_v24  ;;  %v3931_v51 = vld [vmem:[%s4116_s30 + $0x24] sm:$0xf] }
 0x125   : > { %v608_v20 = vrot.slane %v607_v26, 4  ;;  %v618_v44 = vrot.slane %v617_v35, 4  ;;  %v424_v12 = vrot.slane %v422_v3, 4  ;;  %v430_v46 = vrot.slane %v428_v25, 5  ;;  %3170 = vmatmul.mubr.bf16.gmra.mrb[8].mxu0 %v2953_v33  ;;  %v3932_v11 = vld [vmem:[%s4116_s30 + $0x28] sm:$0xf] }
 0x126   : > { %v5373_v8 = vpop.permute.xlu0 %2147  ;;  %v415_v32 = vor.u32 %v414_v61, %v411_v31  ;;  %v2977_v16 = vsel %vm2945_vm12, %v5286_v47, %v5118_v21  ;;  %v3607_v1 = vcombine.low %v3929_v56, %v3930_v23  ;;  %v3599_v24 = vcombine.low %v3931_v51, %v3932_v11  ;;  %v631_v55 = vld [vmem:[%s4116_s30 + $0x54] sm:$0xe]  ;;  %v5387_v31 = vpop.permute.xlu1 %2243 }
 0x127   : > { %v613_v26 = vsel %vm4184_vm5, %v608_v20, %v612_v9  ;;  %v623_v35 = vsel %vm4184_vm5, %v618_v44, %v622_v4  ;;  %v425_v3 = vor.u32 %v424_v12, %v420_v62  ;;  %3234 = vmatmul.mubr.bf16.gmra.mrb[8].mxu1 %v2977_v16  ;;  %v3435_v25 = vrot.slane %v639_v52, 9  ;;  %v3466_v44 = vld [vmem:[%s4116_s30 + $0xc0] sm:$0xf]  ;;  %v5406_v16 = vld [vmem:[%s4116_s30 + $0xc4] sm:$0xf] }
 0x128   : > { %v3627_v21 = vcombine.low %v613_v26, %v623_v35  ;;  %v416_v47 = vrot.slane %v415_v32, 4  ;;  %v2767_v61 = vsel %vm2731_vm6, %v3607_v1, %v5140_v38  ;;  %v2743_v33 = vsel %vm2731_vm6, %v3599_v24, %v5167_v10 }
 0x129   : > { %v426_v56 = vrot.slane %v425_v3, 4  ;;  %v798_v9 = vrot.slane %v5310_v0, 5  ;;  %v801_v4 = vrot.slane %v5326_v42, 5  ;;  %v3427_v20 = vrot.slane %v631_v55, 9  ;;  %v5418_v55 = vld [vmem:[%s4116_s30 + $0x64] sm:$0xf] }
 0x12a   : > { %v5396_v52 = vpop.permute.xlu0 %2227  ;;  %2169 = vrot.lane.b32.xlu1 %v3627_v21, %s4028_s7  ;;  %v421_v12 = vsel %vm4184_vm5, %v416_v47, %v420_v62  ;;  %v742_v38 = vrot.slane %v5352_v59, 5  ;;  %v745_v10 = vrot.slane %v5357_v18, 5  ;;  %v2804_v32 = vsel %vm2780_vm7, %v2767_v61, %v5156_v7  ;;  %v3450_v62 = vld [vmem:[%s4116_s30 + $0x60] sm:$0xf] }
 0x12b   : > { %v431_v42 = vsel %vm4184_vm5, %v426_v56, %v430_v46  ;;  %v799_v23 = vsel %vm4140_vm2, %v3435_v25, %v798_v9  ;;  %v800_v1 = vrot.slane %v798_v9, 4  ;;  %v2788_v51 = vsel %vm2780_vm7, %v2743_v33, %v5192_v48  ;;  %v5424_v48 = vpop.permute.xlu1 %2339  ;;  %v3483_v33 = vld [vmem:[%s4116_s30 + $0xc8] sm:$0x1] }
 0x12c   : > { %v3619_v11 = vcombine.low %v421_v12, %v431_v42  ;;  %v743_v18 = vsel %vm4140_vm2, %v3427_v20, %v742_v38  ;;  %v744_v24 = vrot.slane %v742_v38, 4  ;;  %v1216_v7 = vshrl.u32 %v3466_v44, 16  ;;  %v5432_v12 = vld [vmem:[%s4116_s30 + $0x68] sm:$0x1] }
 0x12d   : > { %v802_v46 = vsel %vm4140_vm2, %v800_v1, %v801_v4  ;;  %v1219_v26 = vshll.u32 %v3466_v44, 16  ;;  %v1229_v35 = vshrl.u32 %v5406_v16, 16  ;;  %v3659_v3 = vcombine.low %v3466_v44, %v5406_v16 }
 0x12e   : > { %2153 = vrot.lane.b32.xlu0 %v3619_v11, %s4028_s7  ;;  %v3643_v25 = vcombine.low %v799_v23, %v802_v46  ;;  %v746_v21 = vsel %vm4140_vm2, %v744_v24, %v745_v10  ;;  %v1218_v47 = vrot.slane %v1216_v7, 4  ;;  %v1024_v61 = vshrl.u32 %v3450_v62, 16  ;;  %v5434_v44 = vpop.permute.xlu0 %2323 }
 0x12f   : > { %v3635_v56 = vcombine.low %v743_v18, %v746_v21  ;;  %v1221_v9 = vrot.slane %v1219_v26, 5  ;;  %v1027_v20 = vshll.u32 %v3450_v62, 16  ;;  %v1037_v4 = vshrl.u32 %v5418_v55, 16 }
 0x130   : > { %2249 = vrot.lane.b32.xlu1 %v3643_v25, %s4027_s6  ;;  %v1026_v38 = vrot.slane %v1024_v61, 4  ;;  %v3651_v42 = vcombine.low %v3450_v62, %v5418_v55  ;;  %v2837_v10 = vsel %vm2813_vm8, %v2804_v32, %v5194_v2  ;;  %v2821_v23 = vsel %vm2813_vm8, %v2788_v51, %v5208_v6  ;;  %v3499_v25 = vld [vmem:[%s4116_s30 + $0xc0] sm:$0xe] }
 0x131   : > { %v1029_v1 = vrot.slane %v1027_v20, 5  ;;  %v1222_v11 = vor.u32 %v1221_v9, %v1218_v47  ;;  %v1225_v18 = vshll.u32 %v5406_v16, 16  ;;  %v1231_v24 = vrot.slane %v1229_v35, 4  ;;  %v3491_v51 = vld [vmem:[%s4116_s30 + $0x60] sm:$0xe]  ;;  %v5450_v47 = vpop.permute.xlu1 %2419 }
 0x132   : > { %2233 = vrot.lane.b32.xlu0 %v3635_v56, %s4027_s6  ;;  %v1235_v7 = vshll.u32 %v3483_v33, 16  ;;  %v1033_v46 = vshll.u32 %v5418_v55, 16  ;;  %v1039_v26 = vrot.slane %v1037_v4, 4  ;;  %v1043_v62 = vshll.u32 %v5432_v12, 16 }
 0x133   : > { %v1223_v21 = vrot.slane %v1222_v11, 4  ;;  %v1227_v2 = vrot.slane %v1225_v18, 5  ;;  %v1030_v32 = vor.u32 %v1029_v1, %v1026_v38  ;;  %v2870_v6 = vsel %vm2846_vm9, %v2837_v10, %v5218_v49  ;;  %v5457_v11 = vpop.permute.xlu0 %2403 }
 0x134   : > { %2345 = vrot.lane.b32.xlu1 %v3659_v3, %s4025_s4  ;;  %v1237_v35 = vrot.slane %v1235_v7, 5  ;;  %v1035_v61 = vrot.slane %v1033_v46, 5  ;;  %v1045_v56 = vrot.slane %v1043_v62, 5  ;;  %v2854_v9 = vsel %vm2846_vm9, %v2821_v23, %v5223_v36  ;;  %v5466_v46 = vld [vmem:[%s4116_s30 + $0xcc] sm:$0xf] }
 0x135   : > { %v1228_v20 = vsel %vm4184_vm5, %v1223_v21, %v1227_v2  ;;  %v1232_v4 = vor.u32 %v1231_v24, %v1227_v2  ;;  %v1031_v38 = vrot.slane %v1030_v32, 4  ;;  %v3515_v1 = vrot.slane %v3499_v25, 9  ;;  %v5479_v21 = vld [vmem:[%s4116_s30 + $0xd0] sm:$0xf]  ;;  %v5481_v2 = vpop.permute.xlu1 %2499 }
 0x136   : > { %2329 = vrot.lane.b32.xlu0 %v3651_v42, %s4025_s4  ;;  %v1040_v49 = vor.u32 %v1039_v26, %v1035_v61  ;;  %v1410_v3 = vrot.slane %v5406_v16, 5  ;;  %v1413_v10 = vrot.slane %v3483_v33, 5  ;;  %v3507_v18 = vrot.slane %v3491_v51, 9 }
 0x137   : > { %v1233_v7 = vrot.slane %v1232_v4, 4  ;;  %v1036_v36 = vsel %vm4184_vm5, %v1031_v38, %v1035_v61  ;;  %v1354_v23 = vrot.slane %v5418_v55, 5  ;;  %v1357_v24 = vrot.slane %v5432_v12, 5  ;;  %v5490_v61 = vld [vmem:[%s4116_s30 + $0x70] sm:$0xf] }
 0x138   : > { %v1041_v62 = vrot.slane %v1040_v49, 4  ;;  %v1411_v42 = vsel %vm4140_vm2, %v3515_v1, %v1410_v3  ;;  %v1412_v16 = vrot.slane %v1410_v3, 4  ;;  %v2903_v33 = vsel %vm2879_vm10, %v2870_v6, %v5235_v13 }
 0x139   : > { %v1238_v26 = vsel %vm4184_vm5, %v1233_v7, %v1237_v35  ;;  %v1355_v55 = vsel %vm4140_vm2, %v3507_v18, %v1354_v23  ;;  %v1356_v25 = vrot.slane %v1354_v23, 4  ;;  %v2887_v12 = vsel %vm2879_vm10, %v2854_v9, %v5260_v37  ;;  %v3530_v35 = vld [vmem:[%s4116_s30 + $0x6c] sm:$0xf]  ;;  %v5504_v23 = vld [vmem:[%s4116_s30 + $0xd4] sm:$0x1] }
 0x13a   : > { %v3675_v32 = vcombine.low %v1228_v20, %v1238_v26  ;;  %v1046_v51 = vsel %vm4184_vm5, %v1041_v62, %v1045_v56  ;;  %v1414_v13 = vsel %vm4140_vm2, %v1412_v16, %v1413_v10  ;;  %v1828_v6 = vshrl.u32 %v5466_v46, 16  ;;  %v5495_v20 = vpop.permute.xlu0 %2483  ;;  %v3567_v26 = vld [vmem:[%s4116_s30 + $0x3c] sm:$0xe] }
 0x13b   : > { %v3667_v4 = vcombine.low %v1036_v36, %v1046_v51  ;;  %v3691_v38 = vcombine.low %v1411_v42, %v1414_v13  ;;  %v1358_v37 = vsel %vm4140_vm2, %v1356_v25, %v1357_v24  ;;  %v1831_v9 = vshll.u32 %v5466_v46, 16  ;;  %v5516_v13 = vpop.permute.xlu1 %2595 }
 0x13c   : > { %2425 = vrot.lane.b32.xlu1 %v3675_v32, %s4029_s8  ;;  %v3683_v56 = vcombine.low %v1355_v55, %v1358_v37  ;;  %v1830_v1 = vrot.slane %v1828_v6, 4  ;;  %v1841_v49 = vshrl.u32 %v5479_v21, 16  ;;  %v3707_v3 = vcombine.low %v5466_v46, %v5479_v21  ;;  %v5513_v46 = vld [vmem:[%s4116_s30 + $0x74] sm:$0x1] }
 0x13d   : > { %2409 = vrot.lane.b32.xlu0 %v3667_v4, %s4029_s8  ;;  %v1833_v10 = vrot.slane %v1831_v9, 5  ;;  %v1636_v18 = vshrl.u32 %v3530_v35, 16  ;;  %v1639_v7 = vshll.u32 %v3530_v35, 16  ;;  %v1649_v36 = vshrl.u32 %v5490_v61, 16  ;;  %v3575_v9 = vld [vmem:[%s4116_s30 + $0x9c] sm:$0xe] }
 0x13e   : > { %v3699_v24 = vcombine.low %v3530_v35, %v5490_v61  ;;  %v2936_v62 = vsel %vm2912_vm11, %v2903_v33, %v5277_v57  ;;  %v2920_v42 = vsel %vm2912_vm11, %v2887_v12, %v5294_v28  ;;  %v1837_v16 = vshll.u32 %v5479_v21, 16  ;;  %s3771_s8 = sshll.u32 %s4015_s15, 12 }
 0x13f   : > { %v1638_v55 = vrot.slane %v1636_v18, 4  ;;  %v1641_v25 = vrot.slane %v1639_v7, 5  ;;  %v1834_v32 = vor.u32 %v1833_v10, %v1830_v1  ;;  %v1843_v51 = vrot.slane %v1841_v49, 4  ;;  %v5524_v1 = vpop.permute.xlu0 %2579  ;;  %s5834_s18 = scalar_lea.hbm %s5893_s3, %s3771_s8 }
 0x140   : > { %2505 = vrot.lane.b32.xlu1 %v3691_v38, %s4026_s5  ;;  %v1839_v6 = vrot.slane %v1837_v16, 5  ;;  %v1847_v57 = vshll.u32 %v5504_v23, 16  ;;  %v1645_v33 = vshll.u32 %v5490_v61, 16  ;;  %v1651_v28 = vrot.slane %v1649_v36, 4 }
 0x141   : > { %2489 = vrot.lane.b32.xlu0 %v3683_v56, %s4026_s5  ;;  %v1835_v12 = vrot.slane %v1834_v32, 4  ;;  %v1642_v35 = vor.u32 %v1641_v25, %v1638_v55  ;;  %v1655_v4 = vshll.u32 %v5513_v46, 16  ;;  %v3583_v37 = vrot.slane %v3567_v26, 9 }
 0x142   : > { %v1844_v49 = vor.u32 %v1843_v51, %v1839_v6  ;;  %v1849_v10 = vrot.slane %v1847_v57, 5  ;;  %v1647_v18 = vrot.slane %v1645_v33, 5  ;;  %v5916_v38 = vrot.slane %v4570_v5, 5 }
 0x143   : > { %v1840_v36 = vsel %vm4184_vm5, %v1835_v12, %v1839_v6  ;;  %v1643_v16 = vrot.slane %v1642_v35, 4  ;;  %v1657_v56 = vrot.slane %v1655_v4, 5  ;;  %v5918_v51 = vrot.slane %v4594_v41, 5  ;;  %v3568_v35 = vld [vmem:[%s4116_s30 + $0x48] sm:$0xe] }
 0x144   : > { %v1940_v7 = vrot.slane %v5916_v38, 4  ;;  %v5917_v55 = vmov %v5916_v38  ;;  %2601 = vrot.lane.b32.xlu1 %v3707_v3, %s4030_s9  ;;  %v1845_v25 = vrot.slane %v1844_v49, 4  ;;  %v1652_v32 = vor.u32 %v1651_v28, %v1647_v18  ;;  %v5546_v28 = vpop.permute.xlu1 %2675 }
 0x145   : > { %v1939_v26 = vsel %vm4140_vm2, %v3583_v37, %v5917_v55  ;;  %v3591_v33 = vrot.slane %v3575_v9, 9  ;;  %2585 = vrot.lane.b32.xlu0 %v3699_v24, %s4030_s9  ;;  %v1648_v5 = vsel %vm4184_vm5, %v1643_v16, %v1647_v18  ;;  %v5919_v12 = vrot.slane %v4554_v58, 5  ;;  %v3576_v18 = vld [vmem:[%s4116_s30 + $0xa8] sm:$0xe]  ;;  %v3935_v55 = vld [vmem:[%s4116_s30 + $0x30] sm:$0xf] }
 0x146   : > { %v1942_v57 = vsel %vm4140_vm2, %v1940_v7, %v5918_v51  ;;  %v2956_v41 = vsel %vm2945_vm12, %v2920_v42, %v5337_v40  ;;  %v1850_v4 = vsel %vm4184_vm5, %v1845_v25, %v1849_v10  ;;  %v1653_v24 = vrot.slane %v1652_v32, 4  ;;  %v3933_v7 = vld [vmem:[%s4116_s30 + $0x90] sm:$0xf]  ;;  %v3934_v10 = vld [vmem:[%s4116_s30 + $0x94] sm:$0xf]  ;;  %v2660_v25 = vpop.permute.xlu0 %2659 }
 0x147   : > { %v3727_v6 = vcombine.low %v1939_v26, %v1942_v57  ;;  %v1996_v3 = vrot.slane %v5919_v12, 4  ;;  %v5920_v37 = vmov %v5919_v12  ;;  %v2980_v49 = vsel %vm2945_vm12, %v2936_v62, %v5312_v15  ;;  %v3936_v58 = vld [vmem:[%s4116_s30 + $0x34] sm:$0xf] }
 0x148   : > { %v1995_v9 = vsel %vm4140_vm2, %v3591_v33, %v5920_v37  ;;  %v3723_v38 = vcombine.low %v1840_v36, %v1850_v4  ;;  %v5921_v40 = vrot.slane %v4581_v27, 5  ;;  %v3608_v16 = vcombine.low %v3933_v7, %v3934_v10  ;;  %v3569_v37 = vld [vmem:[%s4116_s30 + $0x54] sm:$0xe] }
 0x149   : > { %3753 = vmatprep.mubr.msk.bf16.mxu0 %vm2731_vm6, %v3727_v6  ;;  %v3600_v26 = vcombine.low %v3935_v55, %v3936_v58  ;;  %v1658_v32 = vsel %vm4184_vm5, %v1653_v24, %v1657_v56  ;;  %v3584_v62 = vrot.slane %v3568_v35, 9  ;;  %v5922_v36 = vrot.slane %v4807_v34, 5 }
 0x14a   : > { %v1998_v42 = vsel %vm4140_vm2, %v1996_v3, %v5921_v40  ;;  %3178 = vmatmul.mubr.bf16.gmra.mrb[12].mxu0 %v2956_v41  ;;  %v2011_v27 = vrot.slane %v5039_v22, 5  ;;  %2681 = vrot.lane.b32.xlu1 %v3723_v38, %s4031_s10  ;;  %v3715_v57 = vcombine.low %v1648_v5, %v1658_v32  ;;  %v3592_v6 = vrot.slane %v3576_v18, 9  ;;  %v3577_v18 = vld [vmem:[%s4116_s30 + $0xb4] sm:$0xe] }
 0x14b   : > { %v3735_v15 = vcombine.low %v1995_v9, %v1998_v42  ;;  %v1947_v51 = vrot.slane %v5922_v36, 4  ;;  %v2746_v33 = vsel %vm2731_vm6, %v3600_v26, %v5373_v8  ;;  %v2770_v19 = vsel %vm2731_vm6, %v3608_v16, %v5359_v63  ;;  %v5595_v35 = vpop.permute.xlu1 %2165  ;;  %v5930_v26 = vld [vmem:[#allocation5_spill] sm:$0xff] }
 0x14c   : > { %v2790_v56 = vsel %vm2780_vm7, %v2746_v33, %v5396_v52  ;;  %v5923_v12 = vmov %v5922_v36  ;;  %v5924_v5 = vrot.slane %v4833_v60, 5  ;;  %2665 = vrot.lane.b32.xlu0 %v3715_v57, %s4031_s10  ;;  %v2806_v3 = vsel %vm2780_vm7, %v2770_v19, %v5387_v31  ;;  %v3578_v36 = vld [vmem:[%s4116_s30 + $0xc0] sm:$0xe]  ;;  %v3571_v19 = vld [vmem:[%s4116_s30 + $0x6c] sm:$0xe] }
 0x14d   : > { %3761 = vmatprep.mubr.msk.bf16.mxu1 %vm2731_vm6, %v3735_v15  ;;  %v1946_v22 = vsel %vm4140_vm2, %v3584_v62, %v5923_v12  ;;  %v2823_v63 = vsel %vm2813_vm8, %v2790_v56, %v5434_v44  ;;  %v5925_v34 = vrot.slane %v4797_v50, 5  ;;  %v1955_v60 = vrot.slane %v5052_v14, 5  ;;  %v5617_v50 = vpop.permute.xlu0 %2149 }
 0x14e   : > { %v1949_v8 = vsel %vm4140_vm2, %v1947_v51, %v5924_v5  ;;  %3242 = vmatmul.mubr.bf16.gmra.mrb[12].mxu1 %v2980_v49  ;;  %v2839_v4 = vsel %vm2813_vm8, %v2806_v3, %v5424_v48  ;;  %v2856_v24 = vsel %vm2846_vm9, %v2823_v63, %v5457_v11  ;;  %v2015_v9 = vrot.slane %v5244_v54, 5  ;;  %v3579_v63 = vld [vmem:[%s4116_s30 + $0xcc] sm:$0xe] }
 0x14f   : > { %v3728_v52 = vcombine.low %v1946_v22, %v1949_v8  ;;  %v2003_v41 = vrot.slane %v5925_v34, 4  ;;  %v5926_v31 = vmov %v5925_v34  ;;  %v2872_v49 = vsel %vm2846_vm9, %v2839_v4, %v5450_v47 }
 0x150   : > { %v2002_v44 = vsel %vm4140_vm2, %v3592_v6, %v5926_v31  ;;  %v2889_v14 = vsel %vm2879_vm10, %v2856_v24, %v5495_v20  ;;  %v5927_v48 = vrot.slane %v4822_v30, 5  ;;  %v1959_v38 = vrot.slane %v5258_v53, 5  ;;  %v3570_v20 = vld [vmem:[%s4116_s30 + $0x60] sm:$0xe] }
 0x151   : > { %3754 = vmatprep.mubr.msk.bf16.mxu0 %vm2731_vm6, %v3728_v52  ;;  %v2905_v54 = vsel %vm2879_vm10, %v2872_v49, %v5481_v2  ;;  %v2922_v47 = vsel %vm2912_vm11, %v2889_v14, %v5524_v1  ;;  %v1962_v42 = vrot.slane %v5281_v45, 5  ;;  %v3585_v10 = vrot.slane %v3569_v37, 9  ;;  %v2246_v2 = vpop.permute.xlu1 %2245  ;;  %v5928_v1 = vld [vmem:[#allocation6_spill] sm:$0xff]  ;;  %v2230_v51 = vpop.permute.xlu0 %2229 }
 0x152   : > { %v2005_v11 = vsel %vm4140_vm2, %v2003_v41, %v5927_v48  ;;  %v2938_v30 = vsel %vm2912_vm11, %v2905_v54, %v5516_v13  ;;  %v2959_v7 = vsel %vm2945_vm12, %v2922_v47, %v2660_v25  ;;  %v5929_v16 = vrot.slane %v5928_v1, 5  ;;  %v3940_v1 = vld [vmem:[%s4116_s30 + $0x40] sm:$0xf] }
 0x153   : > { %v3736_v40 = vcombine.low %v2002_v44, %v2005_v11  ;;  %3186 = vmatmul.mubr.bf16.gmra.mrb[16].mxu0 %v2959_v7  ;;  %v2983_v53 = vsel %vm2945_vm12, %v2938_v30, %v5546_v28  ;;  %v3593_v58 = vrot.slane %v3577_v18, 9  ;;  %v5931_v45 = vrot.slane %v5930_v26, 5  ;;  %v3937_v30 = vld [vmem:[%s4116_s30 + $0x9c] sm:$0xf]  ;;  %v3938_v7 = vld [vmem:[%s4116_s30 + $0xa0] sm:$0xf] }
 0x154   : > { %v1954_v55 = vrot.slane %v5929_v16, 4  ;;  %v2018_v13 = vrot.slane %v5268_v43, 5  ;;  %v5932_v25 = vmov %v5929_v16  ;;  %v3586_v62 = vrot.slane %v3570_v20, 9 }
 0x155   : > { %3762 = vmatprep.mubr.msk.bf16.mxu1 %vm2731_vm6, %v3736_v40  ;;  %v2010_v32 = vrot.slane %v5931_v45, 4  ;;  %v1953_v15 = vsel %vm4140_vm2, %v3585_v10, %v5932_v25  ;;  %v5933_v57 = vmov %v5931_v45  ;;  %v1961_v6 = vrot.slane %v1959_v38, 4  ;;  %v2326_v37 = vpop.permute.xlu0 %2325 }
 0x156   : > { %v1956_v28 = vsel %vm4140_vm2, %v1954_v55, %v1955_v60  ;;  %v2009_v33 = vsel %vm4140_vm2, %v3593_v58, %v5933_v57  ;;  %3250 = vmatmul.mubr.bf16.gmra.mrb[16].mxu1 %v2983_v53  ;;  %v1960_v22 = vsel %vm4140_vm2, %v3586_v62, %v1959_v38  ;;  %v3594_v8 = vrot.slane %v3578_v36, 9  ;;  %v2342_v60 = vpop.permute.xlu1 %2341  ;;  %v3939_v53 = vld [vmem:[%s4116_s30 + $0x3c] sm:$0xf] }
 0x157   : > { %v2012_v43 = vsel %vm4140_vm2, %v2010_v32, %v2011_v27  ;;  %v3729_v56 = vcombine.low %v1953_v15, %v1956_v28  ;;  %v1963_v5 = vsel %vm4140_vm2, %v1961_v6, %v1962_v42  ;;  %v2017_v3 = vrot.slane %v2015_v9, 4 }
 0x158   : > { %v3737_v12 = vcombine.low %v2009_v33, %v2012_v43  ;;  %v3730_v52 = vcombine.low %v1960_v22, %v1963_v5  ;;  %v3611_v27 = vcombine.low %v5307_v39, %v5310_v0  ;;  %v3603_v34 = vcombine.low %v5349_v29, %v5352_v59 }
 0x159   : > { %3755 = vmatprep.mubr.msk.bf16.mxu0 %vm2731_vm6, %v3729_v56  ;;  %v3587_v41 = vrot.slane %v3571_v19, 9  ;;  %v2016_v4 = vsel %vm4140_vm2, %v3594_v8, %v2015_v9  ;;  %v2019_v24 = vsel %vm4140_vm2, %v2017_v3, %v2018_v13  ;;  %v1966_v31 = vrot.slane %v5490_v61, 5 }
 0x15a   : > { %3763 = vmatprep.mubr.msk.bf16.mxu1 %vm2731_vm6, %v3737_v12  ;;  %v1969_v44 = vrot.slane %v5513_v46, 5  ;;  %v3738_v49 = vcombine.low %v2016_v4, %v2019_v24  ;;  %v3595_v14 = vrot.slane %v3579_v63, 9  ;;  %v2022_v48 = vrot.slane %v5479_v21, 5  ;;  %v3943_v24 = vld [vmem:[%s4116_s30 + $0x48] sm:$0xf] }
 0x15b   : > { %v5672_v11 = vsel %vm4140_vm2, %v3587_v41, %v1966_v31  ;;  %v1968_v9 = vrot.slane %v1966_v31, 4  ;;  %v2025_v18 = vrot.slane %v5504_v23, 5  ;;  %v2422_v47 = vpop.permute.xlu1 %2421  ;;  %v3609_v10 = vcombine.low %v3937_v30, %v3938_v7  ;;  %v3941_v41 = vld [vmem:[%s4116_s30 + $0xa8] sm:$0xf]  ;;  %v3944_v31 = vld [vmem:[%s4116_s30 + $0x4c] sm:$0xf] }
 0x15c   : > { %v5677_v61 = vsel %vm4140_vm2, %v3595_v14, %v2022_v48  ;;  %v2024_v46 = vrot.slane %v2022_v48, 4  ;;  %v2406_v40 = vpop.permute.xlu0 %2405  ;;  %v3601_v16 = vcombine.low %v3939_v53, %v3940_v1 }
 0x15d   : > { %v5681_v38 = vsel %vm4140_vm2, %v1968_v9, %v1969_v44  ;;  %v2773_v58 = vsel %vm2731_vm6, %v3609_v10, %v5595_v35  ;;  %v3602_v44 = vcombine.low %v3943_v24, %v3944_v31 }
 0x15e   : > { %v3731_v21 = vcombine.low %v5672_v11, %v5681_v38  ;;  %v5687_v54 = vsel %vm4140_vm2, %v2024_v46, %v2025_v18  ;;  %v2749_v26 = vsel %vm2731_vm6, %v3601_v16, %v5617_v50  ;;  %v2808_v45 = vsel %vm2780_vm7, %v2773_v58, %v2246_v2 }
 0x15f   : > { %v3739_v23 = vcombine.low %v5677_v61, %v5687_v54  ;;  %v2502_v20 = vpop.permute.xlu1 %2501  ;;  %v2792_v32 = vsel %vm2780_vm7, %v2749_v26, %v2230_v51  ;;  %v2841_v13 = vsel %vm2813_vm8, %v2808_v45, %v2342_v60  ;;  %v3942_v60 = vld [vmem:[%s4116_s30 + $0xac] sm:$0xf]  ;;  %s175_s30 = sand.u32 1, %s4007_s13   ;;  %v5745_v45 = vld [vmem:[%s5892_s2] ss:$0 sm:$0xff] }
 0x160   : > { %v2486_v42 = vpop.permute.xlu0 %2485  ;;  %v2825_v25 = vsel %vm2813_vm8, %v2792_v32, %v2326_v37  ;;  %v2874_v15 = vsel %vm2846_vm9, %v2841_v13, %v2422_v47  ;;  %v3610_v4 = vcombine.low %v3941_v41, %v3942_v60  ;;  %s3418_s4 = sshll.u32 %s175_s30, 8  ;;  %s5844_s15 = scalar_lea.sflag [#allocation3], %s175_s30 }
 0x161   : > { %v2858_v62 = vsel %vm2846_vm9, %v2825_v25, %v2406_v40  ;;  %v2907_v36 = vsel %vm2879_vm10, %v2874_v15, %v2502_v20  ;;  %s5749_s7 = scalar_lea.vmem [#allocation2], %s3418_s4 }
 0x162   : > { %v2891_v35 = vsel %vm2879_vm10, %v2858_v62, %v2486_v42  ;;  %s3330_s9 = sshll.u32 %s5749_s7, 4  ;;  %s5836_s9 = int_to_ptr.vmem [resolvable:$true] %s3330_s9 }
 0x163   : > { %v2598_v55 = vpop.permute.xlu1 %2597  ;;  %s3945_s19 = scalar_lea.vmem %s5836_s9, 4096  ;;  %p3952_p1 = scmp.lt.s32.totalorder %s5836_s9, %s3950_s23 }
 0x164   : > { %v2582_v17 = vpop.permute.xlu0 %2581  ;;  %v2940_v28 = vsel %vm2912_vm11, %v2907_v36, %v2598_v55  ;;  %p3946_p12 = scmp.ne.s32.totalorder %s5836_s9, %s3945_s19  ;;  %p3953_p2 = scmp.lt.s32.totalorder %s3951_s26, %s3945_s19 }
 0x165   : > { %v2924_v50 = vsel %vm2912_vm11, %v2891_v35, %v2582_v17 }
 0x166   : > { %p3947_p13 = pnand %p3946_p12, %p4096_p4  ;;  %p3954_p3 = por %p3953_p2, %p3952_p1 }
 0x168   : > { %p3948_p0 = pneg %p3947_p13 }
 0x16a   : > { %v2678_v57 = vpop.permute.xlu1 %2677  ;;  %p3955_p5 = pnand %p3954_p3, %p3948_p0 }
 0x16b   : > { %v2662_v2 = vpop.permute.xlu0 %2661  ;;  %v2986_v51 = vsel %vm2945_vm12, %v2940_v28, %v2678_v57 }
 0x16c   : > { %v2962_v33 = vsel %vm2945_vm12, %v2924_v50, %v2662_v2  ;;  %3258 = vmatmul.mubr.bf16.gmra.mrb[20].mxu1 %v2986_v51 }
 0x16d   : > { %3194 = vmatmul.mubr.bf16.gmra.mrb[20].mxu0 %v2962_v33  ;;  %3764 = vmatprep.mubr.msk.bf16.mxu1 %vm2731_vm6, %v3738_v49 }
 0x16e   : > { %3756 = vmatprep.mubr.msk.bf16.mxu0 %vm2731_vm6, %v3730_v52 }
 0x172   : > { %v2168_v43 = vpop.permute.xlu1 %2167 }
 0x173   : > { %v2776_v49 = vsel %vm2731_vm6, %v3610_v4, %v2168_v43 }
 0x177   : > { %v2152_v6 = vpop.permute.xlu0 %2151 }
 0x178   : > { %v2248_v19 = vpop.permute.xlu1 %2247  ;;  %v2752_v14 = vsel %vm2731_vm6, %v3602_v44, %v2152_v6 }
 0x179   : > { %v2810_v48 = vsel %vm2780_vm7, %v2776_v49, %v2248_v19 }
 0x17b   : > { %v2232_v56 = vpop.permute.xlu0 %2231 }
 0x17c   : > { %v2344_v12 = vpop.permute.xlu1 %2343  ;;  %v2794_v9 = vsel %vm2780_vm7, %v2752_v14, %v2232_v56 }
 0x17d   : > { %v2843_v18 = vsel %vm2813_vm8, %v2810_v48, %v2344_v12 }
 0x17f   : > { %v2328_v22 = vpop.permute.xlu0 %2327 }
 0x180   : > { %v2827_v46 = vsel %vm2813_vm8, %v2794_v9, %v2328_v22 }
 0x184   : > { %v2424_v5 = vpop.permute.xlu1 %2423 }
 0x185   : > { %v2408_v8 = vpop.permute.xlu0 %2407  ;;  %v2876_v47 = vsel %vm2846_vm9, %v2843_v18, %v2424_v5 }
 0x186   : > { %v2860_v40 = vsel %vm2846_vm9, %v2827_v46, %v2408_v8 }
 0x188   : > { %v2504_v3 = vpop.permute.xlu1 %2503 }
 0x189   : > { %v2488_v63 = vpop.permute.xlu0 %2487  ;;  %v2909_v20 = vsel %vm2879_vm10, %v2876_v47, %v2504_v3 }
 0x18a   : > { %v2893_v42 = vsel %vm2879_vm10, %v2860_v40, %v2488_v63 }
 0x18c   : > { %v2600_v37 = vpop.permute.xlu1 %2599 }
 0x18d   : > { %v2584_v52 = vpop.permute.xlu0 %2583  ;;  %v2942_v30 = vsel %vm2912_vm11, %v2909_v20, %v2600_v37 }
 0x18e   : > { %v2926_v10 = vsel %vm2912_vm11, %v2893_v42, %v2584_v52 }
 0x193   : > { %v2680_v7 = vpop.permute.xlu1 %2679 }
 0x194   : > { %v2989_v1 = vsel %vm2945_vm12, %v2942_v30, %v2680_v7 }
 0x195   : > { %v2664_v53 = vpop.permute.xlu0 %2663  ;;  %3266 = vmatmul.mubr.bf16.gmra.mrb[24].mxu1 %v2989_v1 }
 0x196   : > { %v2965_v16 = vsel %vm2945_vm12, %v2926_v10, %v2664_v53  ;;  %3765 = vmatprep.mubr.msk.bf16.mxu1 %vm2731_vm6, %v3739_v23 }
 0x197   : > { %3202 = vmatmul.mubr.bf16.gmra.mrb[24].mxu0 %v2965_v16 }
 0x198   : > { %3757 = vmatprep.mubr.msk.bf16.mxu0 %vm2731_vm6, %v3731_v21 }
 0x19c   : > { %v2170_v55 = vpop.permute.xlu1 %2169 }
 0x19d   : > { %v2779_v33 = vsel %vm2731_vm6, %v3611_v27, %v2170_v55 }
 0x1a0   : > { %v2154_v58 = vpop.permute.xlu0 %2153 }
 0x1a1   : > { %v2755_v56 = vsel %vm2731_vm6, %v3603_v34, %v2154_v58 }
 0x1a2   : > { %v2250_v17 = vpop.permute.xlu1 %2249 }
 0x1a3   : > { %v2812_v6 = vsel %vm2780_vm7, %v2779_v33, %v2250_v17 }
 0x1a4   : > { %v2234_v26 = vpop.permute.xlu0 %2233 }
 0x1a5   : > { %v2796_v22 = vsel %vm2780_vm7, %v2755_v56, %v2234_v26 }
 0x1a6   : > { %v2346_v61 = vpop.permute.xlu1 %2345 }
 0x1a7   : > { %v3155_v23 = vpop.f32.mrb[0].mxu0  ;;  %v3219_v11 = vpop.f32.mrb[0].mxu1  ;;  %v2845_v12 = vsel %vm2813_vm8, %v2812_v6, %v2346_v61 }
 0x1a8   : > { %v2330_v54 = vpop.permute.xlu0 %2329  ;;  %v3156_v32 = vadd.f32 %v5745_v45, %v3155_v23  ;;  %v3157_v38 = vpop.f32.mrb[1].mxu0  ;;  %v3220_v21 = vadd.f32 %v5745_v45, %v3219_v11 }
 0x1a9   : > { %v3221_v13 = vpop.f32.mrb[1].mxu1  ;;  %v3158_v25 = vpop.f32.mrb[2].mxu0  ;;  %v2829_v8 = vsel %vm2813_vm8, %v2796_v22, %v2330_v54 }
 0x1aa   : > { %3282 = vst [vmem:[%s5749_s7] sm:$0xff] %v3156_v32  ;;  %v3159_v15 = vadd.f32 %v5745_v45, %v3158_v25  ;;  %v3222_v62 = vpop.f32.mrb[2].mxu1  ;;  %v3160_v36 = vpop.f32.mrb[3].mxu0  ;;  %3298 = vst [vmem:[%s5749_s7 + $0x80] sm:$0xff] %v3220_v21 }
 0x1ab   : > { %v3223_v35 = vadd.f32 %v5745_v45, %v3222_v62  ;;  %v3224_v28 = vpop.f32.mrb[3].mxu1 }
 0x1ac   : > { %3283 = vst [vmem:[%s5749_s7 + $0x8] sm:$0xff] %v3159_v15 }
 0x1ad   : > { %3299 = vst [vmem:[%s5749_s7 + $0x88] sm:$0xff] %v3223_v35 }
 0x1ae   : > { %v2426_v57 = vpop.permute.xlu1 %2425 }
 0x1af   : > { %v2410_v50 = vpop.permute.xlu0 %2409  ;;  %v2878_v5 = vsel %vm2846_vm9, %v2845_v12, %v2426_v57 }
 0x1b0   : > { %v2862_v0 = vsel %vm2846_vm9, %v2829_v8, %v2410_v50 }
 0x1b2   : > { %v2506_v2 = vpop.permute.xlu1 %2505 }
 0x1b3   : > { %v2490_v51 = vpop.permute.xlu0 %2489  ;;  %v2911_v39 = vsel %vm2879_vm10, %v2878_v5, %v2506_v2 }
 0x1b4   : > { %v2895_v29 = vsel %vm2879_vm10, %v2862_v0, %v2490_v51 }
 0x1b6   : > { %v2602_v43 = vpop.permute.xlu1 %2601 }
 0x1b7   : > { %v2586_v19 = vpop.permute.xlu0 %2585  ;;  %v2944_v27 = vsel %vm2912_vm11, %v2911_v39, %v2602_v43 }
 0x1b8   : > { %v2928_v34 = vsel %vm2912_vm11, %v2895_v29, %v2586_v19 }
 0x1bc   : > { %v2682_v3 = vpop.permute.xlu1 %2681 }
 0x1bd   : > { %v2992_v59 = vsel %vm2945_vm12, %v2944_v27, %v2682_v3 }
 0x1be   : > { %v2666_v63 = vpop.permute.xlu0 %2665  ;;  %3274 = vmatmul.mubr.bf16.gmra.mrb[28].mxu1 %v2992_v59 }
 0x1bf   : > { %v2968_v41 = vsel %vm2945_vm12, %v2928_v34, %v2666_v63 }
 0x1c0   : > { %3210 = vmatmul.mubr.bf16.gmra.mrb[28].mxu0 %v2968_v41 }
 0x1ce   : > { %v3163_v60 = vpop.f32.mrb[4].mxu0 }
 0x1cf   : > { %v3164_v4 = vadd.f32 %v5745_v45, %v3163_v60  ;;  %v3165_v24 = vpop.f32.mrb[5].mxu0 }
 0x1d0   : > { %v3227_v31 = vpop.f32.mrb[4].mxu1  ;;  %v3166_v44 = vpop.f32.mrb[6].mxu0 }
 0x1d1   : > { %3284 = vst [vmem:[%s5749_s7 + $0x10] sm:$0xff] %v3164_v4  ;;  %v3228_v37 = vadd.f32 %v5745_v45, %v3227_v31  ;;  %v3229_v49 = vpop.f32.mrb[5].mxu1  ;;  %v3167_v52 = vadd.f32 %v5745_v45, %v3166_v44  ;;  %v3168_v14 = vpop.f32.mrb[7].mxu0 }
 0x1d2   : > { %v3230_v48 = vpop.f32.mrb[6].mxu1 }
 0x1d3   : > { %3300 = vst [vmem:[%s5749_s7 + $0x90] sm:$0xff] %v3228_v37  ;;  %3285 = vst [vmem:[%s5749_s7 + $0x18] sm:$0xff] %v3167_v52  ;;  %v3231_v9 = vadd.f32 %v5745_v45, %v3230_v48  ;;  %v3232_v18 = vpop.f32.mrb[7].mxu1 }
 0x1d5   : > { %3301 = vst [vmem:[%s5749_s7 + $0x98] sm:$0xff] %v3231_v9 }
 0x1f8   : > { %v3171_v46 = vpop.f32.mrb[8].mxu0 }
 0x1f9   : > { %v3172_v47 = vadd.f32 %v5745_v45, %v3171_v46  ;;  %v3173_v40 = vpop.f32.mrb[9].mxu0 }
 0x1fa   : > { %v3235_v20 = vpop.f32.mrb[8].mxu1  ;;  %v3174_v42 = vpop.f32.mrb[10].mxu0 }
 0x1fb   : > { %3286 = vst [vmem:[%s5749_s7 + $0x20] sm:$0xff] %v3172_v47  ;;  %v3236_v30 = vadd.f32 %v5745_v45, %v3235_v20  ;;  %v3237_v7 = vpop.f32.mrb[9].mxu1  ;;  %v3175_v10 = vadd.f32 %v5745_v45, %v3174_v42  ;;  %v3176_v53 = vpop.f32.mrb[11].mxu0 }
 0x1fc   : > { %v3238_v1 = vpop.f32.mrb[10].mxu1 }
 0x1fd   : > { %3302 = vst [vmem:[%s5749_s7 + $0xa0] sm:$0xff] %v3236_v30  ;;  %3287 = vst [vmem:[%s5749_s7 + $0x28] sm:$0xff] %v3175_v10  ;;  %v3239_v16 = vadd.f32 %v5745_v45, %v3238_v1  ;;  %v3240_v55 = vpop.f32.mrb[11].mxu1 }
 0x1ff   : > { %3303 = vst [vmem:[%s5749_s7 + $0xa8] sm:$0xff] %v3239_v16 }
 0x21d   : > { %v3179_v58 = vpop.f32.mrb[12].mxu0 }
 0x21e   : > { %v3180_v17 = vadd.f32 %v5745_v45, %v3179_v58  ;;  %v3181_v26 = vpop.f32.mrb[13].mxu0 }
 0x21f   : > { %v3182_v61 = vpop.f32.mrb[14].mxu0 }
 0x220   : > { %3288 = vst [vmem:[%s5749_s7 + $0x30] sm:$0xff] %v3180_v17  ;;  %v3183_v23 = vadd.f32 %v5745_v45, %v3182_v61  ;;  %v3184_v32 = vpop.f32.mrb[15].mxu0 }
 0x221   : > { %v3243_v54 = vpop.f32.mrb[12].mxu1 }
 0x222   : > { %v3244_v11 = vadd.f32 %v5745_v45, %v3243_v54  ;;  %v3245_v38 = vpop.f32.mrb[13].mxu1  ;;  %3289 = vst [vmem:[%s5749_s7 + $0x38] sm:$0xff] %v3183_v23 }
 0x223   : > { %v3246_v21 = vpop.f32.mrb[14].mxu1 }
 0x224   : > { %3304 = vst [vmem:[%s5749_s7 + $0xb0] sm:$0xff] %v3244_v11  ;;  %v3247_v13 = vadd.f32 %v5745_v45, %v3246_v21  ;;  %v3248_v25 = vpop.f32.mrb[15].mxu1 }
 0x226   : > { %3305 = vst [vmem:[%s5749_s7 + $0xb8] sm:$0xff] %v3247_v13  ;;  %v3187_v15 = vpop.f32.mrb[16].mxu0 }
 0x227   : > { %v3188_v62 = vadd.f32 %v5745_v45, %v3187_v15  ;;  %v3189_v36 = vpop.f32.mrb[17].mxu0 }
 0x228   : > { %v3190_v35 = vpop.f32.mrb[18].mxu0 }
 0x229   : > { %3290 = vst [vmem:[%s5749_s7 + $0x40] sm:$0xff] %v3188_v62  ;;  %v3251_v28 = vpop.f32.mrb[16].mxu1  ;;  %v3191_v57 = vadd.f32 %v5745_v45, %v3190_v35  ;;  %v3192_v50 = vpop.f32.mrb[19].mxu0 }
 0x22a   : > { %v3252_v2 = vadd.f32 %v5745_v45, %v3251_v28  ;;  %v3253_v51 = vpop.f32.mrb[17].mxu1 }
 0x22b   : > { %3291 = vst [vmem:[%s5749_s7 + $0x48] sm:$0xff] %v3191_v57  ;;  %v3254_v33 = vpop.f32.mrb[18].mxu1 }
 0x22c   : > { %3306 = vst [vmem:[%s5749_s7 + $0xc0] sm:$0xff] %v3252_v2  ;;  %v3255_v43 = vadd.f32 %v5745_v45, %v3254_v33  ;;  %v3256_v6 = vpop.f32.mrb[19].mxu1 }
 0x22e   : > { %3307 = vst [vmem:[%s5749_s7 + $0xc8] sm:$0xff] %v3255_v43 }
 0x23f   : > { %v3259_v19 = vpop.f32.mrb[20].mxu1 }
 0x240   : > { %v3195_v56 = vpop.f32.mrb[20].mxu0  ;;  %v3260_v12 = vadd.f32 %v5745_v45, %v3259_v19  ;;  %v3261_v22 = vpop.f32.mrb[21].mxu1 }
 0x241   : > { %v3196_v5 = vadd.f32 %v5745_v45, %v3195_v56  ;;  %v3197_v8 = vpop.f32.mrb[21].mxu0  ;;  %v3262_v39 = vpop.f32.mrb[22].mxu1 }
 0x242   : > { %3308 = vst [vmem:[%s5749_s7 + $0xd0] sm:$0xff] %v3260_v12  ;;  %v3198_v0 = vpop.f32.mrb[22].mxu0  ;;  %v3263_v27 = vadd.f32 %v5745_v45, %v3262_v39  ;;  %v3264_v3 = vpop.f32.mrb[23].mxu1 }
 0x243   : > { %3292 = vst [vmem:[%s5749_s7 + $0x50] sm:$0xff] %v3196_v5  ;;  %v3199_v29 = vadd.f32 %v5745_v45, %v3198_v0  ;;  %v3200_v59 = vpop.f32.mrb[23].mxu0 }
 0x244   : > { %3309 = vst [vmem:[%s5749_s7 + $0xd8] sm:$0xff] %v3263_v27 }
 0x245   : > { %3293 = vst [vmem:[%s5749_s7 + $0x58] sm:$0xff] %v3199_v29 }
 0x268   : > { %v3267_v34 = vpop.f32.mrb[24].mxu1 }
 0x269   : > { %v3268_v41 = vadd.f32 %v5745_v45, %v3267_v34  ;;  %v3269_v60 = vpop.f32.mrb[25].mxu1 }
 0x26a   : > { %v3203_v63 = vpop.f32.mrb[24].mxu0  ;;  %v3270_v31 = vpop.f32.mrb[26].mxu1 }
 0x26b   : > { %v3204_v4 = vadd.f32 %v5745_v45, %v3203_v63  ;;  %v3205_v24 = vpop.f32.mrb[25].mxu0  ;;  %3310 = vst [vmem:[%s5749_s7 + $0xe0] sm:$0xff] %v3268_v41  ;;  %v3271_v37 = vadd.f32 %v5745_v45, %v3270_v31  ;;  %v3272_v49 = vpop.f32.mrb[27].mxu1 }
 0x26c   : > { %v3206_v44 = vpop.f32.mrb[26].mxu0 }
 0x26d   : > { %3294 = vst [vmem:[%s5749_s7 + $0x60] sm:$0xff] %v3204_v4  ;;  %v3207_v52 = vadd.f32 %v5745_v45, %v3206_v44  ;;  %v3208_v14 = vpop.f32.mrb[27].mxu0  ;;  %3311 = vst [vmem:[%s5749_s7 + $0xe8] sm:$0xff] %v3271_v37 }
 0x26f   : > { %3295 = vst [vmem:[%s5749_s7 + $0x68] sm:$0xff] %v3207_v52 }
 0x291   : > { %v3275_v48 = vpop.f32.mrb[28].mxu1 }
 0x292   : > { %v3276_v9 = vadd.f32 %v5745_v45, %v3275_v48  ;;  %v3277_v18 = vpop.f32.mrb[29].mxu1 }
 0x293   : > { %v3211_v46 = vpop.f32.mrb[28].mxu0  ;;  %v3278_v47 = vpop.f32.mrb[30].mxu1 }
 0x294   : > { %v3212_v40 = vadd.f32 %v5745_v45, %v3211_v46  ;;  %3312 = vst [vmem:[%s5749_s7 + $0xf0] sm:$0xff] %v3276_v9  ;;  %v3213_v20 = vpop.f32.mrb[29].mxu0  ;;  %v3279_v42 = vadd.f32 %v5745_v45, %v3278_v47  ;;  %v3280_v30 = vpop.f32.mrb[31].mxu1 }
 0x295   : > { %v3214_v7 = vpop.f32.mrb[30].mxu0 }
 0x296   : > { %3296 = vst [vmem:[%s5749_s7 + $0x70] sm:$0xff] %v3212_v40  ;;  %v3215_v10 = vadd.f32 %v5745_v45, %v3214_v7  ;;  %3313 = vst [vmem:[%s5749_s7 + $0xf8] sm:$0xff] %v3279_v42  ;;  %v3216_v53 = vpop.f32.mrb[31].mxu0 }
 0x298   : > { %3297 = vst [vmem:[%s5749_s7 + $0x78] sm:$0xff] %v3215_v10 }
 0x299   : > { %3958 = shalt.err (!%p3955_p5)
}
 0x29a   : > { %s3959_s27 = scalar_lea.hbm %s5834_s18, 4096  ;;  %s3963_s30 = scalar_lea.hbm %s5893_s3, 8192 }
 0x29b   : > { %p3960_p6 = scmp.ne.s32.totalorder %s5834_s18, %s3959_s27  ;;  %p3964_p10 = scmp.lt.u32.totalorder %s5834_s18, %s5893_s3 }
 0x29c   : > { %p3965_p11 = scmp.lt.u32.totalorder %s3963_s30, %s3959_s27  ;;  %p3967_p13 = scmp.lt.u32.totalorder %s3959_s27, %s5834_s18 }
 0x29d   : > { %p3961_p7 = pnand %p3960_p6, %p4096_p4 }
 0x29e   : > { %p3966_p12 = por %p3965_p11, %p3964_p10 }
 0x29f   : > { %p3962_p9 = pneg %p3961_p7 }
 0x2a0   : > { %p3968_p0 = por %p3967_p13, %p3966_p12 }
 0x2a2   : > { %p3969_p1 = pnand %p3968_p0, %p3962_p9 }
 0x2a4   : > { %3972 = shalt.err (!%p3969_p1)
}
 0x2a5   : > { %s4034_s6 = smov 128   ;;  %s4035_s7 = smov 8  }
 0x2a6   : > { %3791 = dma.vmem_to_hbm [thread:$0]  (%p4096_p4), %s5836_s9, 4096, %s5834_s18, %s5844_s15, %s4034_s6, %s4034_s6, %s4035_s7  }
 0x2a7 PF: > { %p3797_p2 = scmp.ge.s32.totalorder %s4023_s17, 2  ;;  %s3345_s8 = sand.u32 1, %s4003_s12  }
 0x2a8   : > { %s3346_s10 = scalar_lea.sflag [#allocation3], %s3345_s8 }
 0x2a9   : > { %p3794_p3 = pnand %p3797_p2, %p4103_p8 }
 0x2ab   : > { %3998 = dma.done.wait (!%p3794_p3), %s3346_s10, 4096  }
 0x2ac   : > { %4000 = vsyncadd (!%p3794_p3), %s3346_s10, 4294963200  ;;  %s16_s17 = sadd.s32 1, %s4023_s17   ;;  %s5934_s12 = smov %s4007_s13 }
 0x2ad   : > { %p13_p5 = scmp.ge.s32.totalorder %s16_s17, 4   ;;  %s5935_s13 = smov %s4011_s14 }
 0x2ae   : > { %s5936_s14 = smov %s4109_s25  ;;  %s5937_s15 = smov %s4019_s16 }
 0x2af   : > { %s5938_s16 = smov %s5940_s20  ;;  %15 = sbr.rel (!%p13_p5) target bundleno = 4 (0x4), region = 70 }
 0x2b6   :  { %3351 = vsyncpa [#allocation3], 1 }
 0x2b7   :  { %3353 = vsyncpa [#allocation3 + $0x1], 1 }

</bundles_post_ra>
